<compile_context>
chip_gen: v7x
topology: tpu7x:2x2x1
jax: 0.10.0
libtpu: 0.0.40
codegen_flags: <defaults>
</compile_context>

<pallas_src>
import functools
import math
from itertools import combinations

import numpy as np
import jax
import jax.numpy as jnp
from jax.experimental import pallas as pl
from jax.experimental.pallas import tpu as pltpu

VMEM = pltpu.MemorySpace.VMEM


def _vmem_specs(n):
    return [pl.BlockSpec(memory_space=VMEM)] * n


# ------------------------------ Pallas kernels -------------------------------

def _prep_kernel(xf_ref, wbig_ref, gpad_ref, pe_ref, o_ref):
    """Fused simplex lift + Raindrop aggregation + relayout + pe concat.

    xf   : (B, N*S)         per-batch row-major flattened x[:, b, :]    (bf16)
    wbig : (N*S, N*total)   kron(I_N, [R_u01 | R_u02 | inc01 @ R_u12])  (bf16)
    gpad : (N*total, 2T*E)  constant linear map folding the reference's
                            reshape -> (inc>thr)^T matmul -> view -> permute
                            -> concat chain; pe lanes are zero           (bf16)
    pe   : (B, 2T*E)        positional encoding scattered into the last
                            2*d_pe lanes of every timestep               (f32)
    out  : (B, 2T*E)        transformer input, row-major (t, feature)    (f32)
    """
    lift = jnp.maximum(
        jnp.dot(xf_ref[...], wbig_ref[...], preferred_element_type=jnp.float32),
        0.0)
    o_ref[...] = (jnp.dot(lift.astype(jnp.bfloat16), gpad_ref[...],
                          preferred_element_type=jnp.float32)
                  + pe_ref[...])


def pallas_prep(x_flat, w_big, g_pad, pe_pad):
    B = x_flat.shape[0]
    out_cols = g_pad.shape[1]
    return pl.pallas_call(
        _prep_kernel,
        out_shape=jax.ShapeDtypeStruct((B, out_cols), jnp.float32),
        in_specs=_vmem_specs(4),
        out_specs=pl.BlockSpec(memory_space=VMEM),
    )(x_flat.astype(jnp.bfloat16), w_big, g_pad, pe_pad)


def _layernorm(x, g, b, eps):
    mu = jnp.mean(x, axis=-1, keepdims=True)
    var = jnp.mean(jnp.square(x - mu), axis=-1, keepdims=True)
    return (x - mu) * jax.lax.rsqrt(var + eps) * g + b


def _encoder_kernel(x0_ref, wq_ref, wk_ref, wv_ref, bq_ref, bk_ref, bv_ref,
                    wo_ref, bo_ref, ln1g_ref, ln1b_ref,
                    w1_ref, b1_ref, w2_ref, b2_ref, ln2g_ref, ln2b_ref,
                    o_ref, carry_ref, *, s_seq, nb, n_heads, eps, ff_chunk):
    """Whole nn.TransformerEncoder: grid=(n_layers,), one layer per grid step.

    The activation is carried across layers in `carry_ref` (VMEM scratch, which
    persists across grid steps); all weights have constant index_maps so they
    are DMA'd once and stay resident.  Rows are laid out as row = s*nb + b
    (s = torch sequence index, b = torch batch index); attention is unrolled
    over the tiny static sequence axis so no in-kernel transposes are needed.
    """
    @pl.when(pl.program_id(0) == 0)
    def _():
        carry_ref[...] = x0_ref[...]

    x = carry_ref[...]                                    # (R, E) f32
    xb = x.astype(jnp.bfloat16)
    # 1/sqrt(head_dim) is folded into wq/bq at build time.
    q = jnp.dot(xb, wq_ref[...], preferred_element_type=jnp.float32) + bq_ref[...]
    k = jnp.dot(xb, wk_ref[...], preferred_element_type=jnp.float32) + bk_ref[...]
    v = jnp.dot(xb, wv_ref[...], preferred_element_type=jnp.float32) + bv_ref[...]

    e = x.shape[-1]
    hd = e // n_heads
    if n_heads == 1:
        masks = [None]
    else:
        lane = jax.lax.broadcasted_iota(jnp.int32, (1, e), 1)
        masks = [((lane >= h * hd) & (lane < (h + 1) * hd)).astype(jnp.float32)
                 for h in range(n_heads)]

    out_rows = []
    for i in range(s_seq):
        qi = q[i * nb:(i + 1) * nb, :]
        scores = []                                        # scores[j][h]: (nb, 1)
        for j in range(s_seq):
            kj = k[j * nb:(j + 1) * nb, :]
            prod = qi * kj
            scores.append([jnp.sum(prod if m is None else prod * m,
                                   axis=-1, keepdims=True) for m in masks])
        out_i = jnp.zeros((nb, e), jnp.float32)
        for h, m in enumerate(masks):
            mx = scores[0][h]
            for j in range(1, s_seq):
                mx = jnp.maximum(mx, scores[j][h])
            ex = [jnp.exp(scores[j][h] - mx) for j in range(s_seq)]
            denom = ex[0]
            for j in range(1, s_seq):
                denom = denom + ex[j]
            inv = pl.reciprocal(denom, approx=True)        # EUP slot
            for j in range(s_seq):
                vj = v[j * nb:(j + 1) * nb, :]
                if m is not None:
                    vj = vj * m
                out_i = out_i + (ex[j] * inv) * vj
        out_rows.append(out_i)
    attn = jnp.concatenate(out_rows, axis=0) if s_seq > 1 else out_rows[0]

    attn = jnp.dot(attn.astype(jnp.bfloat16), wo_ref[...],
                   preferred_element_type=jnp.float32) + bo_ref[...]
    h1 = _layernorm(x + attn, ln1g_ref[...], ln1b_ref[...], eps)

    # FFN chunked over d_ff: never materialize the (R, d_ff) f32 hidden slab.
    h1b = h1.astype(jnp.bfloat16)
    d_ff = w1_ref.shape[1]
    ff = jnp.zeros_like(x)
    for c0 in range(0, d_ff, ff_chunk):
        c1 = c0 + ff_chunk
        hid = jnp.maximum(
            jnp.dot(h1b, w1_ref[:, c0:c1], preferred_element_type=jnp.float32)
            + b1_ref[:, c0:c1], 0.0)
        ff = ff + jnp.dot(hid.astype(jnp.bfloat16), w2_ref[c0:c1, :],
                          preferred_element_type=jnp.float32)
    ff = ff + b2_ref[...]

    res = _layernorm(h1 + ff, ln2g_ref[...], ln2b_ref[...], eps)
    carry_ref[...] = res
    o_ref[...] = res


def pallas_encoder(enc_in, p, n_layers, s_seq, nb, n_heads, eps=1e-5,
                   ff_chunk=512):
    R, E = enc_in.shape
    d_ff = p["ff1_wt"].shape[1]
    assert d_ff % ff_chunk == 0
    kern = functools.partial(_encoder_kernel, s_seq=s_seq, nb=nb,
                             n_heads=n_heads, eps=eps, ff_chunk=ff_chunk)
    args = (enc_in, p["wq_t"], p["wk_t"], p["wv_t"], p["bq"], p["bk"], p["bv"],
            p["wo_t"], p["bo"], p["ln1_g"], p["ln1_b"],
            p["ff1_wt"], p["ff1_b"], p["ff2_wt"], p["ff2_b"],
            p["ln2_g"], p["ln2_b"])
    # All operands are 2-D; constant index maps => DMA once, stay resident.
    in_specs = [pl.BlockSpec(a.shape, lambda l: (0, 0)) for a in args]
    flops = int(2 * n_layers * R * E * (4 * E + 2 * d_ff))
    bytes_acc = int(sum(a.size * a.dtype.itemsize for a in args)
                    + n_layers * R * E * 4)
    return pl.pallas_call(
        kern,
        out_shape=jax.ShapeDtypeStruct((R, E), jnp.float32),
        grid=(n_layers,),
        in_specs=in_specs,
        out_specs=pl.BlockSpec((R, E), lambda l: (0, 0)),
        scratch_shapes=[pltpu.VMEM((R, E), jnp.float32)],
        compiler_params=pltpu.CompilerParams(
            dimension_semantics=("arbitrary",)),
        cost_estimate=pl.CostEstimate(
            flops=flops,
            transcendentals=int(n_layers * (R * s_seq * n_heads + 2 * R)),
            bytes_accessed=bytes_acc),
    )(*args)


def _head_kernel(src_ref, pool_ref, static_ref, embw_ref, embb_ref,
                 w1a_ref, w1b_ref, b1_ref, w2_ref, b2_ref, o_ref):
    # sum-pool over the torch-batch (time) axis expressed as a matmul, static
    # embedding, and the 2-layer MLP head, fused into one kernel.  mlp1 is
    # applied to concat([pooled, emb], -1) without an in-kernel lane concat.
    pooled = jnp.dot(pool_ref[...], src_ref[...].astype(jnp.bfloat16),
                     preferred_element_type=jnp.float32)
    emb = jnp.dot(static_ref[...], embw_ref[...],
                  preferred_element_type=jnp.float32) + embb_ref[...]
    hid = jnp.maximum(
        jnp.dot(pooled.astype(jnp.bfloat16), w1a_ref[...],
                preferred_element_type=jnp.float32)
        + jnp.dot(emb.astype(jnp.bfloat16), w1b_ref[...],
                  preferred_element_type=jnp.float32)
        + b1_ref[...], 0.0)
    o_ref[...] = jnp.dot(hid.astype(jnp.bfloat16), w2_ref[...],
                         preferred_element_type=jnp.float32) + b2_ref[...]


def pallas_head(src, pool, static, p):
    args = (src, pool, static.astype(jnp.bfloat16), p["emb_wt"], p["emb_b"],
            p["mlp1_wt_a"], p["mlp1_wt_b"], p["mlp1_b"], p["mlp2_wt"],
            p["mlp2_b"])
    B = static.shape[0]
    n_classes = p["mlp2_wt"].shape[1]
    return pl.pallas_call(
        _head_kernel,
        out_shape=jax.ShapeDtypeStruct((B, n_classes), jnp.float32),
        in_specs=_vmem_specs(len(args)),
        out_specs=pl.BlockSpec(memory_space=VMEM),
    )(*args)


# ------------------------- module construction (glue) ------------------------

def build_incidence(n_sens):
    zero_cells = [(i,) for i in range(n_sens)]
    one_cells = list(combinations(range(n_sens), 2))
    two_cells = list(combinations(range(n_sens), 3))
    n_c01 = len(one_cells)
    n_c02 = len(two_cells)
    n_c12 = len(list(combinations(range(n_c01), 3)))
    inc01 = np.zeros((n_sens, n_c01), np.float32)
    inc02 = np.zeros((n_sens, n_c02), np.float32)
    inc12 = np.zeros((n_c01, n_c12), np.float32)   # only first len(two_cells) cols filled (faithful)
    for i, z in enumerate(zero_cells):
        for j, o in enumerate(one_cells):
            if set(z).issubset(set(o)):
                inc01[i, j] = 1.0
        for j, t in enumerate(two_cells):
            if set(z).issubset(set(t)):
                inc02[i, j] = 1.0
    for i, o in enumerate(one_cells):
        for j, t in enumerate(two_cells):
            if set(o).issubset(set(t)):
                inc12[i, j] = 1.0
    return inc01, inc02, inc12, n_c01, n_c02, n_c12


def build_g_pad(inc01, inc02, inc12, n_sens, d_ob, N, d_pe, threshold):
    """Constant linear map folding the reference's per-batch Raindrop chain.

    Maps flatten(relu(x_b @ W_lift))  (row-major (n, cell), length N*total)
    to the transformer-input feature block for batch b, laid out row-major as
    (t, feature) with the trailing 2*d_pe pe lanes left zero.
    """
    n_c01, n_c02, n_c12 = inc01.shape[1], inc02.shape[1], inc12.shape[1]
    ranks = [(n_c01, n_sens, (inc01 > threshold).astype(np.float32)),
             (n_c02, n_sens, (inc02 > threshold).astype(np.float32)),
             (n_c12, n_c01, (inc12 > threshold).astype(np.float32))]
    total = n_c01 + n_c02 + n_c12
    feat = sum(nc // d_ob for nc, _, _ in ranks)
    two_t = N * d_ob
    e_dim = feat + 2 * d_pe

    def chain(lift_b):                                   # (N, total) -> (2T, feat)
        outs, off = [], 0
        for n_cells, n_src, mth in ranks:
            lb = lift_b[:, off:off + n_cells]
            off += n_cells
            u = lb.reshape(n_cells, N)[:n_src]           # reference's row-major reinterpretation
            agg = mth.T @ u                              # Raindrop default add-aggregation
            v = agg.reshape(n_cells // d_ob, two_t)      # out.view(-1, 2*max_len)
            outs.append(v.T)                             # out.permute(1, 2, 0) per batch
        return np.concatenate(outs, axis=-1)

    g = np.zeros((N * total, two_t * e_dim), np.float32)
    basis = np.zeros((N, total), np.float32)
    for idx in range(N * total):
        basis.flat[idx] = 1.0
        buf = np.zeros((two_t, e_dim), np.float32)
        buf[:, :feat] = chain(basis)
        g[idx] = buf.reshape(-1)
        basis.flat[idx] = 0.0
    return g                                             # entries are exactly 0/1


def build_droptop_params(key, n_sens, d_model, n_layers, n_heads, n_classes,
                         d_static, max_len, threshold=0.2):
    d_ob = d_model // n_sens
    d_pe = 1
    d_tr = 2 * d_model + d_pe
    assert d_tr % n_heads == 0, "embed_dim must be divisible by num_heads"
    fin_dim = d_tr + n_sens
    d_ff = 2048                          # nn.TransformerEncoderLayer default
    N = (2 * max_len) // d_ob
    two_t = 2 * max_len

    inc01, inc02, inc12, n_c01, n_c02, n_c12 = build_incidence(n_sens)
    feat = n_c01 // d_ob + n_c02 // d_ob + n_c12 // d_ob
    assert feat + 2 * d_pe == d_tr, "concat dim must equal transformer d_model"

    ks = jax.random.split(key, 17)

    def init(k, shape, scale=0.1):
        return scale * jax.random.normal(k, shape, jnp.float32)

    R_u01 = init(ks[0], (n_sens, n_c01))
    R_u02 = init(ks[1], (n_sens, n_c02))
    R_u12 = init(ks[2], (n_c01, n_c12))
    inc01_j = jnp.asarray(inc01)
    # fused lift weight: relu(x @ [R_u01 | R_u02 | inc01 @ R_u12])
    W_lift = jnp.concatenate([R_u01, R_u02, inc01_j @ R_u12], axis=1)
    W_big = jnp.kron(jnp.eye(N, dtype=jnp.float32), W_lift)     # (N*S, N*total)
    G_pad = build_g_pad(inc01, inc02, inc12, n_sens, d_ob, N, d_pe, threshold)

    emb_w = init(ks[3], (n_sens, d_static))
    emb_b = init(ks[4], (n_sens,))

    in_proj_w = init(ks[5], (3 * d_tr, d_tr))
    in_proj_b = init(ks[6], (3 * d_tr,))
    out_proj_w = init(ks[7], (d_tr, d_tr))
    out_proj_b = init(ks[8], (d_tr,))
    ff1_w = init(ks[9], (d_ff, d_tr))
    ff1_b = init(ks[10], (d_ff,))
    ff2_w = init(ks[11], (d_tr, d_ff))
    ff2_b = init(ks[12], (d_tr,))
    mlp1_w = init(ks[13], (fin_dim, fin_dim))
    mlp1_b = init(ks[14], (fin_dim,))
    mlp2_w = init(ks[15], (n_classes, fin_dim))
    mlp2_b = init(ks[16], (n_classes,))

    scale = 1.0 / math.sqrt(d_tr // n_heads)       # folded into wq_t / bq
    bf = jnp.bfloat16
    mlp1_wt = mlp1_w.T

    return dict(
        n_sens=n_sens, d_model=d_model, d_ob=d_ob, d_pe=d_pe, d_tr=d_tr,
        n_layers=n_layers, n_heads=n_heads, max_len=max_len, two_t=two_t, N=N,
        n_c01=n_c01, n_c02=n_c02, n_c12=n_c12, threshold=threshold,
        # fused / precomputed operands (transposes, masks, relayout map, scale
        # folding and bf16 casts all done once here)
        W_big=W_big.astype(bf),
        G_pad=jnp.asarray(G_pad).astype(bf),
        emb_wt=emb_w.T.astype(bf), emb_b=emb_b.reshape(1, n_sens),
        wq_t=(in_proj_w[:d_tr].T * scale).astype(bf),
        wk_t=in_proj_w[d_tr:2 * d_tr].T.astype(bf),
        wv_t=in_proj_w[2 * d_tr:].T.astype(bf),
        bq=(in_proj_b[:d_tr] * scale).reshape(1, d_tr),
        bk=in_proj_b[d_tr:2 * d_tr].reshape(1, d_tr),
        bv=in_proj_b[2 * d_tr:].reshape(1, d_tr),
        wo_t=out_proj_w.T.astype(bf), bo=out_proj_b.reshape(1, d_tr),
        ff1_wt=ff1_w.T.astype(bf), ff1_b=ff1_b.reshape(1, d_ff),
        ff2_wt=ff2_w.T.astype(bf), ff2_b=ff2_b.reshape(1, d_tr),
        ln1_g=jnp.ones((1, d_tr), jnp.float32),
        ln1_b=jnp.zeros((1, d_tr), jnp.float32),
        ln2_g=jnp.ones((1, d_tr), jnp.float32),
        ln2_b=jnp.zeros((1, d_tr), jnp.float32),
        mlp1_wt_a=mlp1_wt[:d_tr].astype(bf), mlp1_wt_b=mlp1_wt[d_tr:].astype(bf),
        mlp1_b=mlp1_b.reshape(1, fin_dim),
        mlp2_wt=mlp2_w.T.astype(bf), mlp2_b=mlp2_b.reshape(1, n_classes),
    )


# ------------------------------- forward pass --------------------------------

def droptop_forward(p, x, times, static):
    # x: (N, B, n_sens) ; times: (T, B, 1) ; static: (B, d_static)
    N, B, S = x.shape
    E = p["d_tr"]
    d_pe = p["d_pe"]
    two_t = N * p["d_ob"]
    feat = E - 2 * d_pe
    assert N == p["N"] and two_t == p["two_t"]
    assert 2 * times.shape[0] == two_t            # pe rows must match concat dim

    # --- PositionalEncodingTF (d_pe = 1): tiny plain-jnp glue (no launch) ----
    timescales = jnp.asarray(500.0 ** np.linspace(0.0, 1.0, d_pe), jnp.float32)
    scaled = times.astype(jnp.float32)[:, :, None, :] / timescales   # (T,B,1,K)
    pe = jnp.concatenate([jnp.sin(scaled), jnp.cos(scaled)], axis=-1)  # (T,B,1,2K)
    pe = jnp.transpose(pe, (1, 0, 2, 3))                               # (B,T,1,2K)
    pe = jnp.concatenate([pe, pe], axis=1)                             # (B,2T,1,2K)
    pe = jnp.squeeze(jnp.transpose(pe, (0, 1, 3, 2)), axis=-1)         # (B,2T,2K)
    pe_pad = jnp.concatenate(
        [jnp.zeros((B, two_t, feat), jnp.float32), pe], axis=-1
    ).reshape(B, two_t * E)

    # --- fused lift + Raindrop aggregation + relayout + pe concat: ONE call --
    # TODO(synk): nn.Dropout omitted (eval-mode identity, no RNG masking).
    x_flat = jnp.transpose(x, (1, 0, 2)).reshape(B, N * S)
    enc_in = pallas_prep(x_flat, p["W_big"], p["G_pad"], pe_pad)
    enc_in = enc_in.reshape(B * two_t, E)          # row = seq(b)*2T + batch(t)

    # --- TransformerEncoder: ONE pallas_call, grid over layers ---------------
    src = pallas_encoder(enc_in, p, p["n_layers"], s_seq=B, nb=two_t,
                         n_heads=p["n_heads"])

    # --- fused head: sum-pool (as matmul) + static emb + 2-layer MLP ---------
    pool_np = np.zeros((B, B * two_t), np.float32)
    for b in range(B):
        pool_np[b, b * two_t:(b + 1) * two_t] = 1.0
    pool = jnp.asarray(pool_np).astype(jnp.bfloat16)
    return pallas_head(src, pool, static, p)


# ----------------------------------- main ------------------------------------

if __name__ == "__main__":
    n_sens, d_model = 4, 8
    n_layers, n_heads = 2, 1
    n_classes, d_static = 2, 3
    N, B = 8, 2                                   # x is (N, B, n_sens)
    d_ob = d_model // n_sens
    max_len = (N * d_ob) // 2                     # keeps Raindrop's view() consistent

    key = jax.random.PRNGKey(0)
    kx, ks, kp = jax.random.split(key, 3)
    x = jax.random.normal(kx, (N, B, n_sens), jnp.float32)
    # times must be 3-D (T, B, 1) for PositionalEncodingTF's permute(1,0,2,3)
    times = jnp.tile(jnp.arange(N, dtype=jnp.float32)[:, None, None], (1, B, 1))
    static = jax.random.normal(ks, (B, d_static), jnp.float32)

    params = build_droptop_params(kp, n_sens, d_model, n_layers, n_heads,
                                  n_classes, d_static, max_len)

    # shape-consistency guards implied by the reference forward
    assert N * d_ob == 2 * max_len
    assert 2 * N == N * d_ob                      # pe rows == Raindrop rows

    fwd = jax.jit(functools.partial(droptop_forward, params))
    logits = fwd(x, times, static)
    jax.block_until_ready(logits)
    assert logits.shape == (B, n_classes)
    print("KERNEL_OK")
</pallas_src>

<mosaic_0001>
module attributes {stable_mosaic.version = 11 : i64} {
  func.func @_prep_kernel(%arg0: memref<2x32xbf16, #tpu.memory_space<vmem>>, %arg1: memref<32x240xbf16, #tpu.memory_space<vmem>>, %arg2: memref<240x272xbf16, #tpu.memory_space<vmem>>, %arg3: memref<2x272xf32, #tpu.memory_space<vmem>>, %arg4: memref<2x272xf32, #tpu.memory_space<vmem>>) attributes {dimension_semantics = [], scalar_prefetch = 0 : i64, scratch_operands = 0 : i64, tpu.core_type = #tpu.core_type<tc>} {
    %c0 = arith.constant 0 : index
    %c0_0 = arith.constant 0 : index
    %0 = vector.load %arg0[%c0, %c0_0] : memref<2x32xbf16, #tpu.memory_space<vmem>>, vector<2x32xbf16>
    %c0_1 = arith.constant 0 : index
    %c0_2 = arith.constant 0 : index
    %1 = vector.load %arg1[%c0_1, %c0_2] : memref<32x240xbf16, #tpu.memory_space<vmem>>, vector<32x240xbf16>
    %cst = arith.constant dense<0.000000e+00> : vector<2x240xf32>
    %2 = tpu.matmul %0, %1, %cst {dimension_numbers = #tpu.dot_dimension_numbers<[1], [0], [0], [1], [0, 0, 1, 1], [], []>} : vector<2x32xbf16>, vector<32x240xbf16>, vector<2x240xf32> -> vector<2x240xf32>
    %cst_3 = arith.constant 0.000000e+00 : f32
    %3 = vector.broadcast %cst_3 : f32 to vector<2x240xf32>
    %4 = arith.maximumf %2, %3 : vector<2x240xf32>
    %5 = arith.truncf %4 : vector<2x240xf32> to vector<2x240xbf16>
    %c0_4 = arith.constant 0 : index
    %c0_5 = arith.constant 0 : index
    %6 = vector.load %arg2[%c0_4, %c0_5] : memref<240x272xbf16, #tpu.memory_space<vmem>>, vector<240x272xbf16>
    %cst_6 = arith.constant dense<0.000000e+00> : vector<2x272xf32>
    %7 = tpu.matmul %5, %6, %cst_6 {dimension_numbers = #tpu.dot_dimension_numbers<[1], [0], [0], [1], [0, 0, 1, 1], [], []>} : vector<2x240xbf16>, vector<240x272xbf16>, vector<2x272xf32> -> vector<2x272xf32>
    %c0_7 = arith.constant 0 : index
    %c0_8 = arith.constant 0 : index
    %8 = vector.load %arg3[%c0_7, %c0_8] : memref<2x272xf32, #tpu.memory_space<vmem>>, vector<2x272xf32>
    %9 = arith.addf %7, %8 : vector<2x272xf32>
    %c0_9 = arith.constant 0 : index
    %c0_10 = arith.constant 0 : index
    %10 = vector.load %arg4[%c0_9, %c0_10] : memref<2x272xf32, #tpu.memory_space<vmem>>, vector<2x272xf32>
    tpu.vector_store %arg4[%c0_9, %c0_10], %9 {strides = array<i32>} : memref<2x272xf32, #tpu.memory_space<vmem>>, vector<2x272xf32>,
    return
  }
}

module attributes {stable_mosaic.version = 11 : i64} {
  func.func @_head_kernel(%arg0: memref<32x17xf32, #tpu.memory_space<vmem>>, %arg1: memref<2x32xbf16, #tpu.memory_space<vmem>>, %arg2: memref<2x3xbf16, #tpu.memory_space<vmem>>, %arg3: memref<3x4xbf16, #tpu.memory_space<vmem>>, %arg4: memref<1x4xf32, #tpu.memory_space<vmem>>, %arg5: memref<17x21xbf16, #tpu.memory_space<vmem>>, %arg6: memref<4x21xbf16, #tpu.memory_space<vmem>>, %arg7: memref<1x21xf32, #tpu.memory_space<vmem>>, %arg8: memref<21x2xbf16, #tpu.memory_space<vmem>>, %arg9: memref<1x2xf32, #tpu.memory_space<vmem>>, %arg10: memref<2x2xf32, #tpu.memory_space<vmem>>) attributes {dimension_semantics = [], scalar_prefetch = 0 : i64, scratch_operands = 0 : i64, tpu.core_type = #tpu.core_type<tc>} {
    %c0 = arith.constant 0 : index
    %c0_0 = arith.constant 0 : index
    %0 = vector.load %arg1[%c0, %c0_0] : memref<2x32xbf16, #tpu.memory_space<vmem>>, vector<2x32xbf16>
    %c0_1 = arith.constant 0 : index
    %c0_2 = arith.constant 0 : index
    %1 = vector.load %arg0[%c0_1, %c0_2] : memref<32x17xf32, #tpu.memory_space<vmem>>, vector<32x17xf32>
    %2 = arith.truncf %1 : vector<32x17xf32> to vector<32x17xbf16>
    %cst = arith.constant dense<0.000000e+00> : vector<2x17xf32>
    %3 = tpu.matmul %0, %2, %cst {dimension_numbers = #tpu.dot_dimension_numbers<[1], [0], [0], [1], [0, 0, 1, 1], [], []>} : vector<2x32xbf16>, vector<32x17xbf16>, vector<2x17xf32> -> vector<2x17xf32>
    %c0_3 = arith.constant 0 : index
    %c0_4 = arith.constant 0 : index
    %4 = vector.load %arg2[%c0_3, %c0_4] : memref<2x3xbf16, #tpu.memory_space<vmem>>, vector<2x3xbf16>
    %c0_5 = arith.constant 0 : index
    %c0_6 = arith.constant 0 : index
    %5 = vector.load %arg3[%c0_5, %c0_6] : memref<3x4xbf16, #tpu.memory_space<vmem>>, vector<3x4xbf16>
    %cst_7 = arith.constant dense<0.000000e+00> : vector<2x4xf32>
    %6 = tpu.matmul %4, %5, %cst_7 {dimension_numbers = #tpu.dot_dimension_numbers<[1], [0], [0], [1], [0, 0, 1, 1], [], []>} : vector<2x3xbf16>, vector<3x4xbf16>, vector<2x4xf32> -> vector<2x4xf32>
    %c0_8 = arith.constant 0 : index
    %c0_9 = arith.constant 0 : index
    %7 = vector.load %arg4[%c0_8, %c0_9] : memref<1x4xf32, #tpu.memory_space<vmem>>, vector<1x4xf32>
    %8 = vector.broadcast %7 : vector<1x4xf32> to vector<2x4xf32>
    %9 = arith.addf %6, %8 : vector<2x4xf32>
    %10 = arith.truncf %3 : vector<2x17xf32> to vector<2x17xbf16>
    %c0_10 = arith.constant 0 : index
    %c0_11 = arith.constant 0 : index
    %11 = vector.load %arg5[%c0_10, %c0_11] : memref<17x21xbf16, #tpu.memory_space<vmem>>, vector<17x21xbf16>
    %cst_12 = arith.constant dense<0.000000e+00> : vector<2x21xf32>
    %12 = tpu.matmul %10, %11, %cst_12 {dimension_numbers = #tpu.dot_dimension_numbers<[1], [0], [0], [1], [0, 0, 1, 1], [], []>} : vector<2x17xbf16>, vector<17x21xbf16>, vector<2x21xf32> -> vector<2x21xf32>
    %13 = arith.truncf %9 : vector<2x4xf32> to vector<2x4xbf16>
    %c0_13 = arith.constant 0 : index
    %c0_14 = arith.constant 0 : index
    %14 = vector.load %arg6[%c0_13, %c0_14] : memref<4x21xbf16, #tpu.memory_space<vmem>>, vector<4x21xbf16>
    %cst_15 = arith.constant dense<0.000000e+00> : vector<2x21xf32>
    %15 = tpu.matmul %13, %14, %cst_15 {dimension_numbers = #tpu.dot_dimension_numbers<[1], [0], [0], [1], [0, 0, 1, 1], [], []>} : vector<2x4xbf16>, vector<4x21xbf16>, vector<2x21xf32> -> vector<2x21xf32>
    %16 = arith.addf %12, %15 : vector<2x21xf32>
    %c0_16 = arith.constant 0 : index
    %c0_17 = arith.constant 0 : index
    %17 = vector.load %arg7[%c0_16, %c0_17] : memref<1x21xf32, #tpu.memory_space<vmem>>, vector<1x21xf32>
    %18 = vector.broadcast %17 : vector<1x21xf32> to vector<2x21xf32>
    %19 = arith.addf %16, %18 : vector<2x21xf32>
    %cst_18 = arith.constant 0.000000e+00 : f32
    %20 = vector.broadcast %cst_18 : f32 to vector<2x21xf32>
    %21 = arith.maximumf %19, %20 : vector<2x21xf32>
    %22 = arith.truncf %21 : vector<2x21xf32> to vector<2x21xbf16>
    %c0_19 = arith.constant 0 : index
    %c0_20 = arith.constant 0 : index
    %23 = vector.load %arg8[%c0_19, %c0_20] : memref<21x2xbf16, #tpu.memory_space<vmem>>, vector<21x2xbf16>
    %cst_21 = arith.constant dense<0.000000e+00> : vector<2x2xf32>
    %24 = tpu.matmul %22, %23, %cst_21 {dimension_numbers = #tpu.dot_dimension_numbers<[1], [0], [0], [1], [0, 0, 1, 1], [], []>} : vector<2x21xbf16>, vector<21x2xbf16>, vector<2x2xf32> -> vector<2x2xf32>
    %c0_22 = arith.constant 0 : index
    %c0_23 = arith.constant 0 : index
    %25 = vector.load %arg9[%c0_22, %c0_23] : memref<1x2xf32, #tpu.memory_space<vmem>>, vector<1x2xf32>
    %26 = vector.broadcast %25 : vector<1x2xf32> to vector<2x2xf32>
    %27 = arith.addf %24, %26 : vector<2x2xf32>
    %c0_24 = arith.constant 0 : index
    %c0_25 = arith.constant 0 : index
    %28 = vector.load %arg10[%c0_24, %c0_25] : memref<2x2xf32, #tpu.memory_space<vmem>>, vector<2x2xf32>
    tpu.vector_store %arg10[%c0_24, %c0_25], %27 {strides = array<i32>} : memref<2x2xf32, #tpu.memory_space<vmem>>, vector<2x2xf32>,
    return
  }
}

module attributes {stable_mosaic.version = 11 : i64} {
  func.func @_encoder_kernel(%arg0: i32, %arg1: memref<32x17xf32, #tpu.memory_space<vmem>>, %arg2: memref<17x17xbf16, #tpu.memory_space<vmem>>, %arg3: memref<17x17xbf16, #tpu.memory_space<vmem>>, %arg4: memref<17x17xbf16, #tpu.memory_space<vmem>>, %arg5: memref<1x17xf32, #tpu.memory_space<vmem>>, %arg6: memref<1x17xf32, #tpu.memory_space<vmem>>, %arg7: memref<1x17xf32, #tpu.memory_space<vmem>>, %arg8: memref<17x17xbf16, #tpu.memory_space<vmem>>, %arg9: memref<1x17xf32, #tpu.memory_space<vmem>>, %arg10: memref<1x17xf32, #tpu.memory_space<vmem>>, %arg11: memref<1x17xf32, #tpu.memory_space<vmem>>, %arg12: memref<17x2048xbf16, #tpu.memory_space<vmem>>, %arg13: memref<1x2048xf32, #tpu.memory_space<vmem>>, %arg14: memref<2048x17xbf16, #tpu.memory_space<vmem>>, %arg15: memref<1x17xf32, #tpu.memory_space<vmem>>, %arg16: memref<1x17xf32, #tpu.memory_space<vmem>>, %arg17: memref<1x17xf32, #tpu.memory_space<vmem>>, %arg18: memref<32x17xf32, #tpu.memory_space<vmem>>, %arg19: memref<32x17xf32, #tpu.memory_space<vmem>>) attributes {dimension_semantics = [#tpu.dimension_semantics<arbitrary>], iteration_bounds = array<i64: 2>, scalar_prefetch = 0 : i64, scratch_operands = 1 : i64, tpu.core_type = #tpu.core_type<tc>, window_params = [{pipeline_mode = #tpu.pipeline_mode<synchronous>, transform_indices = @transform_0, window_bounds = array<i64: 32, 17>}, {pipeline_mode = #tpu.pipeline_mode<synchronous>, transform_indices = @transform_1, window_bounds = array<i64: 17, 17>}, {pipeline_mode = #tpu.pipeline_mode<synchronous>, transform_indices = @transform_2, window_bounds = array<i64: 17, 17>}, {pipeline_mode = #tpu.pipeline_mode<synchronous>, transform_indices = @transform_3, window_bounds = array<i64: 17, 17>}, {pipeline_mode = #tpu.pipeline_mode<synchronous>, transform_indices = @transform_4, window_bounds = array<i64: 1, 17>}, {pipeline_mode = #tpu.pipeline_mode<synchronous>, transform_indices = @transform_5, window_bounds = array<i64: 1, 17>}, {pipeline_mode = #tpu.pipeline_mode<synchronous>, transform_indices = @transform_6, window_bounds = array<i64: 1, 17>}, {pipeline_mode = #tpu.pipeline_mode<synchronous>, transform_indices = @transform_7, window_bounds = array<i64: 17, 17>}, {pipeline_mode = #tpu.pipeline_mode<synchronous>, transform_indices = @transform_8, window_bounds = array<i64: 1, 17>}, {pipeline_mode = #tpu.pipeline_mode<synchronous>, transform_indices = @transform_9, window_bounds = array<i64: 1, 17>}, {pipeline_mode = #tpu.pipeline_mode<synchronous>, transform_indices = @transform_10, window_bounds = array<i64: 1, 17>}, {pipeline_mode = #tpu.pipeline_mode<synchronous>, transform_indices = @transform_11, window_bounds = array<i64: 17, 2048>}, {pipeline_mode = #tpu.pipeline_mode<synchronous>, transform_indices = @transform_12, window_bounds = array<i64: 1, 2048>}, {pipeline_mode = #tpu.pipeline_mode<synchronous>, transform_indices = @transform_13, window_bounds = array<i64: 2048, 17>}, {pipeline_mode = #tpu.pipeline_mode<synchronous>, transform_indices = @transform_14, window_bounds = array<i64: 1, 17>}, {pipeline_mode = #tpu.pipeline_mode<synchronous>, transform_indices = @transform_15, window_bounds = array<i64: 1, 17>}, {pipeline_mode = #tpu.pipeline_mode<synchronous>, transform_indices = @transform_16, window_bounds = array<i64: 1, 17>}, {pipeline_mode = #tpu.pipeline_mode<synchronous>, transform_indices = @transform_17, window_bounds = array<i64: 32, 17>}]} {
    %c0_i32 = arith.constant 0 : i32
    %0 = arith.cmpi eq, %arg0, %c0_i32 : i32
    %1 = arith.extui %0 : i1 to i32
    %c0_i32_0 = arith.constant 0 : i32
    %2 = arith.cmpi ne, %1, %c0_i32_0 : i32
    scf.if %2 {
      %c0_85 = arith.constant 0 : index
      %c0_86 = arith.constant 0 : index
      %182 = vector.load %arg1[%c0_85, %c0_86] : memref<32x17xf32, #tpu.memory_space<vmem>>, vector<32x17xf32>
      %c0_87 = arith.constant 0 : index
      %c0_88 = arith.constant 0 : index
      %183 = vector.load %arg19[%c0_87, %c0_88] : memref<32x17xf32, #tpu.memory_space<vmem>>, vector<32x17xf32>
      tpu.vector_store %arg19[%c0_87, %c0_88], %182 {strides = array<i32>} : memref<32x17xf32, #tpu.memory_space<vmem>>, vector<32x17xf32>,
    } else {
    }
    %c0 = arith.constant 0 : index
    %c0_1 = arith.constant 0 : index
    %3 = vector.load %arg19[%c0, %c0_1] : memref<32x17xf32, #tpu.memory_space<vmem>>, vector<32x17xf32>
    %4 = arith.truncf %3 : vector<32x17xf32> to vector<32x17xbf16>
    %c0_2 = arith.constant 0 : index
    %c0_3 = arith.constant 0 : index
    %5 = vector.load %arg2[%c0_2, %c0_3] : memref<17x17xbf16, #tpu.memory_space<vmem>>, vector<17x17xbf16>
    %cst = arith.constant dense<0.000000e+00> : vector<32x17xf32>
    %6 = tpu.matmul %4, %5, %cst {dimension_numbers = #tpu.dot_dimension_numbers<[1], [0], [0], [1], [0, 0, 1, 1], [], []>} : vector<32x17xbf16>, vector<17x17xbf16>, vector<32x17xf32> -> vector<32x17xf32>
    %c0_4 = arith.constant 0 : index
    %c0_5 = arith.constant 0 : index
    %7 = vector.load %arg5[%c0_4, %c0_5] : memref<1x17xf32, #tpu.memory_space<vmem>>, vector<1x17xf32>
    %8 = vector.broadcast %7 : vector<1x17xf32> to vector<32x17xf32>
    %9 = arith.addf %6, %8 : vector<32x17xf32>
    %c0_6 = arith.constant 0 : index
    %c0_7 = arith.constant 0 : index
    %10 = vector.load %arg3[%c0_6, %c0_7] : memref<17x17xbf16, #tpu.memory_space<vmem>>, vector<17x17xbf16>
    %cst_8 = arith.constant dense<0.000000e+00> : vector<32x17xf32>
    %11 = tpu.matmul %4, %10, %cst_8 {dimension_numbers = #tpu.dot_dimension_numbers<[1], [0], [0], [1], [0, 0, 1, 1], [], []>} : vector<32x17xbf16>, vector<17x17xbf16>, vector<32x17xf32> -> vector<32x17xf32>
    %c0_9 = arith.constant 0 : index
    %c0_10 = arith.constant 0 : index
    %12 = vector.load %arg6[%c0_9, %c0_10] : memref<1x17xf32, #tpu.memory_space<vmem>>, vector<1x17xf32>
    %13 = vector.broadcast %12 : vector<1x17xf32> to vector<32x17xf32>
    %14 = arith.addf %11, %13 : vector<32x17xf32>
    %c0_11 = arith.constant 0 : index
    %c0_12 = arith.constant 0 : index
    %15 = vector.load %arg4[%c0_11, %c0_12] : memref<17x17xbf16, #tpu.memory_space<vmem>>, vector<17x17xbf16>
    %cst_13 = arith.constant dense<0.000000e+00> : vector<32x17xf32>
    %16 = tpu.matmul %4, %15, %cst_13 {dimension_numbers = #tpu.dot_dimension_numbers<[1], [0], [0], [1], [0, 0, 1, 1], [], []>} : vector<32x17xbf16>, vector<17x17xbf16>, vector<32x17xf32> -> vector<32x17xf32>
    %c0_14 = arith.constant 0 : index
    %c0_15 = arith.constant 0 : index
    %17 = vector.load %arg7[%c0_14, %c0_15] : memref<1x17xf32, #tpu.memory_space<vmem>>, vector<1x17xf32>
    %18 = vector.broadcast %17 : vector<1x17xf32> to vector<32x17xf32>
    %19 = arith.addf %16, %18 : vector<32x17xf32>
    %20 = vector.extract_strided_slice %9 {offsets = [0, 0], sizes = [16, 17], strides = [1, 1]} : vector<32x17xf32> to vector<16x17xf32>
    %21 = vector.extract_strided_slice %14 {offsets = [0, 0], sizes = [16, 17], strides = [1, 1]} : vector<32x17xf32> to vector<16x17xf32>
    %22 = arith.mulf %20, %21 : vector<16x17xf32>
    %cst_16 = arith.constant dense<0.000000e+00> : vector<16xf32>
    %23 = vector.multi_reduction <add>, %22, %cst_16 [1] : vector<16x17xf32> to vector<16xf32>
    %24 = vector.shape_cast %23 : vector<16xf32> to vector<16x1xf32>
    %25 = vector.extract_strided_slice %14 {offsets = [16, 0], sizes = [16, 17], strides = [1, 1]} : vector<32x17xf32> to vector<16x17xf32>
    %26 = arith.mulf %20, %25 : vector<16x17xf32>
    %cst_17 = arith.constant dense<0.000000e+00> : vector<16xf32>
    %27 = vector.multi_reduction <add>, %26, %cst_17 [1] : vector<16x17xf32> to vector<16xf32>
    %28 = vector.shape_cast %27 : vector<16xf32> to vector<16x1xf32>
    %cst_18 = arith.constant 0.000000e+00 : f32
    %29 = vector.broadcast %cst_18 : f32 to vector<16x17xf32>
    %30 = arith.maximumf %24, %28 : vector<16x1xf32>
    %31 = arith.subf %24, %30 : vector<16x1xf32>
    %32 = math.exp %31 : vector<16x1xf32>
    %33 = arith.subf %28, %30 : vector<16x1xf32>
    %34 = math.exp %33 : vector<16x1xf32>
    %35 = arith.addf %32, %34 : vector<16x1xf32>
    %36 = tpu.reciprocal %35 {approx = true} : vector<16x1xf32> -> vector<16x1xf32>
    %37 = vector.extract_strided_slice %19 {offsets = [0, 0], sizes = [16, 17], strides = [1, 1]} : vector<32x17xf32> to vector<16x17xf32>
    %38 = arith.mulf %32, %36 : vector<16x1xf32>
    %39 = vector.broadcast %38 : vector<16x1xf32> to vector<16x17xf32>
    %40 = arith.mulf %39, %37 : vector<16x17xf32>
    %41 = arith.addf %29, %40 : vector<16x17xf32>
    %42 = vector.extract_strided_slice %19 {offsets = [16, 0], sizes = [16, 17], strides = [1, 1]} : vector<32x17xf32> to vector<16x17xf32>
    %43 = arith.mulf %34, %36 : vector<16x1xf32>
    %44 = vector.broadcast %43 : vector<16x1xf32> to vector<16x17xf32>
    %45 = arith.mulf %44, %42 : vector<16x17xf32>
    %46 = arith.addf %41, %45 : vector<16x17xf32>
    %47 = vector.extract_strided_slice %9 {offsets = [16, 0], sizes = [16, 17], strides = [1, 1]} : vector<32x17xf32> to vector<16x17xf32>
    %48 = vector.extract_strided_slice %14 {offsets = [0, 0], sizes = [16, 17], strides = [1, 1]} : vector<32x17xf32> to vector<16x17xf32>
    %49 = arith.mulf %47, %48 : vector<16x17xf32>
    %cst_19 = arith.constant dense<0.000000e+00> : vector<16xf32>
    %50 = vector.multi_reduction <add>, %49, %cst_19 [1] : vector<16x17xf32> to vector<16xf32>
    %51 = vector.shape_cast %50 : vector<16xf32> to vector<16x1xf32>
    %52 = vector.extract_strided_slice %14 {offsets = [16, 0], sizes = [16, 17], strides = [1, 1]} : vector<32x17xf32> to vector<16x17xf32>
    %53 = arith.mulf %47, %52 : vector<16x17xf32>
    %cst_20 = arith.constant dense<0.000000e+00> : vector<16xf32>
    %54 = vector.multi_reduction <add>, %53, %cst_20 [1] : vector<16x17xf32> to vector<16xf32>
    %55 = vector.shape_cast %54 : vector<16xf32> to vector<16x1xf32>
    %cst_21 = arith.constant 0.000000e+00 : f32
    %56 = vector.broadcast %cst_21 : f32 to vector<16x17xf32>
    %57 = arith.maximumf %51, %55 : vector<16x1xf32>
    %58 = arith.subf %51, %57 : vector<16x1xf32>
    %59 = math.exp %58 : vector<16x1xf32>
    %60 = arith.subf %55, %57 : vector<16x1xf32>
    %61 = math.exp %60 : vector<16x1xf32>
    %62 = arith.addf %59, %61 : vector<16x1xf32>
    %63 = tpu.reciprocal %62 {approx = true} : vector<16x1xf32> -> vector<16x1xf32>
    %64 = vector.extract_strided_slice %19 {offsets = [0, 0], sizes = [16, 17], strides = [1, 1]} : vector<32x17xf32> to vector<16x17xf32>
    %65 = arith.mulf %59, %63 : vector<16x1xf32>
    %66 = vector.broadcast %65 : vector<16x1xf32> to vector<16x17xf32>
    %67 = arith.mulf %66, %64 : vector<16x17xf32>
    %68 = arith.addf %56, %67 : vector<16x17xf32>
    %69 = vector.extract_strided_slice %19 {offsets = [16, 0], sizes = [16, 17], strides = [1, 1]} : vector<32x17xf32> to vector<16x17xf32>
    %70 = arith.mulf %61, %63 : vector<16x1xf32>
    %71 = vector.broadcast %70 : vector<16x1xf32> to vector<16x17xf32>
    %72 = arith.mulf %71, %69 : vector<16x17xf32>
    %73 = arith.addf %68, %72 : vector<16x17xf32>
    %74 = tpu.concatenate %46, %73 in 0 : vector<16x17xf32>, vector<16x17xf32> -> vector<32x17xf32>
    %75 = arith.truncf %74 : vector<32x17xf32> to vector<32x17xbf16>
    %c0_22 = arith.constant 0 : index
    %c0_23 = arith.constant 0 : index
    %76 = vector.load %arg8[%c0_22, %c0_23] : memref<17x17xbf16, #tpu.memory_space<vmem>>, vector<17x17xbf16>
    %cst_24 = arith.constant dense<0.000000e+00> : vector<32x17xf32>
    %77 = tpu.matmul %75, %76, %cst_24 {dimension_numbers = #tpu.dot_dimension_numbers<[1], [0], [0], [1], [0, 0, 1, 1], [], []>} : vector<32x17xbf16>, vector<17x17xbf16>, vector<32x17xf32> -> vector<32x17xf32>
    %c0_25 = arith.constant 0 : index
    %c0_26 = arith.constant 0 : index
    %78 = vector.load %arg9[%c0_25, %c0_26] : memref<1x17xf32, #tpu.memory_space<vmem>>, vector<1x17xf32>
    %79 = vector.broadcast %78 : vector<1x17xf32> to vector<32x17xf32>
    %80 = arith.addf %77, %79 : vector<32x17xf32>
    %81 = arith.addf %3, %80 : vector<32x17xf32>
    %c0_27 = arith.constant 0 : index
    %c0_28 = arith.constant 0 : index
    %82 = vector.load %arg10[%c0_27, %c0_28] : memref<1x17xf32, #tpu.memory_space<vmem>>, vector<1x17xf32>
    %c0_29 = arith.constant 0 : index
    %c0_30 = arith.constant 0 : index
    %83 = vector.load %arg11[%c0_29, %c0_30] : memref<1x17xf32, #tpu.memory_space<vmem>>, vector<1x17xf32>
    %cst_31 = arith.constant dense<0.000000e+00> : vector<32xf32>
    %84 = vector.multi_reduction <add>, %81, %cst_31 [1] : vector<32x17xf32> to vector<32xf32>
    %85 = vector.shape_cast %84 : vector<32xf32> to vector<32x1xf32>
    %cst_32 = arith.constant 1.700000e+01 : f32
    %86 = vector.broadcast %cst_32 : f32 to vector<32x1xf32>
    %87 = arith.divf %85, %86 : vector<32x1xf32>
    %88 = vector.broadcast %87 : vector<32x1xf32> to vector<32x17xf32>
    %89 = arith.subf %81, %88 : vector<32x17xf32>
    %90 = arith.mulf %89, %89 : vector<32x17xf32>
    %cst_33 = arith.constant dense<0.000000e+00> : vector<32xf32>
    %91 = vector.multi_reduction <add>, %90, %cst_33 [1] : vector<32x17xf32> to vector<32xf32>
    %92 = vector.shape_cast %91 : vector<32xf32> to vector<32x1xf32>
    %cst_34 = arith.constant 1.700000e+01 : f32
    %93 = vector.broadcast %cst_34 : f32 to vector<32x1xf32>
    %94 = arith.divf %92, %93 : vector<32x1xf32>
    %95 = vector.broadcast %87 : vector<32x1xf32> to vector<32x17xf32>
    %96 = arith.subf %81, %95 : vector<32x17xf32>
    %cst_35 = arith.constant 9.99999974E-6 : f32
    %97 = vector.broadcast %cst_35 : f32 to vector<32x1xf32>
    %98 = arith.addf %94, %97 : vector<32x1xf32>
    %99 = math.rsqrt %98 : vector<32x1xf32>
    %100 = vector.broadcast %99 : vector<32x1xf32> to vector<32x17xf32>
    %101 = arith.mulf %96, %100 : vector<32x17xf32>
    %102 = vector.broadcast %82 : vector<1x17xf32> to vector<32x17xf32>
    %103 = arith.mulf %101, %102 : vector<32x17xf32>
    %104 = vector.broadcast %83 : vector<1x17xf32> to vector<32x17xf32>
    %105 = arith.addf %103, %104 : vector<32x17xf32>
    %106 = arith.truncf %105 : vector<32x17xf32> to vector<32x17xbf16>
    %cst_36 = arith.constant 0.000000e+00 : f32
    %107 = vector.broadcast %cst_36 : f32 to vector<32x17xf32>
    %c0_37 = arith.constant 0 : index
    %c0_38 = arith.constant 0 : index
    %108 = vector.load %arg12[%c0_37, %c0_38] : memref<17x2048xbf16, #tpu.memory_space<vmem>>, vector<17x512xbf16>
    %cst_39 = arith.constant dense<0.000000e+00> : vector<32x512xf32>
    %109 = tpu.matmul %106, %108, %cst_39 {dimension_numbers = #tpu.dot_dimension_numbers<[1], [0], [0], [1], [0, 0, 1, 1], [], []>} : vector<32x17xbf16>, vector<17x512xbf16>, vector<32x512xf32> -> vector<32x512xf32>
    %c0_40 = arith.constant 0 : index
    %c0_41 = arith.constant 0 : index
    %110 = vector.load %arg13[%c0_40, %c0_41] : memref<1x2048xf32, #tpu.memory_space<vmem>>, vector<1x512xf32>
    %111 = vector.broadcast %110 : vector<1x512xf32> to vector<32x512xf32>
    %112 = arith.addf %109, %111 : vector<32x512xf32>
    %cst_42 = arith.constant 0.000000e+00 : f32
    %113 = vector.broadcast %cst_42 : f32 to vector<32x512xf32>
    %114 = arith.maximumf %112, %113 : vector<32x512xf32>
    %115 = arith.truncf %114 : vector<32x512xf32> to vector<32x512xbf16>
    %c0_43 = arith.constant 0 : index
    %c0_44 = arith.constant 0 : index
    %116 = vector.load %arg14[%c0_43, %c0_44] : memref<2048x17xbf16, #tpu.memory_space<vmem>>, vector<512x17xbf16>
    %cst_45 = arith.constant dense<0.000000e+00> : vector<32x17xf32>
    %117 = tpu.matmul %115, %116, %cst_45 {dimension_numbers = #tpu.dot_dimension_numbers<[1], [0], [0], [1], [0, 0, 1, 1], [], []>} : vector<32x512xbf16>, vector<512x17xbf16>, vector<32x17xf32> -> vector<32x17xf32>
    %118 = arith.addf %107, %117 : vector<32x17xf32>
    %c0_46 = arith.constant 0 : index
    %c512 = arith.constant 512 : index
    %119 = vector.load %arg12[%c0_46, %c512] : memref<17x2048xbf16, #tpu.memory_space<vmem>>, vector<17x512xbf16>
    %cst_47 = arith.constant dense<0.000000e+00> : vector<32x512xf32>
    %120 = tpu.matmul %106, %119, %cst_47 {dimension_numbers = #tpu.dot_dimension_numbers<[1], [0], [0], [1], [0, 0, 1, 1], [], []>} : vector<32x17xbf16>, vector<17x512xbf16>, vector<32x512xf32> -> vector<32x512xf32>
    %c0_48 = arith.constant 0 : index
    %c512_49 = arith.constant 512 : index
    %121 = vector.load %arg13[%c0_48, %c512_49] : memref<1x2048xf32, #tpu.memory_space<vmem>>, vector<1x512xf32>
    %122 = vector.broadcast %121 : vector<1x512xf32> to vector<32x512xf32>
    %123 = arith.addf %120, %122 : vector<32x512xf32>
    %cst_50 = arith.constant 0.000000e+00 : f32
    %124 = vector.broadcast %cst_50 : f32 to vector<32x512xf32>
    %125 = arith.maximumf %123, %124 : vector<32x512xf32>
    %126 = arith.truncf %125 : vector<32x512xf32> to vector<32x512xbf16>
    %c512_51 = arith.constant 512 : index
    %c0_52 = arith.constant 0 : index
    %127 = vector.load %arg14[%c512_51, %c0_52] : memref<2048x17xbf16, #tpu.memory_space<vmem>>, vector<512x17xbf16>
    %cst_53 = arith.constant dense<0.000000e+00> : vector<32x17xf32>
    %128 = tpu.matmul %126, %127, %cst_53 {dimension_numbers = #tpu.dot_dimension_numbers<[1], [0], [0], [1], [0, 0, 1, 1], [], []>} : vector<32x512xbf16>, vector<512x17xbf16>, vector<32x17xf32> -> vector<32x17xf32>
    %129 = arith.addf %118, %128 : vector<32x17xf32>
    %c0_54 = arith.constant 0 : index
    %c1024 = arith.constant 1024 : index
    %130 = vector.load %arg12[%c0_54, %c1024] : memref<17x2048xbf16, #tpu.memory_space<vmem>>, vector<17x512xbf16>
    %cst_55 = arith.constant dense<0.000000e+00> : vector<32x512xf32>
    %131 = tpu.matmul %106, %130, %cst_55 {dimension_numbers = #tpu.dot_dimension_numbers<[1], [0], [0], [1], [0, 0, 1, 1], [], []>} : vector<32x17xbf16>, vector<17x512xbf16>, vector<32x512xf32> -> vector<32x512xf32>
    %c0_56 = arith.constant 0 : index
    %c1024_57 = arith.constant 1024 : index
    %132 = vector.load %arg13[%c0_56, %c1024_57] : memref<1x2048xf32, #tpu.memory_space<vmem>>, vector<1x512xf32>
    %133 = vector.broadcast %132 : vector<1x512xf32> to vector<32x512xf32>
    %134 = arith.addf %131, %133 : vector<32x512xf32>
    %cst_58 = arith.constant 0.000000e+00 : f32
    %135 = vector.broadcast %cst_58 : f32 to vector<32x512xf32>
    %136 = arith.maximumf %134, %135 : vector<32x512xf32>
    %137 = arith.truncf %136 : vector<32x512xf32> to vector<32x512xbf16>
    %c1024_59 = arith.constant 1024 : index
    %c0_60 = arith.constant 0 : index
    %138 = vector.load %arg14[%c1024_59, %c0_60] : memref<2048x17xbf16, #tpu.memory_space<vmem>>, vector<512x17xbf16>
    %cst_61 = arith.constant dense<0.000000e+00> : vector<32x17xf32>
    %139 = tpu.matmul %137, %138, %cst_61 {dimension_numbers = #tpu.dot_dimension_numbers<[1], [0], [0], [1], [0, 0, 1, 1], [], []>} : vector<32x512xbf16>, vector<512x17xbf16>, vector<32x17xf32> -> vector<32x17xf32>
    %140 = arith.addf %129, %139 : vector<32x17xf32>
    %c0_62 = arith.constant 0 : index
    %c1536 = arith.constant 1536 : index
    %141 = vector.load %arg12[%c0_62, %c1536] : memref<17x2048xbf16, #tpu.memory_space<vmem>>, vector<17x512xbf16>
    %cst_63 = arith.constant dense<0.000000e+00> : vector<32x512xf32>
    %142 = tpu.matmul %106, %141, %cst_63 {dimension_numbers = #tpu.dot_dimension_numbers<[1], [0], [0], [1], [0, 0, 1, 1], [], []>} : vector<32x17xbf16>, vector<17x512xbf16>, vector<32x512xf32> -> vector<32x512xf32>
    %c0_64 = arith.constant 0 : index
    %c1536_65 = arith.constant 1536 : index
    %143 = vector.load %arg13[%c0_64, %c1536_65] : memref<1x2048xf32, #tpu.memory_space<vmem>>, vector<1x512xf32>
    %144 = vector.broadcast %143 : vector<1x512xf32> to vector<32x512xf32>
    %145 = arith.addf %142, %144 : vector<32x512xf32>
    %cst_66 = arith.constant 0.000000e+00 : f32
    %146 = vector.broadcast %cst_66 : f32 to vector<32x512xf32>
    %147 = arith.maximumf %145, %146 : vector<32x512xf32>
    %148 = arith.truncf %147 : vector<32x512xf32> to vector<32x512xbf16>
    %c1536_67 = arith.constant 1536 : index
    %c0_68 = arith.constant 0 : index
    %149 = vector.load %arg14[%c1536_67, %c0_68] : memref<2048x17xbf16, #tpu.memory_space<vmem>>, vector<512x17xbf16>
    %cst_69 = arith.constant dense<0.000000e+00> : vector<32x17xf32>
    %150 = tpu.matmul %148, %149, %cst_69 {dimension_numbers = #tpu.dot_dimension_numbers<[1], [0], [0], [1], [0, 0, 1, 1], [], []>} : vector<32x512xbf16>, vector<512x17xbf16>, vector<32x17xf32> -> vector<32x17xf32>
    %151 = arith.addf %140, %150 : vector<32x17xf32>
    %c0_70 = arith.constant 0 : index
    %c0_71 = arith.constant 0 : index
    %152 = vector.load %arg15[%c0_70, %c0_71] : memref<1x17xf32, #tpu.memory_space<vmem>>, vector<1x17xf32>
    %153 = vector.broadcast %152 : vector<1x17xf32> to vector<32x17xf32>
    %154 = arith.addf %151, %153 : vector<32x17xf32>
    %155 = arith.addf %105, %154 : vector<32x17xf32>
    %c0_72 = arith.constant 0 : index
    %c0_73 = arith.constant 0 : index
    %156 = vector.load %arg16[%c0_72, %c0_73] : memref<1x17xf32, #tpu.memory_space<vmem>>, vector<1x17xf32>
    %c0_74 = arith.constant 0 : index
    %c0_75 = arith.constant 0 : index
    %157 = vector.load %arg17[%c0_74, %c0_75] : memref<1x17xf32, #tpu.memory_space<vmem>>, vector<1x17xf32>
    %cst_76 = arith.constant dense<0.000000e+00> : vector<32xf32>
    %158 = vector.multi_reduction <add>, %155, %cst_76 [1] : vector<32x17xf32> to vector<32xf32>
    %159 = vector.shape_cast %158 : vector<32xf32> to vector<32x1xf32>
    %cst_77 = arith.constant 1.700000e+01 : f32
    %160 = vector.broadcast %cst_77 : f32 to vector<32x1xf32>
    %161 = arith.divf %159, %160 : vector<32x1xf32>
    %162 = vector.broadcast %161 : vector<32x1xf32> to vector<32x17xf32>
    %163 = arith.subf %155, %162 : vector<32x17xf32>
    %164 = arith.mulf %163, %163 : vector<32x17xf32>
    %cst_78 = arith.constant dense<0.000000e+00> : vector<32xf32>
    %165 = vector.multi_reduction <add>, %164, %cst_78 [1] : vector<32x17xf32> to vector<32xf32>
    %166 = vector.shape_cast %165 : vector<32xf32> to vector<32x1xf32>
    %cst_79 = arith.constant 1.700000e+01 : f32
    %167 = vector.broadcast %cst_79 : f32 to vector<32x1xf32>
    %168 = arith.divf %166, %167 : vector<32x1xf32>
    %169 = vector.broadcast %161 : vector<32x1xf32> to vector<32x17xf32>
    %170 = arith.subf %155, %169 : vector<32x17xf32>
    %cst_80 = arith.constant 9.99999974E-6 : f32
    %171 = vector.broadcast %cst_80 : f32 to vector<32x1xf32>
    %172 = arith.addf %168, %171 : vector<32x1xf32>
    %173 = math.rsqrt %172 : vector<32x1xf32>
    %174 = vector.broadcast %173 : vector<32x1xf32> to vector<32x17xf32>
    %175 = arith.mulf %170, %174 : vector<32x17xf32>
    %176 = vector.broadcast %156 : vector<1x17xf32> to vector<32x17xf32>
    %177 = arith.mulf %175, %176 : vector<32x17xf32>
    %178 = vector.broadcast %157 : vector<1x17xf32> to vector<32x17xf32>
    %179 = arith.addf %177, %178 : vector<32x17xf32>
    %c0_81 = arith.constant 0 : index
    %c0_82 = arith.constant 0 : index
    %180 = vector.load %arg19[%c0_81, %c0_82] : memref<32x17xf32, #tpu.memory_space<vmem>>, vector<32x17xf32>
    tpu.vector_store %arg19[%c0_81, %c0_82], %179 {strides = array<i32>} : memref<32x17xf32, #tpu.memory_space<vmem>>, vector<32x17xf32>,
    %c0_83 = arith.constant 0 : index
    %c0_84 = arith.constant 0 : index
    %181 = vector.load %arg18[%c0_83, %c0_84] : memref<32x17xf32, #tpu.memory_space<vmem>>, vector<32x17xf32>
    tpu.vector_store %arg18[%c0_83, %c0_84], %179 {strides = array<i32>} : memref<32x17xf32, #tpu.memory_space<vmem>>, vector<32x17xf32>,
    return
  }
  func.func @transform_0(%arg0: i32) -> (i32, i32) {
    %c0_i32 = arith.constant 0 : i32
    %c0_i32_0 = arith.constant 0 : i32
    %c0_i32_1 = arith.constant 0 : i32
    return %c0_i32, %c0_i32_0 : i32, i32
  }
  func.func @transform_1(%arg0: i32) -> (i32, i32) {
    %c0_i32 = arith.constant 0 : i32
    %c0_i32_0 = arith.constant 0 : i32
    %c0_i32_1 = arith.constant 0 : i32
    return %c0_i32, %c0_i32_0 : i32, i32
  }
  func.func @transform_2(%arg0: i32) -> (i32, i32) {
    %c0_i32 = arith.constant 0 : i32
    %c0_i32_0 = arith.constant 0 : i32
    %c0_i32_1 = arith.constant 0 : i32
    return %c0_i32, %c0_i32_0 : i32, i32
  }
  func.func @transform_3(%arg0: i32) -> (i32, i32) {
    %c0_i32 = arith.constant 0 : i32
    %c0_i32_0 = arith.constant 0 : i32
    %c0_i32_1 = arith.constant 0 : i32
    return %c0_i32, %c0_i32_0 : i32, i32
  }
  func.func @transform_4(%arg0: i32) -> (i32, i32) {
    %c0_i32 = arith.constant 0 : i32
    %c0_i32_0 = arith.constant 0 : i32
    %c0_i32_1 = arith.constant 0 : i32
    return %c0_i32, %c0_i32_0 : i32, i32
  }
  func.func @transform_5(%arg0: i32) -> (i32, i32) {
    %c0_i32 = arith.constant 0 : i32
    %c0_i32_0 = arith.constant 0 : i32
    %c0_i32_1 = arith.constant 0 : i32
    return %c0_i32, %c0_i32_0 : i32, i32
  }
  func.func @transform_6(%arg0: i32) -> (i32, i32) {
    %c0_i32 = arith.constant 0 : i32
    %c0_i32_0 = arith.constant 0 : i32
    %c0_i32_1 = arith.constant 0 : i32
    return %c0_i32, %c0_i32_0 : i32, i32
  }
  func.func @transform_7(%arg0: i32) -> (i32, i32) {
    %c0_i32 = arith.constant 0 : i32
    %c0_i32_0 = arith.constant 0 : i32
    %c0_i32_1 = arith.constant 0 : i32
    return %c0_i32, %c0_i32_0 : i32, i32
  }
  func.func @transform_8(%arg0: i32) -> (i32, i32) {
    %c0_i32 = arith.constant 0 : i32
    %c0_i32_0 = arith.constant 0 : i32
    %c0_i32_1 = arith.constant 0 : i32
    return %c0_i32, %c0_i32_0 : i32, i32
  }
  func.func @transform_9(%arg0: i32) -> (i32, i32) {
    %c0_i32 = arith.constant 0 : i32
    %c0_i32_0 = arith.constant 0 : i32
    %c0_i32_1 = arith.constant 0 : i32
    return %c0_i32, %c0_i32_0 : i32, i32
  }
  func.func @transform_10(%arg0: i32) -> (i32, i32) {
    %c0_i32 = arith.constant 0 : i32
    %c0_i32_0 = arith.constant 0 : i32
    %c0_i32_1 = arith.constant 0 : i32
    return %c0_i32, %c0_i32_0 : i32, i32
  }
  func.func @transform_11(%arg0: i32) -> (i32, i32) {
    %c0_i32 = arith.constant 0 : i32
    %c0_i32_0 = arith.constant 0 : i32
    %c0_i32_1 = arith.constant 0 : i32
    return %c0_i32, %c0_i32_0 : i32, i32
  }
  func.func @transform_12(%arg0: i32) -> (i32, i32) {
    %c0_i32 = arith.constant 0 : i32
    %c0_i32_0 = arith.constant 0 : i32
    %c0_i32_1 = arith.constant 0 : i32
    return %c0_i32, %c0_i32_0 : i32, i32
  }
  func.func @transform_13(%arg0: i32) -> (i32, i32) {
    %c0_i32 = arith.constant 0 : i32
    %c0_i32_0 = arith.constant 0 : i32
    %c0_i32_1 = arith.constant 0 : i32
    return %c0_i32, %c0_i32_0 : i32, i32
  }
  func.func @transform_14(%arg0: i32) -> (i32, i32) {
    %c0_i32 = arith.constant 0 : i32
    %c0_i32_0 = arith.constant 0 : i32
    %c0_i32_1 = arith.constant 0 : i32
    return %c0_i32, %c0_i32_0 : i32, i32
  }
  func.func @transform_15(%arg0: i32) -> (i32, i32) {
    %c0_i32 = arith.constant 0 : i32
    %c0_i32_0 = arith.constant 0 : i32
    %c0_i32_1 = arith.constant 0 : i32
    return %c0_i32, %c0_i32_0 : i32, i32
  }
  func.func @transform_16(%arg0: i32) -> (i32, i32) {
    %c0_i32 = arith.constant 0 : i32
    %c0_i32_0 = arith.constant 0 : i32
    %c0_i32_1 = arith.constant 0 : i32
    return %c0_i32, %c0_i32_0 : i32, i32
  }
  func.func @transform_17(%arg0: i32) -> (i32, i32) {
    %c0_i32 = arith.constant 0 : i32
    %c0_i32_0 = arith.constant 0 : i32
    %c0_i32_1 = arith.constant 0 : i32
    return %c0_i32, %c0_i32_0 : i32, i32
  }
}

</mosaic_0001>

<bundles_post_ra>
// kernel: droptop_forward.5
= control target key start
LH: loop header
LB: loop body
LE: loop exit
PB: predicated region body
PF: predicated region fallthrough
CT: control target
= control target key end

     0   :  { %vm101_vm0 = vcmask 1040384   ;;  %v448_v3 = vmov 0.0   ;;  %vm102_vm1 = vcmask 1041408   ;;  %v449_v6 = vmov 65535   ;;  %s588_s0 = inlined_call_operand.vmem [shape: f32[32,17], index: 0, kind: input, shape index: {}]   ;;  %s589_s1 = inlined_call_operand.vmem [shape: bf16[2,32], index: 1, kind: input, shape index: {}]   ;;  %s590_s2 = inlined_call_operand.vmem [shape: bf16[2,3], index: 2, kind: input, shape index: {}]   ;;  %s591_s3 = inlined_call_operand.vmem [shape: bf16[3,4], index: 3, kind: input, shape index: {}]   ;;  %s592_s4 = inlined_call_operand.vmem [shape: f32[1,4], index: 4, kind: input, shape index: {}]   ;;  %s593_s5 = inlined_call_operand.vmem [shape: bf16[17,21], index: 5, kind: input, shape index: {}]   ;;  %s594_s6 = inlined_call_operand.vmem [shape: bf16[4,21], index: 6, kind: input, shape index: {}]   ;;  %s595_s7 = inlined_call_operand.vmem [shape: f32[1,21], index: 7, kind: input, shape index: {}]   ;;  %s596_s8 = inlined_call_operand.vmem [shape: bf16[21,2], index: 8, kind: input, shape index: {}]   ;;  %s597_s9 = inlined_call_operand.vmem [shape: f32[1,2], index: 9, kind: input, shape index: {}]   ;;  %s598_s10 = inlined_call_operand.hbm [shape: f32[2,2], index: 10, kind: output, shape index: {}]  }
   0x1   :  { %v38_v0 = vld [vmem:[%s588_s0] sm:$0xff]  ;;  %v39_v1 = vld [vmem:[%s588_s0 + $0x8] sm:$0xff]  ;;  %379 = vmatprep.subr.bf16.mxu0 %v448_v3  ;;  %387 = vmatprep.subr.bf16.mxu1 %v448_v3  ;;  %v40_v5 = vld [vmem:[%s588_s0 + $0x10] sm:$0xff]  ;;  %v103_v7 = vsel %vm101_vm0, 4294967295, %v449_v6  ;;  %v293_v9 = vsel %vm102_vm1, 4294967295, %v449_v6  ;;  %vm450_vm2 = vmmov 0  }
   0x2   :  { %v89_v2 = vld [vmem:[%s591_s3] sm:$0x3]  ;;  %v42_v4 = vpack.c.bf16 %v39_v1, %v38_v0  ;;  %v104_v8 = vsel %vm102_vm1, %v103_v7, 0  ;;  %v41_v10 = vld [vmem:[%s588_s0 + $0x18] sm:$0xff]  ;;  %389 = vmatprep.mubr.msk.bf16.mxu1 %vm450_vm2, %v448_v3  ;;  %vm97_vm3 = vcmask 23552   ;;  %383 = vmatprep.mubr.msk.bf16.mxu0 %vm450_vm2, %v448_v3  ;;  %vm44_vm4 = vcmask 261120  }
   0x3   :  { %v106_v11 = vand.u32 %v104_v8, %v89_v2  ;;  %v43_v12 = vpack.c.bf16 %v41_v10, %v40_v5  ;;  %v88_v13 = vld [vmem:[%s590_s2] sm:$0x1]  ;;  %v420_v15 = vld [vmem:[%s593_s5 + $0x8] ss:$0 sps:$4 sm:$0x11]  }
   0x4   :  { %380 = vmatpush3.bf16.msra.mxu0 %v42_v4  ;;  %v153_v14 = vld [vmem:[%s594_s6] sm:$0x3] }
   0x5   :  { %381 = vmatprep.subr.bf16.mxu0 %v448_v3  ;;  %v37_v16 = vld [vmem:[%s589_s1] sm:$0x1]  ;;  %388 = vmatpush3.bf16.msra.mxu1 %v106_v11  ;;  %v159_v18 = vsel %vm102_vm1, %v153_v14, 0 }
   0x6   :  { %v421_v17 = vld [vmem:[%s593_s5] sm:$0xff]   ;;  %393 = vmatprep.subr.bf16.mxu1 %v448_v3 }
   0x8   :  { %382 = vmatpush3.bf16.msra.mxu0 %v43_v12 }
   0x9   :  { %15 = vsyncpa [#allocation3], 0  ;;  %v451_v19 = vmov 0   ;;  %399 = vmatprep.subr.bf16.mxu0 %v448_v3  ;;  %390 = vmatmul.mubr.msk.bf16.vlgmr.msra.gmra.mrb[0].mxu1 %vm97_vm3, %v88_v13  ;;  %v355_v22 = vld [vmem:[%s592_s4] ss:$0 sm:$0xff]  ;;  %vm210_vm5 = vcmask 138240  }
   0xa   :  { %v215_v20 = vsel %vm101_vm0, 65535, %v451_v19  ;;  %394 = vmatpush3.bf16.msra.mxu1 %v159_v18  ;;  %395 = vmatprep.mubr.msk.bf16.mxu1 %vm450_vm2, %v448_v3  ;;  %vm154_vm6 = vcmask 31744   ;;  %vm292_vm7 = vcmask 1042432   ;;  %v422_v34 = vld [vmem:[%s596_s8] sm:$0xff]   ;;  %vm288_vm8 = vcmask 171008   ;;  %s452_s15 = smov [#allocation2]  }
   0xb   :  { %384 = vmatmul.mubr.msk.bf16.vlgmr.msra.gmra.mrb[0].mxu0 %vm44_vm4, %v37_v16  ;;  %v217_v21 = vand.u32 %v420_v15, %v215_v20  ;;  %407 = vmatprep.subr.bf16.mxu1 %v448_v3  ;;  %v294_v35 = vsel %vm292_vm7, %v293_v9, 0  ;;  %v423_v36 = vld [vmem:[%s596_s8 + $0x8] ss:$0 sps:$4 sm:$0x77]   ;;  %v361_v40 = vld [vmem:[%s595_s7] ss:$0 sm:$0xff] }
   0xc   :  { %400 = vmatpush3.bf16.msra.mxu0 %v421_v17  ;;  %403 = vmatprep.mubr.msk.bf16.mxu0 %vm450_vm2, %v448_v3  ;;  %v296_v37 = vand.u32 %v423_v36, %v294_v35  ;;  %v362_v51 = vld [vmem:[%s597_s9] ss:$0 sm:$0xff]  ;;  %s346_s16 = sshll.u32 %s452_s15, 4  ;;  %vm338_vm9 = vcmask 9216   ;;  %s347_s16 = int_to_ptr.vmem [resolvable:$true] %s346_s16 }
   0xd   :  { %401 = vmatprep.subr.bf16.mxu0 %v448_v3  ;;  %s424_s7 = scalar_lea.vmem %s347_s16, 32  ;;  %p429_p1 = scmp.lt.s32.totalorder %s347_s16, %s347_s16 }
   0xe   :  { %p425_p0 = scmp.ne.s32.totalorder %s347_s16, %s424_s7  ;;  %p430_p2 = scmp.lt.s32.totalorder %s424_s7, %s424_s7 }
  0x10   :  { %402 = vmatpush3.bf16.msra.mxu0 %v217_v21  ;;  %p431_p3 = por %p430_p2, %p429_p1 }
  0x12   :  { %p432_p4 = pnand %p431_p3, %p425_p0 }
  0xdc   :  { %v142_v23 = vpop.f32.mrb[0].mxu1 }
  0xdd   :  { %v143_v24 = vadd.f32 %v355_v22, %v142_v23  ;;  %v391_v25 = vpop.f32.mrb[1].mxu1 }
  0xde   :  { %v82_v26 = vpop.f32.mrb[0].mxu0  ;;  %v145_v28 = vpop.f32.mrb[2].mxu1 }
  0xdf   :  { %v148_v27 = vpack.c.bf16 %v82_v26, %v82_v26  ;;  %v385_v29 = vpop.f32.mrb[1].mxu0  ;;  %v152_v30 = vpack.c.bf16 %v143_v24, %v143_v24  ;;  %v392_v31 = vpop.f32.mrb[3].mxu1 }
  0xe0   :  { %v85_v32 = vpop.f32.mrb[2].mxu0 }
  0xe1   :  { %v386_v33 = vpop.f32.mrb[3].mxu0  ;;  %404 = vmatmul.mubr.msk.bf16.vlgmr.msra.gmra.mrb[4].mxu0 %vm210_vm5, %v148_v27  ;;  %396 = vmatmul.mubr.msk.bf16.vlgmr.msra.gmra.mrb[4].mxu1 %vm154_vm6, %v152_v30 }
  0xe2   :  { %411 = vmatprep.mubr.msk.bf16.mxu1 %vm450_vm2, %v448_v3  ;;  %408 = vmatpush3.bf16.msra.mxu1 %v422_v34 }
  0xe3   :  { %409 = vmatprep.subr.bf16.mxu1 %v448_v3 }
  0xe6   :  { %410 = vmatpush3.bf16.msra.mxu1 %v296_v37 }
 0x1b4   :  { %v253_v38 = vpop.f32.mrb[4].mxu0  ;;  %v195_v39 = vpop.f32.mrb[4].mxu1 }
 0x1b5   :  { %v405_v41 = vpop.f32.mrb[5].mxu0  ;;  %v254_v42 = vadd.f32 %v253_v38, %v195_v39  ;;  %v397_v43 = vpop.f32.mrb[5].mxu1 }
 0x1b6   :  { %v256_v44 = vpop.f32.mrb[6].mxu0  ;;  %v198_v45 = vpop.f32.mrb[6].mxu1 }
 0x1b7   :  { %v406_v46 = vpop.f32.mrb[7].mxu0  ;;  %v266_v47 = vadd.f32 %v361_v40, %v254_v42  ;;  %v398_v48 = vpop.f32.mrb[7].mxu1 }
 0x1b9   :  { %v267_v49 = vmax.f32 %v266_v47, 0.0 }
 0x1bb   :  { %v268_v50 = vpack.c.bf16 %v267_v49, %v267_v49 }
 0x1bd   :  { %412 = vmatmul.mubr.msk.bf16.vlgmr.msra.gmra.mrb[8].mxu1 %vm288_vm8, %v268_v50 }
 0x290   :  { %v332_v52 = vpop.f32.mrb[8].mxu1 }
 0x291   :  { %v333_v53 = vadd.f32 %v362_v51, %v332_v52  ;;  %v413_v54 = vpop.f32.mrb[9].mxu1 }
 0x292   :  { %v335_v55 = vpop.f32.mrb[10].mxu1 }
 0x293   :  { %v414_v56 = vpop.f32.mrb[11].mxu1  ;;  %339 = vst.msk [vmem:[#allocation2] sm:$0x3] %vm338_vm9, %v333_v53 }
 0x294   :  { %435 = shalt.err (!%p432_p4)
}
 0x295   :  { %s436_s9 = scalar_lea.hbm %s598_s10, 32 }
 0x296   :  { %p437_p5 = scmp.ne.s32.totalorder %s598_s10, %s436_s9  ;;  %p440_p6 = scmp.lt.u32.totalorder %s436_s9, %s598_s10 }
 0x298   :  { %p442_p7 = pnand %p440_p6, %p437_p5 }
 0x29a   :  { %445 = shalt.err (!%p442_p7)
}
 0x29b   :  { %349 = dma.vmem_to_hbm [thread:$0]  %s347_s16, 32, %s598_s10, [#allocation3]  }
 0x29c   :  { %446 = dma.done.wait [#allocation3], 32  }
 0x29d   :  { %447 = vsyncadd [#allocation3], 4294967264 }
 0x29e   :  { %353 = vsyncpa [#allocation3], 1 }

// kernel: droptop_forward.3
= control target key start
LH: loop header
LB: loop body
LE: loop exit
PB: predicated region body
PF: predicated region fallthrough
CT: control target
= control target key end

     0   :  { %v649_v1 = vmov 0   ;;  %vm43_vm0 = vcmask 261120   ;;  %vm413_vm1 = vcmask 916480   ;;  %v650_v59 = vmov 1983009808   ;;  %s848_s1 = inlined_call_operand.vmem [shape: bf16[32,240], index: 1, kind: input, shape index: {}]   ;;  %s849_s2 = inlined_call_operand.vmem [shape: bf16[240,272], index: 2, kind: input, shape index: {}]   ;;  %s850_s0 = inlined_call_operand.vmem [shape: bf16[2,32], index: 0, kind: input, shape index: {}]   ;;  %s851_s3 = inlined_call_operand.vmem [shape: f32[2,272], index: 3, kind: input, shape index: {}]   ;;  %s852_s4 = inlined_call_operand.vmem [shape: f32[2,272], index: 4, kind: output, shape index: {}]  }
   0x1   :  { %v582_v0 = vld [vmem:[%s848_s1 + $0x4] ss:$8 sps:$4 sm:$0xff]   ;;  %79 = vmatprep.mubr.bf16.mxu0 %v649_v1  ;;  %v584_v2 = vld [vmem:[%s848_s1] ss:$8 sps:$4 sm:$0xff]   ;;  %v585_v3 = vld [vmem:[%s848_s1 + $0x14] ss:$8 sps:$4 sm:$0xff]   ;;  %v396_v60 = vunpack.c.l.s4 %v650_v59  ;;  %v398_v61 = vlaneseq }
   0x2   :  { %47 = vmatprep.subr.bf16.mxu0 %v582_v0  ;;  %v587_v4 = vld [vmem:[%s848_s1 + $0x10] ss:$8 sps:$4 sm:$0xff]   ;;  %v590_v6 = vld [vmem:[%s849_s2] ss:$12 sps:$4 sm:$0xff]   ;;  %v592_v8 = vld [vmem:[%s849_s2 + $0x1c] ss:$12 sps:$4 sm:$0xff]  }
   0x3   :  { %48 = vmatpush1.bf16.msra.mxu0 %v584_v2  ;;  %v588_v5 = vld [vmem:[%s849_s2 + $0x4] ss:$12 sps:$4 sm:$0xff]   ;;  %v18_v7 = vld [vmem:[%s850_s0] sm:$0x1]  ;;  %v591_v10 = vld [vmem:[%s849_s2 + $0x8] ss:$12 sps:$4 sm:$0xff]   ;;  %v397_v62 = vunpack.c.0.s8 %v396_v60 }
   0x4   :  { %49 = vmatprep.subr.bf16.mxu0 %v585_v3  ;;  %417 = vmatprep.subr.bf16.mxu1 %v588_v5  ;;  %v594_v9 = vld [vmem:[%s849_s2 + $0x18] ss:$12 sps:$4 sm:$0xff]   ;;  %v596_v11 = vld [vmem:[%s849_s2 + $0x34] ss:$12 sps:$4 sm:$0xff]   ;;  %v598_v13 = vld [vmem:[%s849_s2 + $0x30] ss:$12 sps:$4 sm:$0xff]  }
   0x5   :  { %418 = vmatpush1.bf16.msra.mxu1 %v590_v6  ;;  %v595_v12 = vld [vmem:[%s849_s2 + $0x20] ss:$12 sps:$4 sm:$0xff]   ;;  %v602_v15 = vld [vmem:[%s849_s2 + $0x48] ss:$12 sps:$4 sm:$0xff]   ;;  %v599_v16 = vld [vmem:[%s849_s2 + $0x38] ss:$12 sps:$4 sm:$0xff]  }
   0x6   :  { %419 = vmatprep.subr.bf16.mxu1 %v592_v8  ;;  %v600_v14 = vld [vmem:[%s849_s2 + $0x4c] ss:$12 sps:$4 sm:$0xff]   ;;  %v604_v17 = vld [vmem:[%s849_s2 + $0x64] ss:$12 sps:$4 sm:$0xff]   ;;  %v608_v20 = vld [vmem:[%s849_s2 + $0x7c] ss:$12 sps:$4 sm:$0xff]  }
   0x7   :  { %50 = vmatpush1.bf16.msra.mxu0 %v587_v4  ;;  %v603_v18 = vld [vmem:[%s849_s2 + $0x50] ss:$12 sps:$4 sm:$0xff]   ;;  %v606_v19 = vld [vmem:[%s849_s2 + $0x60] ss:$12 sps:$4 sm:$0xff]   ;;  %v607_v21 = vld [vmem:[%s849_s2 + $0x68] ss:$12 sps:$4 sm:$0xff]  }
   0x8   :  { %458 = vmatprep.subr.bf16.mxu0 %v649_v1  ;;  %v610_v22 = vld [vmem:[%s849_s2 + $0x78] ss:$12 sps:$4 sm:$0xff]   ;;  %v612_v23 = vld [vmem:[%s849_s2 + $0x94] ss:$12 sps:$4 sm:$0xff]   ;;  %v614_v24 = vld [vmem:[%s849_s2 + $0x90] ss:$12 sps:$4 sm:$0xff]  }
   0x9   :  { %420 = vmatpush1.bf16.msra.mxu1 %v594_v9  ;;  %v611_v25 = vld [vmem:[%s849_s2 + $0x80] ss:$12 sps:$4 sm:$0xff]   ;;  %v615_v27 = vld [vmem:[%s849_s2 + $0x98] ss:$12 sps:$4 sm:$0xff]   ;;  %v618_v28 = vld [vmem:[%s849_s2 + $0xa8] ss:$12 sps:$4 sm:$0xff]  }
   0xa   :  { %532 = vmatmul.mubr.msk.bf16.vlgmr.msra.gmra.mrb[0].mxu0 %vm43_vm0, %v18_v7  ;;  %421 = vmatprep.subr.bf16.mxu1 %v596_v11  ;;  %v616_v26 = vld [vmem:[%s849_s2 + $0xac] ss:$12 sps:$4 sm:$0xff]   ;;  %v620_v29 = vld [vmem:[%s849_s2 + $0xc4] ss:$12 sps:$4 sm:$0xff]   ;;  %v624_v32 = vld [vmem:[%s849_s2 + $0xdc] ss:$12 sps:$4 sm:$0xff]  }
   0xb   :  { %459 = vmatpush1.bf16.msra.mxu0 %v591_v10  ;;  %v619_v30 = vld [vmem:[%s849_s2 + $0xb0] ss:$12 sps:$4 sm:$0xff]   ;;  %v622_v31 = vld [vmem:[%s849_s2 + $0xc0] ss:$12 sps:$4 sm:$0xff]   ;;  %v626_v33 = vld [vmem:[%s849_s2 + $0xd8] ss:$12 sps:$4 sm:$0xff]  }
   0xc   :  { %460 = vmatprep.subr.bf16.mxu0 %v649_v1  ;;  %v623_v34 = vld [vmem:[%s849_s2 + $0xc8] ss:$12 sps:$4 sm:$0xff]   ;;  %v630_v36 = vld [vmem:[%s849_s2 + $0xf0] ss:$12 sps:$4 sm:$0xff]   ;;  %v627_v37 = vld [vmem:[%s849_s2 + $0xe0] ss:$12 sps:$4 sm:$0xff]  }
   0xd   :  { %422 = vmatpush1.bf16.msra.mxu1 %v598_v13  ;;  %v628_v35 = vld [vmem:[%s849_s2 + $0xf4] ss:$12 sps:$4 sm:$0xff]   ;;  %v632_v38 = vld [vmem:[%s849_s2 + $0x10c] ss:$12 sps:$4 sm:$0xff]   ;;  %v636_v41 = vld [vmem:[%s849_s2 + $0x124] ss:$12 sps:$4 sm:$0xff]  }
   0xe   :  { %423 = vmatprep.subr.bf16.mxu1 %v600_v14  ;;  %v634_v39 = vld [vmem:[%s849_s2 + $0x108] ss:$12 sps:$4 sm:$0xff]   ;;  %v631_v40 = vld [vmem:[%s849_s2 + $0xf8] ss:$12 sps:$4 sm:$0xff]   ;;  %v638_v42 = vld [vmem:[%s849_s2 + $0x120] ss:$12 sps:$4 sm:$0xff]  }
   0xf   :  { %461 = vmatpush1.bf16.msra.mxu0 %v595_v12  ;;  %v635_v43 = vld [vmem:[%s849_s2 + $0x110] ss:$12 sps:$4 sm:$0xff]   ;;  %v639_v45 = vld [vmem:[%s849_s2 + $0x128] ss:$12 sps:$4 sm:$0xff]   ;;  %v642_v46 = vld [vmem:[%s849_s2 + $0x138] ss:$12 sps:$4 sm:$0xff]  }
  0x10   :  { %462 = vmatprep.subr.bf16.mxu0 %v649_v1  ;;  %v640_v44 = vld [vmem:[%s849_s2 + $0x13c] ss:$12 sps:$4 sm:$0xff]   ;;  %v643_v47 = vld [vmem:[%s849_s2 + $0x140] ss:$12 sps:$4 sm:$0xff]   ;;  %v647_v50 = vld [vmem:[%s849_s2 + $0x158] ss:$12 sps:$4 sm:$0xff]  }
  0x11   :  { %424 = vmatpush1.bf16.msra.mxu1 %v602_v15  ;;  %v644_v48 = vld [vmem:[%s849_s2 + $0x154] ss:$12 sps:$4 sm:$0xff]   ;;  %v646_v49 = vld [vmem:[%s849_s2 + $0x150] ss:$12 sps:$4 sm:$0xff]   ;;  %v399_v63 = vshrl.u32 %v398_v61, 7  ;;  %vm518_vm2 = vcmask 1041408  }
  0x12   :  { %425 = vmatprep.subr.bf16.mxu1 %v604_v17  ;;  %vm519_vm3 = vcmask 1043458   ;;  %vm521_vm5 = vcmask 128004  }
  0x13   :  { %463 = vmatpush1.bf16.msra.mxu0 %v599_v16  ;;  %v400_v0 = vsub.s32 %v397_v62, %v399_v63  ;;  %vm520_vm4 = vmor %vm519_vm3, %vm518_vm2 }
  0x14   :  { %464 = vmatprep.subr.bf16.mxu0 %v649_v1  ;;  %vm522_vm6 = vmor %vm521_vm5, %vm520_vm4 }
  0x15   :  { %426 = vmatpush1.bf16.msra.mxu1 %v606_v19 }
  0x16   :  { %427 = vmatprep.subr.bf16.mxu1 %v608_v20 }
  0x17   :  { %465 = vmatpush1.bf16.msra.mxu0 %v603_v18 }
  0x18   :  { %466 = vmatprep.subr.bf16.mxu0 %v649_v1 }
  0x19   :  { %428 = vmatpush1.bf16.msra.mxu1 %v610_v22 }
  0x1a   :  { %429 = vmatprep.subr.bf16.mxu1 %v612_v23 }
  0x1b   :  { %467 = vmatpush1.bf16.msra.mxu0 %v607_v21 }
  0x1c   :  { %468 = vmatprep.subr.bf16.mxu0 %v649_v1 }
  0x1d   :  { %430 = vmatpush1.bf16.msra.mxu1 %v614_v24 }
  0x1e   :  { %431 = vmatprep.subr.bf16.mxu1 %v616_v26 }
  0x1f   :  { %469 = vmatpush1.bf16.msra.mxu0 %v611_v25 }
  0x20   :  { %470 = vmatprep.subr.bf16.mxu0 %v649_v1 }
  0x21   :  { %432 = vmatpush1.bf16.msra.mxu1 %v618_v28 }
  0x22   :  { %433 = vmatprep.subr.bf16.mxu1 %v620_v29 }
  0x23   :  { %471 = vmatpush1.bf16.msra.mxu0 %v615_v27 }
  0x24   :  { %472 = vmatprep.subr.bf16.mxu0 %v649_v1 }
  0x25   :  { %434 = vmatpush1.bf16.msra.mxu1 %v622_v31 }
  0x26   :  { %435 = vmatprep.subr.bf16.mxu1 %v624_v32 }
  0x27   :  { %473 = vmatpush1.bf16.msra.mxu0 %v619_v30 }
  0x28   :  { %474 = vmatprep.subr.bf16.mxu0 %v649_v1 }
  0x29   :  { %436 = vmatpush1.bf16.msra.mxu1 %v626_v33 }
  0x2a   :  { %437 = vmatprep.subr.bf16.mxu1 %v628_v35 }
  0x2b   :  { %475 = vmatpush1.bf16.msra.mxu0 %v623_v34 }
  0x2c   :  { %476 = vmatprep.subr.bf16.mxu0 %v649_v1 }
  0x2d   :  { %438 = vmatpush1.bf16.msra.mxu1 %v630_v36 }
  0x2e   :  { %439 = vmatprep.subr.bf16.mxu1 %v632_v38 }
  0x2f   :  { %477 = vmatpush1.bf16.msra.mxu0 %v627_v37 }
  0x30   :  { %478 = vmatprep.subr.bf16.mxu0 %v649_v1 }
  0x31   :  { %440 = vmatpush1.bf16.msra.mxu1 %v634_v39 }
  0x32   :  { %441 = vmatprep.subr.bf16.mxu1 %v636_v41 }
  0x33   :  { %479 = vmatpush1.bf16.msra.mxu0 %v631_v40 }
  0x34   :  { %480 = vmatprep.subr.bf16.mxu0 %v649_v1 }
  0x35   :  { %442 = vmatpush1.bf16.msra.mxu1 %v638_v42 }
  0x36   :  { %443 = vmatprep.subr.bf16.mxu1 %v640_v44 }
  0x37   :  { %481 = vmatpush1.bf16.msra.mxu0 %v635_v43 }
  0x38   :  { %482 = vmatprep.subr.bf16.mxu0 %v649_v1 }
  0x39   :  { %444 = vmatpush1.bf16.msra.mxu1 %v642_v46 }
  0x3a   :  { %445 = vmatprep.subr.bf16.mxu1 %v644_v48 }
  0x3b   :  { %483 = vmatpush1.bf16.msra.mxu0 %v639_v45 }
  0x3c   :  { %484 = vmatprep.subr.bf16.mxu0 %v649_v1 }
  0x3d   :  { %446 = vmatpush1.bf16.msra.mxu1 %v646_v49 }
  0x3f   :  { %485 = vmatpush1.bf16.msra.mxu0 %v643_v47 }
  0x40   :  { %486 = vmatprep.subr.bf16.mxu0 %v649_v1  ;;  %v152_v1 = vld [vmem:[%s851_s3] sm:$0x3f] }
  0x41   :  { %v401_v2 = vrot.slane %v152_v1, %v400_v0  ;;  %v394_v3 = vcombine.high %v152_v1, %v152_v1 }
  0x43   :  { %487 = vmatpush1.bf16.msra.mxu0 %v647_v50  ;;  %v408_v4 = vrot.slane %v394_v3, %v400_v0  ;;  %v409_v5 = vcombine.high %v401_v2, %v401_v2 }
  0xdd   :  { %v81_v51 = vpop.f32.mrb[0].mxu0 }
  0xde   :  { %v88_v52 = vmax.f32 %v81_v51, 0.0  ;;  %v83_v53 = vpop.f32.mrb[1].mxu0 }
  0xdf   :  { %v89_v54 = vmax.f32 %v83_v53, 0.0  ;;  %v85_v55 = vpop.f32.mrb[2].mxu0 }
  0xe0   :  { %v86_v56 = vpop.f32.mrb[3].mxu0  ;;  %v90_v58 = vpack.c.bf16 %v88_v52, %v88_v52 }
  0xe1   :  { %v91_v57 = vpack.c.bf16 %v89_v54, %v89_v54 }
  0xe3   :  { %578 = vmatprep.mubr.msk.bf16.mxu1 %vm413_vm1, %v91_v57  ;;  %579 = vmatprep.mubr.msk.bf16.mxu0 %vm413_vm1, %v91_v57 }
  0xe4   :  { %450 = vmatmul.mubr.bf16.vlgmr.msra.gmra.mrb[0].mxu1 %v90_v58  ;;  %491 = vmatmul.mubr.bf16.vlgmr.msra.gmra.mrb[4].mxu0 %v90_v58 }
 0x1b7   :  { %v451_v6 = vpop.f32.mrb[0].mxu1  ;;  %v492_v7 = vpop.f32.mrb[4].mxu0 }
 0x1b8   :  { %v452_v8 = vadd.f32 %v451_v6, %v401_v2  ;;  %v453_v9 = vpop.f32.mrb[1].mxu1  ;;  %v494_v10 = vpop.f32.mrb[5].mxu0  ;;  %v493_v11 = vadd.f32 %v492_v7, %v408_v4 }
 0x1b9   :  { %v454_v12 = vadd.f32 %v453_v9, %v409_v5  ;;  %v455_v13 = vpop.f32.mrb[2].mxu1  ;;  %v495_v14 = vpop.f32.mrb[6].mxu0 }
 0x1ba   :  { %v456_v15 = vpop.f32.mrb[3].mxu1  ;;  %v496_v16 = vpop.f32.mrb[7].mxu0  ;;  %v515_v18 = vrot.slane %v493_v11, %v400_v0 }
 0x1bb   :  { %v501_v17 = vcombine.low %v452_v8, %v454_v12 }
 0x1bd   :  { %v508_v19 = vrot.slane %v501_v17, %v400_v0 }
 0x1bf   :  { %v516_v20 = vcombine.low %v508_v19, %v515_v18 }
 0x1c1   :  { %523 = vst.msk [vmem:[%s852_s4] sm:$0x3f] %vm522_vm6, %v516_v20 }

// kernel: droptop_forward.4
= control target key start
LH: loop header
LB: loop body
LE: loop exit
PB: predicated region body
PF: predicated region fallthrough
CT: control target
= control target key end

     0   :  { %s4131_s24 = smov 0   ;;  %s4964_s0 = inlined_call_operand.vmem [shape: f32[32,17], index: 0, kind: input, shape index: {}]   ;;  %s4965_s1 = inlined_call_operand.vmem [shape: bf16[17,17], index: 1, kind: input, shape index: {}]   ;;  %s4966_s2 = inlined_call_operand.vmem [shape: bf16[17,17], index: 2, kind: input, shape index: {}]   ;;  %s4967_s3 = inlined_call_operand.vmem [shape: bf16[17,17], index: 3, kind: input, shape index: {}]   ;;  %s4968_s4 = inlined_call_operand.vmem [shape: f32[1,17], index: 4, kind: input, shape index: {}]   ;;  %s4969_s5 = inlined_call_operand.vmem [shape: f32[1,17], index: 5, kind: input, shape index: {}]   ;;  %s4970_s6 = inlined_call_operand.vmem [shape: f32[1,17], index: 6, kind: input, shape index: {}]   ;;  %s4971_s7 = inlined_call_operand.vmem [shape: bf16[17,17], index: 7, kind: input, shape index: {}]   ;;  %s4972_s8 = inlined_call_operand.vmem [shape: f32[1,17], index: 8, kind: input, shape index: {}]   ;;  %s4973_s9 = inlined_call_operand.vmem [shape: f32[1,17], index: 9, kind: input, shape index: {}, may-alias: {9,15}]   ;;  %s4974_s10 = inlined_call_operand.vmem [shape: f32[1,17], index: 10, kind: input, shape index: {}, may-alias: {10,16}]   ;;  %s4975_s11 = inlined_call_operand.vmem [shape: bf16[17,2048], index: 11, kind: input, shape index: {}]   ;;  %s4976_s12 = inlined_call_operand.vmem [shape: f32[1,2048], index: 12, kind: input, shape index: {}]   ;;  %s4977_s13 = inlined_call_operand.vmem [shape: bf16[2048,17], index: 13, kind: input, shape index: {}]   ;;  %s4978_s14 = inlined_call_operand.vmem [shape: f32[1,17], index: 14, kind: input, shape index: {}]   ;;  %s4979_s15 = inlined_call_operand.vmem [shape: f32[1,17], index: 15, kind: input, shape index: {}, may-alias: {9,15}]   ;;  %s4980_s16 = inlined_call_operand.vmem [shape: f32[1,17], index: 16, kind: input, shape index: {}, may-alias: {10,16}]   ;;  %s4981_s17 = inlined_call_operand.vmem [shape: f32[32,17], index: 17, kind: output, shape index: {}]  }
   0x1   :  { %4984 = sst [smem:[#allocation3_spill]] %s4964_s0 }
   0x2   :  { %4985 = sst [smem:[#allocation4_spill]] %s4965_s1 }
   0x3 LB: > { %s3352_s25 = sadd.s32 4294967295, %s4038_s24   ;;  %p3354_p0 = scmp.ge.s32.totalorder %s4038_s24, 1  ;;  %s4038_s24 = sphi %s4131_s24, %s27_s24  }
   0x4   : > { %p472_p1 = scmp.lt.s32.totalorder %s4038_s24, 3 }
   0x6   : > { %p473_p2 = pnand %p3354_p0, %p472_p1 }
   0x7   : > { %p3355_p3 = scmp.ne.s32.totalorder (!%p473_p2), %s3352_s25, 0 }
   0x8   : > { %476 = sbr.rel (%p473_p2) target bundleno = 2280 (0x8e8), region = 88 }
   0xf   : > { %518 = sbr.rel (%p3355_p3) target bundleno = 24 (0x18), region = 92  ;;  %s4986_s28 = sld [smem:[#allocation3_spill]] (!%p3355_p3)  ;;  %vm523_vm0 = vcmask (!%p3355_p3), 138240  }
  0x15   : > { %v519_v0 = vld [vmem:[%s4986_s28] sm:$0xff] (!%p3355_p3)  ;;  %v520_v1 = vld [vmem:[%s4986_s28 + $0x8] sm:$0xff] (!%p3355_p3)  ;;  %v521_v2 = vld [vmem:[%s4986_s28 + $0x10] sm:$0xff] (!%p3355_p3) }
  0x16   : > { %524 = vst.msk [vmem:[#allocation2] sm:$0xff] %vm523_vm0, %v519_v0  ;;  %525 = vst.msk [vmem:[#allocation2 + $0x8] sm:$0xff] %vm523_vm0, %v520_v1  ;;  %v522_v3 = vld [vmem:[%s4986_s28 + $0x18] sm:$0xff] }
  0x17   : > { %526 = vst.msk [vmem:[#allocation2 + $0x10] sm:$0xff] %vm523_vm0, %v521_v2  ;;  %527 = vst.msk [vmem:[#allocation2 + $0x18] sm:$0xff] %vm523_vm0, %v522_v3 }
  0x18 PF: > { %s4987_s22 = sld [smem:[#allocation4_spill]]  ;;  %vm560_vm1 = vcmask 1040384   ;;  %v3841_v5 = vld [vmem:[%s4966_s2] sm:$0xff]   ;;  %v4040_v7 = vmov 0   ;;  %vm553_vm2 = vcmask 138240  }
  0x19   : > { %v4161_v8 = vsel %vm560_vm1, 65535, %v4040_v7  ;;  %3807 = vmatprep.subr.bf16.mxu1 %v3841_v5  ;;  %v3843_v9 = vld [vmem:[%s4966_s2 + $0x8] ss:$0 sps:$4 sm:$0x11]   ;;  %v3844_v17 = vld [vmem:[%s4967_s3] sm:$0xff]  }
  0x1a   : > { %3808 = vmatpush3.bf16.msra.mxu1 %v3841_v5  ;;  %v635_v15 = vand.u32 %v3843_v9, %v4161_v8  ;;  %v3845_v19 = vld [vmem:[%s4967_s3 + $0x8] ss:$0 sps:$4 sm:$0x11]   ;;  %v3356_v21 = vld [vmem:[%s4968_s4] ss:$0 sm:$0xff] }
  0x1b   : > { %v706_v20 = vand.u32 %v3845_v19, %v4161_v8  ;;  %v3361_v22 = vld [vmem:[%s4969_s5] ss:$0 sm:$0xff]  ;;  %v3847_v60 = vld [vmem:[%s4971_s7 + $0x8] ss:$0 sps:$4 sm:$0x11]  }
  0x1c   : > { %3809 = vmatprep.subr.bf16.mxu1 %v635_v15  ;;  %v3846_v59 = vld [vmem:[%s4971_s7] sm:$0xff]   ;;  %v877_v61 = vand.u32 %v3847_v60, %v4161_v8 }
  0x1e   : > { %v3840_v4 = vld [vmem:[%s4987_s22] sm:$0xff]   ;;  %v3842_v6 = vld [vmem:[%s4987_s22 + $0x8] ss:$0 sps:$4 sm:$0x11]   ;;  %v4171_v13 = vld [vmem:[#allocation2 + $0x10] sm:$0xff]  ;;  %3810 = vmatpush3.bf16.msra.mxu1 %v635_v15 }
  0x1f   : > { %3799 = vmatprep.subr.bf16.mxu0 %v3840_v4  ;;  %v4166_v10 = vld [vmem:[#allocation2] sm:$0xff]  ;;  %v564_v11 = vand.u32 %v3842_v6, %v4161_v8  ;;  %v4169_v12 = vld [vmem:[#allocation2 + $0x8] sm:$0xff]  ;;  %v4173_v14 = vld [vmem:[#allocation2 + $0x18] sm:$0xff]  ;;  %3823 = vmatprep.subr.bf16.mxu1 %v3846_v59 }
  0x20   : > { %3800 = vmatpush3.bf16.msra.mxu0 %v3840_v4  ;;  %v532_v16 = vpack.c.bf16 %v4169_v12, %v4166_v10  ;;  %v533_v18 = vpack.c.bf16 %v4173_v14, %v4171_v13 }
  0x21   : > { %3801 = vmatprep.subr.bf16.mxu0 %v564_v11 }
  0x22   : > { %3803 = vmatprep.mubr.msk.bf16.mxu0 %vm553_vm2, %v532_v16  ;;  %3811 = vmatprep.mubr.msk.bf16.mxu1 %vm553_vm2, %v532_v16 }
  0x23   : > { %3812 = vmatmul.mubr.msk.bf16.vlgmr.msra.gmra.mrb[0].mxu1 %vm553_vm2, %v533_v18 }
  0x24   : > { %3802 = vmatpush3.bf16.msra.mxu0 %v564_v11  ;;  %3824 = vmatpush3.bf16.msra.mxu1 %v3846_v59 }
  0x25   : > { %3815 = vmatprep.subr.bf16.mxu0 %v3844_v17  ;;  %3825 = vmatprep.subr.bf16.mxu1 %v877_v61 }
  0x27   : > { %3804 = vmatmul.mubr.msk.bf16.vlgmr.msra.gmra.mrb[0].mxu0 %vm553_vm2, %v533_v18 }
  0x28   : > { %3816 = vmatpush3.bf16.msra.mxu0 %v3844_v17  ;;  %3819 = vmatprep.mubr.msk.bf16.mxu0 %vm553_vm2, %v532_v16 }
  0x29   : > { %3817 = vmatprep.subr.bf16.mxu0 %v706_v20  ;;  %3826 = vmatpush3.bf16.msra.mxu1 %v877_v61 }
  0x2c   : > { %3818 = vmatpush3.bf16.msra.mxu0 %v706_v20 }
  0x2f   : > { %3820 = vmatmul.mubr.msk.bf16.vlgmr.msra.gmra.mrb[4].mxu0 %vm553_vm2, %v533_v18 }
  0x30   : > { %1117 = vmatprep.mubr.bf16.mxu0 %v4040_v7 }
  0xf6   : > { %v3813_v25 = vpop.f32.mrb[0].mxu1 }
  0xf7   : > { %v680_v27 = vadd.f32 %v3813_v25, %v3361_v22  ;;  %v671_v29 = vpop.f32.mrb[1].mxu1 }
  0xf8   : > { %v672_v31 = vadd.f32 %v3361_v22, %v671_v29  ;;  %v3814_v33 = vpop.f32.mrb[2].mxu1 }
  0xf9   : > { %v683_v35 = vadd.f32 %v3814_v33, %v3361_v22  ;;  %v674_v37 = vpop.f32.mrb[3].mxu1 }
  0xfa   : > { %v3805_v23 = vpop.f32.mrb[0].mxu0  ;;  %v675_v40 = vadd.f32 %v3361_v22, %v674_v37 }
  0xfb   : > { %v609_v24 = vadd.f32 %v3805_v23, %v3356_v21  ;;  %v600_v26 = vpop.f32.mrb[1].mxu0 }
  0xfc   : > { %v601_v28 = vadd.f32 %v3356_v21, %v600_v26  ;;  %v3806_v30 = vpop.f32.mrb[2].mxu0 }
  0xfd   : > { %v612_v32 = vadd.f32 %v3806_v30, %v3356_v21  ;;  %v603_v34 = vpop.f32.mrb[3].mxu0  ;;  %v811_v39 = vmul.f32 %v680_v27, %v609_v24  ;;  %v803_v42 = vmul.f32 %v672_v31, %v609_v24 }
  0xfe   : > { %v604_v36 = vadd.f32 %v3356_v21, %v603_v34  ;;  %v765_v38 = vmul.f32 %v680_v27, %v601_v28  ;;  %v757_v41 = vmul.f32 %v672_v31, %v601_v28 }
  0xff   : > { %v812_v45 = vmul.f32 %v683_v35, %v612_v32  ;;  %v804_v47 = vmul.f32 %v675_v40, %v612_v32  ;;  %v805_v50 = vsel %vm553_vm2, %v803_v42, 0.0  ;;  %v813_v54 = vsel %vm553_vm2, %v811_v39, 0.0 }
 0x100   : > { %v767_v43 = vsel %vm553_vm2, %v765_v38, 0.0  ;;  %v766_v44 = vmul.f32 %v683_v35, %v604_v36  ;;  %v759_v46 = vsel %vm553_vm2, %v757_v41, 0.0  ;;  %v758_v48 = vmul.f32 %v675_v40, %v604_v36  ;;  %v3366_v38 = vld [vmem:[%s4970_s6] ss:$0 sm:$0xff] }
 0x101   : > { %768 = vadd.xlane.f32.xlu1 %v767_v43  ;;  %760 = vadd.xlane.f32.xlu0 %v759_v46  ;;  %v808_v51 = vsel %vm553_vm2, %v804_v47, 0.0  ;;  %v816_v53 = vsel %vm553_vm2, %v812_v45, 0.0 }
 0x102   : > { %v770_v49 = vsel %vm553_vm2, %v766_v44, 0.0  ;;  %v762_v52 = vsel %vm553_vm2, %v758_v48, 0.0  ;;  %v3821_v55 = vpop.f32.mrb[4].mxu0 }
 0x103   : > { %v742_v56 = vpop.f32.mrb[5].mxu0  ;;  %v751_v43 = vadd.f32 %v3821_v55, %v3366_v38 }
 0x104   : > { %v4208_v57 = vpop.f32.mrb[6].mxu0  ;;  %v743_v44 = vadd.f32 %v3366_v38, %v742_v56 }
 0x105   : > { %771 = vadd.xlane.f32.xlu1 %v770_v49  ;;  %806 = vadd.xlane.f32.xlu0 %v805_v50  ;;  %v4210_v58 = vpop.f32.mrb[7].mxu0 }
 0x109   : > { %809 = vadd.xlane.f32.xlu1 %v808_v51  ;;  %763 = vadd.xlane.f32.xlu0 %v762_v52 }
 0x10d   : > { %817 = vadd.xlane.f32.xlu1 %v816_v53  ;;  %814 = vadd.xlane.f32.xlu0 %v813_v54  ;;  %v754_v53 = vadd.f32 %v4208_v57, %v3366_v38  ;;  %v746_v54 = vadd.f32 %v3366_v38, %v4210_v58 }
 0x18e   : > { %v769_v62 = vpop.xlane.xlu1 %768  ;;  %v761_v63 = vpop.xlane.xlu0 %760 }
 0x18f   : > { %v773_v0 = vmax.f32 %v761_v63, %v769_v62 }
 0x191   : > { %v775_v1 = vsub.f32 %v761_v63, %v773_v0  ;;  %v781_v2 = vsub.f32 %v769_v62, %v773_v0 }
 0x192   : > { %v772_v3 = vpop.xlane.xlu1 %771  ;;  %v807_v4 = vpop.xlane.xlu0 %806 }
 0x193   : > { %v777_v5 = vmul.f32 1.442695, %v775_v1  ;;  %v783_v6 = vmul.f32 1.442695, %v781_v2 }
 0x195   : > { %3992 = vpow2.f32 %v777_v5 }
 0x196   : > { %v810_v9 = vpop.xlane.xlu1 %809  ;;  %3994 = vpow2.f32 %v783_v6  ;;  %v764_v11 = vpop.xlane.xlu0 %763 }
 0x197   : > { %v774_v15 = vmax.f32 %v764_v11, %v772_v3 }
 0x199   : > { %v776_v16 = vsub.f32 %v764_v11, %v774_v15  ;;  %v782_v17 = vsub.f32 %v772_v3, %v774_v15 }
 0x19a   : > { %v818_v18 = vpop.xlane.xlu1 %817  ;;  %v815_v20 = vpop.xlane.xlu0 %814 }
 0x19b   : > { %v820_v19 = vmax.f32 %v810_v9, %v818_v18  ;;  %v779_v21 = vmul.f32 1.442695, %v776_v16  ;;  %v785_v22 = vmul.f32 1.442695, %v782_v17  ;;  %v819_v23 = vmax.f32 %v807_v4, %v815_v20  ;;  %v3371_v17 = vld [vmem:[%s4972_s8] ss:$0 sm:$0xff] }
 0x19d   : > { %v822_v24 = vsub.f32 %v810_v9, %v820_v19  ;;  %v828_v25 = vsub.f32 %v818_v18, %v820_v19  ;;  %3996 = vpow2.f32 %v779_v21  ;;  %v821_v26 = vsub.f32 %v807_v4, %v819_v23 }
 0x19e   : > { %v827_v27 = vsub.f32 %v815_v20, %v819_v23  ;;  %3998 = vpow2.f32 %v785_v22 }
 0x19f   : > { %v825_v28 = vmul.f32 1.442695, %v822_v24  ;;  %v831_v29 = vmul.f32 1.442695, %v828_v25  ;;  %v3993_v30 = vpop.eup %3992  ;;  %v823_v31 = vmul.f32 1.442695, %v821_v26 }
 0x1a0   : > { %v3995_v32 = vpop.eup %3994  ;;  %v829_v33 = vmul.f32 1.442695, %v827_v27 }
 0x1a1   : > { %4000 = vpow2.f32 %v825_v28  ;;  %v787_v34 = vadd.f32 %v3995_v32, %v3993_v30 }
 0x1a2   : > { %4002 = vpow2.f32 %v831_v29 }
 0x1a3   : > { %4004 = vpow2.f32 %v823_v31 }
 0x1a4   : > { %4006 = vrcp.f32 %v787_v34 }
 0x1a5   : > { %4008 = vpow2.f32 %v829_v33 }
 0x1a7   : > { %v3997_v35 = vpop.eup %3996 }
 0x1a8   : > { %v3999_v36 = vpop.eup %3998 }
 0x1a9   : > { %v788_v37 = vadd.f32 %v3999_v36, %v3997_v35 }
 0x1ab   : > { %v4001_v39 = vpop.eup %4000  ;;  %4010 = vrcp.f32 %v788_v37 }
 0x1ac   : > { %v4003_v40 = vpop.eup %4002 }
 0x1ad   : > { %v4005_v41 = vpop.eup %4004  ;;  %v834_v42 = vadd.f32 %v4003_v40, %v4001_v39 }
 0x1ae   : > { %v4007_v45 = vpop.eup %4006 }
 0x1af   : > { %v4009_v46 = vpop.eup %4008  ;;  %4012 = vrcp.f32 %v834_v42  ;;  %v797_v47 = vmul.f32 %v4007_v45, %v3995_v32  ;;  %v791_v48 = vmul.f32 %v4007_v45, %v3993_v30 }
 0x1b0   : > { %v833_v49 = vadd.f32 %v4009_v46, %v4005_v41 }
 0x1b1   : > { %v799_v50 = vmul.f32 %v797_v47, %v751_v43  ;;  %v793_v51 = vmul.f32 %v791_v48, %v743_v44 }
 0x1b2   : > { %4014 = vrcp.f32 %v833_v49 }
 0x1b3   : > { %v801_v52 = vadd.f32 %v799_v50, %v793_v51  ;;  %v1009_v50 = vld [vmem:[%s4975_s11] sm:$0xff] }
 0x1b4   : > { %v1011_v51 = vld [vmem:[%s4975_s11 + $0x40] sm:$0xff] }
 0x1b5   : > { %v4011_v59 = vpop.eup %4010 }
 0x1b6   : > { %v798_v60 = vmul.f32 %v4011_v59, %v3999_v36  ;;  %v792_v61 = vmul.f32 %v4011_v59, %v3997_v35  ;;  %v3378_v59 = vcombine.low %v1009_v50, %v1011_v51 }
 0x1b8   : > { %v800_v55 = vmul.f32 %v798_v60, %v754_v53  ;;  %v794_v56 = vmul.f32 %v792_v61, %v746_v54 }
 0x1b9   : > { %v4013_v62 = vpop.eup %4012 }
 0x1ba   : > { %v844_v63 = vmul.f32 %v4013_v62, %v4003_v40  ;;  %v838_v0 = vmul.f32 %v4013_v62, %v4001_v39  ;;  %v802_v1 = vadd.f32 %v800_v55, %v794_v56  ;;  %v1013_v62 = vld [vmem:[%s4975_s11 + $0x80] sm:$0x11]  ;;  %v1014_v55 = vld [vmem:[%s4975_s11 + $0x88] sm:$0x11] }
 0x1bb   : > { %v3383_v56 = vcombine.high %v1013_v62, %v1013_v62 }
 0x1bc   : > { %v4015_v2 = vpop.eup %4014  ;;  %v846_v3 = vmul.f32 %v844_v63, %v754_v53  ;;  %v840_v4 = vmul.f32 %v838_v0, %v746_v54  ;;  %v849_v9 = vpack.c.bf16 %v802_v1, %v801_v52  ;;  %v1010_v52 = vld [vmem:[%s4975_s11 + $0x8] sm:$0xff]  ;;  %v3379_v53 = vcombine.high %v1009_v50, %v1011_v51 }
 0x1bd   : > { %v843_v5 = vmul.f32 %v4015_v2, %v4009_v46  ;;  %v837_v6 = vmul.f32 %v4015_v2, %v4005_v41  ;;  %v1012_v54 = vld [vmem:[%s4975_s11 + $0x48] sm:$0xff]  ;;  %v3385_v63 = vcombine.high %v1014_v55, %v1014_v55  ;;  %v3382_v0 = vcombine.low %v1013_v62, %v1013_v62  ;;  %v3858_v62 = vld [vmem:[%s4977_s13 + $0x100] sm:$0xff]  }
 0x1be   : > { %v848_v11 = vadd.f32 %v846_v3, %v840_v4  ;;  %3827 = vmatprep.mubr.msk.bf16.mxu1 %vm553_vm2, %v849_v9  ;;  %v3380_v60 = vcombine.low %v1010_v52, %v1012_v54  ;;  %v3381_v61 = vcombine.high %v1010_v52, %v1012_v54  ;;  %1085 = vmatprep.subr.bf16.mxu0 %v3379_v53  ;;  %v1281_v9 = vld [vmem:[%s4975_s11 + $0x50] sm:$0xff]  ;;  %v3856_v54 = vld [vmem:[%s4977_s13 + $0x140] sm:$0xff]  }
 0x1bf   : > { %v845_v15 = vmul.f32 %v843_v5, %v751_v43  ;;  %v839_v57 = vmul.f32 %v837_v6, %v743_v44  ;;  %1086 = vmatpush1.bf16.msra.mxu0 %v3378_v59  ;;  %v3384_v1 = vcombine.low %v1014_v55, %v1014_v55  ;;  %v1077_v2 = vand.u32 %v3383_v56, %v4161_v8  ;;  %v1279_v6 = vld [vmem:[%s4975_s11 + $0x10] sm:$0xff]  ;;  %v3857_v59 = vld [vmem:[%s4977_s13 + $0x1c0] sm:$0xff]   ;;  %v3860_v56 = vld [vmem:[%s4977_s13 + $0x148] sm:$0xff]  }
 0x1c0   : > { %1138 = vmatprep.subr.bf16.mxu1 %v3381_v61  ;;  %v1083_v3 = vand.u32 %v3385_v63, %v4161_v8  ;;  %v1074_v4 = vand.u32 %v3382_v0, %v4161_v8  ;;  %v3859_v55 = vld [vmem:[%s4977_s13 + $0x180] sm:$0xff]   ;;  %v3861_v63 = vld [vmem:[%s4977_s13 + $0x1c8] sm:$0xff]  }
 0x1c1   : > { %v847_v58 = vadd.f32 %v845_v15, %v839_v57  ;;  %v1080_v5 = vand.u32 %v3384_v1, %v4161_v8  ;;  %1087 = vmatprep.subr.bf16.mxu0 %v1077_v2  ;;  %v3390_v15 = vcombine.low %v1279_v6, %v1281_v9  ;;  %v3391_v57 = vcombine.high %v1279_v6, %v1281_v9  ;;  %v3862_v0 = vld [vmem:[%s4977_s13 + $0x108] sm:$0xff]   ;;  %v3864_v2 = vld [vmem:[%s4977_s13 + $0x150] sm:$0xff]   ;;  %v3868_v6 = vld [vmem:[%s4977_s13 + $0x158] sm:$0xff]  }
 0x1c2   : > { %v3863_v1 = vld [vmem:[%s4977_s13 + $0x188] sm:$0xff]   ;;  %v3869_v9 = vld [vmem:[%s4977_s13 + $0x1d8] sm:$0xff]  }
 0x1c3   : > { %v850_v16 = vpack.c.bf16 %v848_v11, %v847_v58  ;;  %1088 = vmatpush1.bf16.msra.mxu0 %v1074_v4  ;;  %v1280_v11 = vld [vmem:[%s4975_s11 + $0x18] sm:$0xff]  ;;  %v3866_v4 = vld [vmem:[%s4977_s13 + $0x110] sm:$0xff]  }
 0x1c4   : > { %v1282_v58 = vld [vmem:[%s4975_s11 + $0x58] sm:$0xff]  ;;  %1349 = vmatprep.subr.bf16.mxu0 %v3391_v57  ;;  %v3872_v57 = vld [vmem:[%s4977_s13 + $0x160] sm:$0xff]  }
 0x1c5   : > { %3828 = vmatmul.mubr.msk.bf16.vlgmr.msra.gmra.mrb[4].mxu1 %vm553_vm2, %v850_v16  ;;  %v3392_v16 = vcombine.low %v1280_v11, %v1282_v58 }
 0x1c6   : > { %1170 = vmatprep.mubr.bf16.mxu1 %v4040_v7  ;;  %1139 = vmatpush1.bf16.msra.mxu1 %v3380_v60 }
 0x1c7   : > { %1140 = vmatprep.subr.bf16.mxu1 %v1083_v3  ;;  %v3865_v3 = vld [vmem:[%s4977_s13 + $0x1d0] sm:$0xff]  }
 0x1ca   : > { %1141 = vmatpush1.bf16.msra.mxu1 %v1080_v5  ;;  %v3867_v5 = vld [vmem:[%s4977_s13 + $0x190] sm:$0xff]  }
 0x298   : > { %v3829_v18 = vpop.f32.mrb[4].mxu1 }
 0x299   : > { %v913_v19 = vpop.f32.mrb[5].mxu1  ;;  %v922_v20 = vadd.f32 %v3829_v18, %v3371_v17 }
 0x29a   : > { %v914_v21 = vadd.f32 %v3371_v17, %v913_v19  ;;  %v3830_v22 = vpop.f32.mrb[6].mxu1 }
 0x29b   : > { %v916_v23 = vpop.f32.mrb[7].mxu1  ;;  %v925_v24 = vadd.f32 %v3830_v22, %v3371_v17  ;;  %v930_v29 = vadd.f32 %v922_v20, %v4171_v13 }
 0x29c   : > { %v917_v25 = vadd.f32 %v3371_v17, %v916_v23  ;;  %v928_v26 = vadd.f32 %v914_v21, %v4166_v10  ;;  %v3393_v17 = vcombine.high %v1280_v11, %v1282_v58  ;;  %v3870_v11 = vld [vmem:[%s4977_s13 + $0x118] sm:$0xff]   ;;  %v3873_v58 = vld [vmem:[%s4977_s13 + $0x1e0] sm:$0xff]  }
 0x29d   : > { %v931_v31 = vadd.f32 %v925_v24, %v4173_v14  ;;  %v940_v32 = vsel %vm553_vm2, %v930_v29, 0.0 }
 0x29e   : > { %v934_v27 = vsel %vm553_vm2, %v928_v26, 0.0  ;;  %v929_v28 = vadd.f32 %v917_v25, %v4169_v12  ;;  %1402 = vmatprep.subr.bf16.mxu1 %v3393_v17  ;;  %v3875_v17 = vld [vmem:[%s4977_s13 + $0x1a0] sm:$0xff]  }
 0x29f   : > { %935 = vadd.xlane.f32.xlu0 %v934_v27  ;;  %v943_v33 = vsel %vm553_vm2, %v931_v31, 0.0 }
 0x2a0   : > { %v937_v30 = vsel %vm553_vm2, %v929_v28, 0.0 }
 0x2a1   : > { %938 = vadd.xlane.f32.xlu1 %v937_v30 }
 0x2a3   : > { %941 = vadd.xlane.f32.xlu0 %v940_v32 }
 0x2a5   : > { %944 = vadd.xlane.f32.xlu1 %v943_v33 }
 0x32c   : > { %v936_v34 = vpop.xlane.xlu0 %935 }
 0x32d   : > { %v947_v10 = vmul.f32 0.05882353, %v936_v34 }
 0x32e   : > { %v939_v35 = vpop.xlane.xlu1 %938 }
 0x32f   : > { %v4238_v36 = vsub.f32 %v928_v26, %v947_v10  ;;  %v948_v12 = vmul.f32 0.05882353, %v939_v35  ;;  %v1283_v35 = vld [vmem:[%s4975_s11 + $0x90] sm:$0x11] }
 0x330   : > { %v942_v37 = vpop.xlane.xlu0 %941 }
 0x331   : > { %v4240_v13 = vsub.f32 %v929_v28, %v948_v12  ;;  %v949_v38 = vmul.f32 0.05882353, %v942_v37  ;;  %v955_v14 = vmul.f32 %v4238_v36, %v4238_v36  ;;  %v1284_v12 = vld [vmem:[%s4975_s11 + $0x98] sm:$0x11] }
 0x332   : > { %v945_v39 = vpop.xlane.xlu1 %944 }
 0x333   : > { %v4244_v40 = vsub.f32 %v930_v29, %v949_v38  ;;  %v950_v41 = vmul.f32 0.05882353, %v945_v39  ;;  %v959_v42 = vsel %vm553_vm2, %v955_v14, 0.0  ;;  %v956_v43 = vmul.f32 %v4240_v13, %v4240_v13  ;;  %v3377_v38 = vld [vmem:[%s4974_s10] ss:$0 sm:$0xff] }
 0x334   : > { %960 = vadd.xlane.f32.xlu0 %v959_v42 }
 0x335   : > { %v4249_v44 = vsub.f32 %v931_v31, %v950_v41  ;;  %v962_v45 = vsel %vm553_vm2, %v956_v43, 0.0  ;;  %v957_v46 = vmul.f32 %v4244_v40, %v4244_v40  ;;  %v3376_v31 = vld [vmem:[%s4973_s9] ss:$0 sm:$0xff]  ;;  %v3397_v41 = vcombine.high %v1284_v12, %v1284_v12 }
 0x336   : > { %963 = vadd.xlane.f32.xlu1 %v962_v45 }
 0x337   : > { %v965_v47 = vsel %vm553_vm2, %v957_v46, 0.0  ;;  %v958_v48 = vmul.f32 %v4249_v44, %v4249_v44  ;;  %v3394_v46 = vcombine.low %v1283_v35, %v1283_v35  ;;  %v1347_v51 = vand.u32 %v3397_v41, %v4161_v8 }
 0x338   : > { %966 = vadd.xlane.f32.xlu0 %v965_v47  ;;  %v3396_v47 = vcombine.low %v1284_v12, %v1284_v12 }
 0x339   : > { %v968_v49 = vsel %vm553_vm2, %v958_v48, 0.0 }
 0x33a   : > { %969 = vadd.xlane.f32.xlu1 %v968_v49 }
 0x3c1   : > { %v961_v18 = vpop.xlane.xlu0 %960 }
 0x3c2   : > { %v971_v19 = vmul.f32 0.05882353, %v961_v18  ;;  %v3876_v18 = vld [vmem:[%s4977_s13 + $0x168] sm:$0xff]  }
 0x3c3   : > { %v964_v20 = vpop.xlane.xlu1 %963 }
 0x3c4   : > { %v975_v21 = vadd.f32 1e-05, %v971_v19  ;;  %v972_v22 = vmul.f32 0.05882353, %v964_v20  ;;  %v3877_v19 = vld [vmem:[%s4977_s13 + $0x1e8] sm:$0xff]  }
 0x3c5   : > { %v967_v23 = vpop.xlane.xlu0 %966  ;;  %v3878_v20 = vld [vmem:[%s4977_s13 + $0x128] sm:$0xff]  }
 0x3c6   : > { %4016 = vrsqrt.f32 %v975_v21  ;;  %v976_v24 = vadd.f32 1e-05, %v972_v22  ;;  %v973_v25 = vmul.f32 0.05882353, %v967_v23  ;;  %v3879_v21 = vld [vmem:[%s4977_s13 + $0x1a8] sm:$0xff]   ;;  %v3880_v22 = vld [vmem:[%s4977_s13 + $0x170] sm:$0xff]  }
 0x3c7   : > { %v970_v26 = vpop.xlane.xlu1 %969  ;;  %v3881_v23 = vld [vmem:[%s4977_s13 + $0x1f0] sm:$0xff]  }
 0x3c8   : > { %4018 = vrsqrt.f32 %v976_v24  ;;  %v977_v27 = vadd.f32 1e-05, %v973_v25  ;;  %v974_v28 = vmul.f32 0.05882353, %v970_v26  ;;  %v3882_v24 = vld [vmem:[%s4977_s13 + $0x130] sm:$0xff]   ;;  %v3884_v26 = vld [vmem:[%s4977_s13 + $0x178] sm:$0xff]  }
 0x3c9   : > { %v3883_v25 = vld [vmem:[%s4977_s13 + $0x1b0] sm:$0xff]  }
 0x3ca   : > { %4020 = vrsqrt.f32 %v977_v27  ;;  %v978_v29 = vadd.f32 1e-05, %v974_v28  ;;  %v3885_v27 = vld [vmem:[%s4977_s13 + $0x1f8] sm:$0xff]  }
 0x3cb   : > { %v3886_v28 = vld [vmem:[%s4977_s13 + $0x138] sm:$0xff]  }
 0x3cc   : > { %4022 = vrsqrt.f32 %v978_v29  ;;  %v3887_v29 = vld [vmem:[%s4977_s13 + $0x1b8] sm:$0xff]  }
 0x3d0   : > { %v4017_v30 = vpop.eup %4016 }
 0x3d1   : > { %v983_v32 = vmul.f32 %v4017_v30, %v4238_v36  ;;  %v3395_v36 = vcombine.high %v1283_v35, %v1283_v35  ;;  %v3888_v30 = vld [vmem:[%s4977_s13 + $0x40] sm:$0xff]  }
 0x3d2   : > { %v4019_v33 = vpop.eup %4018  ;;  %v1015_v35 = vld [vmem:[%s4976_s12] sm:$0xf] }
 0x3d3   : > { %v993_v34 = vmul.f32 %v3376_v31, %v983_v32  ;;  %v984_v10 = vmul.f32 %v4019_v33, %v4240_v13  ;;  %v1341_v50 = vand.u32 %v3395_v36, %v4161_v8  ;;  %v1017_v32 = vlaneseq }
 0x3d4   : > { %v4021_v37 = vpop.eup %4020 }
 0x3d5   : > { %v994_v14 = vmul.f32 %v3376_v31, %v984_v10  ;;  %v4306_v42 = vadd.f32 %v3377_v38, %v993_v34  ;;  %v985_v43 = vmul.f32 %v4021_v37, %v4244_v40  ;;  %v1338_v40 = vand.u32 %v3394_v46, %v4161_v8 }
 0x3d6   : > { %v4023_v39 = vpop.eup %4022  ;;  %v1018_v33 = vshrl.u32 %v1017_v32, 7 }
 0x3d7   : > { %v4308_v13 = vadd.f32 %v3377_v38, %v994_v14  ;;  %v986_v45 = vmul.f32 %v4023_v39, %v4249_v44  ;;  %v995_v52 = vmul.f32 %v3376_v31, %v985_v43  ;;  %v1344_v44 = vand.u32 %v3396_v47, %v4161_v8 }
 0x3d8   : > { %v4452_v34 = vsub.s32 0, %v1018_v33  ;;  %v4454_v10 = vsub.s32 2, %v1018_v33  ;;  %v4459_v12 = vsub.s32 1, %v1018_v33  ;;  %v4461_v37 = vsub.s32 3, %v1018_v33 }
 0x3d9   : > { %v4314_v48 = vpack.c.bf16 %v4308_v13, %v4306_v42  ;;  %v996_v49 = vmul.f32 %v3376_v31, %v986_v45  ;;  %v4334_v60 = vadd.f32 %v3377_v38, %v995_v52  ;;  %v3889_v31 = vld [vmem:[%s4977_s13 + $0xc0] sm:$0xff]  }
 0x3da   : > { %v1028_v14 = vrot.slane %v1015_v35, %v4454_v10  ;;  %v1024_v39 = vrot.slane %v1015_v35, %v4459_v12  ;;  %v1032_v36 = vrot.slane %v1015_v35, %v4461_v37 }
 0x3db   : > { %3386 = vmatmul.mubr.msk.bf16.vlgmr.msra.gmra.mrb[8].mxu0 %vm553_vm2, %v4314_v48  ;;  %3388 = vmatmul.mubr.msk.bf16.vlgmr.msra.gmra.mrb[8].mxu1 %vm553_vm2, %v4314_v48  ;;  %v4324_v53 = vadd.f32 %v3377_v38, %v996_v49  ;;  %v1020_v38 = vrot.slane %v1015_v35, %v4452_v34 }
 0x3dc   : > { %1350 = vmatpush1.bf16.msra.mxu0 %v3390_v15  ;;  %1403 = vmatpush1.bf16.msra.mxu1 %v3392_v16  ;;  %v3871_v15 = vld [vmem:[%s4977_s13 + $0x198] sm:$0xff]   ;;  %v3874_v16 = vld [vmem:[%s4977_s13 + $0x120] sm:$0xff]  }
 0x3dd   : > { %1127 = vmatprep.mubr.bf16.mxu0 %v4040_v7  ;;  %1180 = vmatprep.mubr.bf16.mxu1 %v4040_v7  ;;  %v4338_v61 = vpack.c.bf16 %v4324_v53, %v4334_v60 }
 0x3de   : > { %1351 = vmatprep.subr.bf16.mxu0 %v1341_v50  ;;  %1404 = vmatprep.subr.bf16.mxu1 %v1347_v51 }
 0x3e0   : > { %1352 = vmatpush1.bf16.msra.mxu0 %v1338_v40  ;;  %1405 = vmatpush1.bf16.msra.mxu1 %v1344_v44 }
 0x3e1   : > { %3575 = vmatprep.subr.bf16.mxu0 %v3856_v54  ;;  %3603 = vmatprep.subr.bf16.mxu1 %v3857_v59 }
 0x3e3   : > { %3387 = vmatmul.mubr.msk.bf16.gmra.mrb[12].mxu0 %vm553_vm2, %v4338_v61  ;;  %3389 = vmatmul.mubr.msk.bf16.gmra.mrb[12].mxu1 %vm553_vm2, %v4338_v61 }
 0x3e4   : > { %1381 = vmatprep.mubr.bf16.mxu0 %v4040_v7  ;;  %1434 = vmatprep.mubr.bf16.mxu1 %v4040_v7 }
 0x3eb   : > { %3398 = vmatmul.mubr.msk.bf16.vlgmr.msra.gmra.mrb[16].mxu0 %vm553_vm2, %v4314_v48  ;;  %3400 = vmatmul.mubr.msk.bf16.vlgmr.msra.gmra.mrb[16].mxu1 %vm553_vm2, %v4314_v48 }
 0x3ec   : > { %1391 = vmatprep.mubr.bf16.mxu0 %v4040_v7  ;;  %1444 = vmatprep.mubr.bf16.mxu1 %v4040_v7 }
 0x3ed   : > { %3576 = vmatpush3.bf16.msra.mxu0 %v3858_v62  ;;  %3604 = vmatpush3.bf16.msra.mxu1 %v3859_v55 }
 0x3ee   : > { %3577 = vmatprep.subr.bf16.mxu0 %v3860_v56  ;;  %3605 = vmatprep.subr.bf16.mxu1 %v3861_v63 }
 0x3f1   : > { %3578 = vmatpush3.bf16.msra.mxu0 %v3862_v0  ;;  %3606 = vmatpush3.bf16.msra.mxu1 %v3863_v1 }
 0x3f2   : > { %3579 = vmatprep.subr.bf16.mxu0 %v3864_v2  ;;  %3607 = vmatprep.subr.bf16.mxu1 %v3865_v3 }
 0x3f3   : > { %3399 = vmatmul.mubr.msk.bf16.gmra.mrb[20].mxu0 %vm553_vm2, %v4338_v61  ;;  %3401 = vmatmul.mubr.msk.bf16.gmra.mrb[20].mxu1 %vm553_vm2, %v4338_v61 }
 0x3f5   : > { %3580 = vmatpush3.bf16.msra.mxu0 %v3866_v4  ;;  %3608 = vmatpush3.bf16.msra.mxu1 %v3867_v5 }
 0x3f6   : > { %3581 = vmatprep.subr.bf16.mxu0 %v3868_v6  ;;  %3609 = vmatprep.subr.bf16.mxu1 %v3869_v9 }
 0x3f9   : > { %3582 = vmatpush3.bf16.msra.mxu0 %v3870_v11  ;;  %3610 = vmatpush3.bf16.msra.mxu1 %v3871_v15 }
 0x3fa   : > { %3583 = vmatprep.subr.bf16.mxu0 %v3872_v57  ;;  %3611 = vmatprep.subr.bf16.mxu1 %v3873_v58 }
 0x3fd   : > { %3584 = vmatpush3.bf16.msra.mxu0 %v3874_v16  ;;  %3612 = vmatpush3.bf16.msra.mxu1 %v3875_v17  ;;  %v1285_v17 = vld [vmem:[%s4976_s12 + $0x4] sm:$0xf] }
 0x3fe   : > { %3585 = vmatprep.subr.bf16.mxu0 %v3876_v18  ;;  %3613 = vmatprep.subr.bf16.mxu1 %v3877_v19  ;;  %v4481_v35 = vrot.slane %v1285_v17, %v4459_v12 }
 0x401   : > { %3586 = vmatpush3.bf16.msra.mxu0 %v3878_v20  ;;  %3614 = vmatpush3.bf16.msra.mxu1 %v3879_v21 }
 0x402   : > { %3587 = vmatprep.subr.bf16.mxu0 %v3880_v22  ;;  %3615 = vmatprep.subr.bf16.mxu1 %v3881_v23 }
 0x405   : > { %3588 = vmatpush3.bf16.msra.mxu0 %v3882_v24  ;;  %3616 = vmatpush3.bf16.msra.mxu1 %v3883_v25 }
 0x406   : > { %3589 = vmatprep.subr.bf16.mxu0 %v3884_v26  ;;  %3617 = vmatprep.subr.bf16.mxu1 %v3885_v27 }
 0x409   : > { %3590 = vmatpush3.bf16.msra.mxu0 %v3886_v28  ;;  %3618 = vmatpush3.bf16.msra.mxu1 %v3887_v29 }
 0x40a   : > { %3631 = vmatprep.subr.bf16.mxu0 %v3888_v30  ;;  %3659 = vmatprep.subr.bf16.mxu1 %v3889_v31  ;;  %v1290_v30 = vrot.slane %v1285_v17, %v4452_v34  ;;  %v1298_v31 = vrot.slane %v1285_v17, %v4454_v10 }
 0x4ae   : > { %v1119_v41 = vpop.f32.mrb[8].mxu0  ;;  %v1172_v43 = vpop.f32.mrb[8].mxu1 }
 0x4af   : > { %v1120_v45 = vadd.f32 %v1119_v41, %v1020_v38  ;;  %v1173_v46 = vadd.f32 %v1172_v43, %v1028_v14  ;;  %v1121_v47 = vpop.f32.mrb[9].mxu0  ;;  %v1174_v49 = vpop.f32.mrb[9].mxu1  ;;  %v4484_v41 = vrot.slane %v1285_v17, %v4461_v37 }
 0x4b0   : > { %v1122_v50 = vadd.f32 %v1121_v47, %v1024_v39  ;;  %v1175_v51 = vadd.f32 %v1174_v49, %v1032_v36  ;;  %v1123_v52 = vpop.f32.mrb[10].mxu0  ;;  %v1176_v40 = vpop.f32.mrb[10].mxu1 }
 0x4b1   : > { %v1124_v44 = vadd.f32 %v1123_v52, %v1020_v38  ;;  %v1177_v54 = vadd.f32 %v1176_v40, %v1028_v14  ;;  %v1125_v59 = vpop.f32.mrb[11].mxu0  ;;  %v1178_v62 = vpop.f32.mrb[11].mxu1  ;;  %v1191_v63 = vmax.f32 %v1120_v45, 0.0  ;;  %v1193_v0 = vmax.f32 %v1173_v46, 0.0 }
 0x4b2   : > { %v1126_v55 = vadd.f32 %v1125_v59, %v1024_v39  ;;  %v1179_v56 = vadd.f32 %v1178_v62, %v1032_v36  ;;  %v1192_v3 = vmax.f32 %v1122_v50, 0.0  ;;  %v1194_v4 = vmax.f32 %v1175_v51, 0.0 }
 0x4b3   : > { %v1195_v1 = vmax.f32 %v1124_v44, 0.0  ;;  %v1197_v2 = vmax.f32 %v1177_v54, 0.0 }
 0x4b4   : > { %v1196_v5 = vmax.f32 %v1126_v55, 0.0  ;;  %v1198_v6 = vmax.f32 %v1179_v56, 0.0 }
 0x4b5   : > { %v4467_v9 = vpack.c.bf16 %v1195_v1, %v1191_v63  ;;  %v4469_v11 = vpack.c.bf16 %v1197_v2, %v1193_v0 }
 0x4b6   : > { %v4471_v15 = vpack.c.bf16 %v1196_v5, %v1192_v3  ;;  %v4473_v57 = vpack.c.bf16 %v1198_v6, %v1194_v4  ;;  %v1129_v58 = vpop.f32.mrb[12].mxu0  ;;  %v1182_v16 = vpop.f32.mrb[12].mxu1 }
 0x4b7   : > { %v1130_v18 = vadd.f32 %v1129_v58, %v1020_v38  ;;  %v1183_v19 = vadd.f32 %v1182_v16, %v1028_v14  ;;  %v1131_v20 = vpop.f32.mrb[13].mxu0  ;;  %v1184_v21 = vpop.f32.mrb[13].mxu1 }
 0x4b8   : > { %v1132_v22 = vadd.f32 %v1131_v20, %v1024_v39  ;;  %v1185_v23 = vadd.f32 %v1184_v21, %v1032_v36  ;;  %v1133_v24 = vpop.f32.mrb[14].mxu0  ;;  %v1186_v25 = vpop.f32.mrb[14].mxu1 }
 0x4b9   : > { %v1134_v26 = vadd.f32 %v1133_v24, %v1020_v38  ;;  %v1187_v27 = vadd.f32 %v1186_v25, %v1028_v14  ;;  %v1135_v28 = vpop.f32.mrb[15].mxu0  ;;  %v1188_v29 = vpop.f32.mrb[15].mxu1  ;;  %v1199_v43 = vmax.f32 %v1130_v18, 0.0  ;;  %v1201_v45 = vmax.f32 %v1183_v19, 0.0 }
 0x4ba   : > { %v1136_v32 = vadd.f32 %v1135_v28, %v1024_v39  ;;  %v1189_v33 = vadd.f32 %v1188_v29, %v1032_v36  ;;  %v1200_v38 = vmax.f32 %v1132_v22, 0.0  ;;  %v1202_v14 = vmax.f32 %v1185_v23, 0.0 }
 0x4bb   : > { %v1203_v46 = vmax.f32 %v1134_v26, 0.0  ;;  %v1205_v47 = vmax.f32 %v1187_v27, 0.0 }
 0x4bc   : > { %v1204_v49 = vmax.f32 %v1136_v32, 0.0  ;;  %v1206_v50 = vmax.f32 %v1189_v33, 0.0  ;;  %v3890_v32 = vld [vmem:[%s4977_s13] sm:$0xff]  }
 0x4bd   : > { %v4486_v51 = vpack.c.bf16 %v1203_v46, %v1199_v43  ;;  %v4488_v52 = vpack.c.bf16 %v1205_v47, %v1201_v45  ;;  %v3891_v33 = vld [vmem:[%s4977_s13 + $0x80] sm:$0xff]  }
 0x4be   : > { %v4490_v39 = vpack.c.bf16 %v1204_v49, %v1200_v38  ;;  %v4492_v36 = vpack.c.bf16 %v1206_v50, %v1202_v14  ;;  %v1383_v40 = vpop.f32.mrb[16].mxu0  ;;  %v1436_v44 = vpop.f32.mrb[16].mxu1  ;;  %v3892_v38 = vld [vmem:[%s4977_s13 + $0x48] sm:$0xff]  }
 0x4bf   : > { %v1384_v54 = vadd.f32 %v1383_v40, %v1290_v30  ;;  %v1437_v59 = vadd.f32 %v1436_v44, %v1298_v31  ;;  %v1385_v62 = vpop.f32.mrb[17].mxu0  ;;  %v1438_v55 = vpop.f32.mrb[17].mxu1  ;;  %v3893_v14 = vld [vmem:[%s4977_s13 + $0xc8] sm:$0xff]  }
 0x4c0   : > { %v1386_v56 = vadd.f32 %v1385_v62, %v4481_v35  ;;  %v1439_v63 = vadd.f32 %v1438_v55, %v4484_v41  ;;  %v1387_v0 = vpop.f32.mrb[18].mxu0  ;;  %v1440_v1 = vpop.f32.mrb[18].mxu1 }
 0x4c1   : > { %v1388_v2 = vadd.f32 %v1387_v0, %v1290_v30  ;;  %v1441_v3 = vadd.f32 %v1440_v1, %v1298_v31  ;;  %v1389_v4 = vpop.f32.mrb[19].mxu0  ;;  %v1442_v5 = vpop.f32.mrb[19].mxu1  ;;  %v1455_v16 = vmax.f32 %v1384_v54, 0.0  ;;  %v1457_v17 = vmax.f32 %v1437_v59, 0.0  ;;  %v3894_v0 = vld [vmem:[%s4977_s13 + $0x8] sm:$0xff]  }
 0x4c2   : > { %v1390_v6 = vadd.f32 %v1389_v4, %v4481_v35  ;;  %v1443_v58 = vadd.f32 %v1442_v5, %v4484_v41  ;;  %v1456_v20 = vmax.f32 %v1386_v56, 0.0  ;;  %v1458_v21 = vmax.f32 %v1439_v63, 0.0  ;;  %v3895_v1 = vld [vmem:[%s4977_s13 + $0x88] sm:$0xff]  }
 0x4c3   : > { %v1459_v18 = vmax.f32 %v1388_v2, 0.0  ;;  %v1461_v19 = vmax.f32 %v1441_v3, 0.0 }
 0x4c4   : > { %v1460_v22 = vmax.f32 %v1390_v6, 0.0  ;;  %v1462_v23 = vmax.f32 %v1443_v58, 0.0 }
 0x4c5   : > { %v1471_v24 = vpack.c.bf16 %v1459_v18, %v1455_v16  ;;  %v1473_v25 = vpack.c.bf16 %v1461_v19, %v1457_v17 }
 0x4c6   : > { %v1472_v26 = vpack.c.bf16 %v1460_v22, %v1456_v20  ;;  %v1474_v27 = vpack.c.bf16 %v1462_v23, %v1458_v21  ;;  %v1393_v28 = vpop.f32.mrb[20].mxu0  ;;  %v1446_v29 = vpop.f32.mrb[20].mxu1  ;;  %v3898_v20 = vld [vmem:[%s4977_s13 + $0x10] sm:$0xff]   ;;  %v3900_v22 = vld [vmem:[%s4977_s13 + $0x58] sm:$0xff]  }
 0x4c7   : > { %v1394_v43 = vadd.f32 %v1393_v28, %v1290_v30  ;;  %v1447_v45 = vadd.f32 %v1446_v29, %v1298_v31  ;;  %v1395_v46 = vpop.f32.mrb[21].mxu0  ;;  %v1448_v47 = vpop.f32.mrb[21].mxu1  ;;  %v3899_v21 = vld [vmem:[%s4977_s13 + $0x90] sm:$0xff]   ;;  %v3901_v23 = vld [vmem:[%s4977_s13 + $0xd8] sm:$0xff]   ;;  %v3906_v28 = vld [vmem:[%s4977_s13 + $0x20] sm:$0xff]  }
 0x4c8   : > { %v1396_v49 = vadd.f32 %v1395_v46, %v4481_v35  ;;  %v1449_v50 = vadd.f32 %v1448_v47, %v4484_v41  ;;  %v1397_v40 = vpop.f32.mrb[22].mxu0  ;;  %v1450_v44 = vpop.f32.mrb[22].mxu1  ;;  %1767 = vmatprep.mubr.bf16.mxu0 %v1472_v26  ;;  %1816 = vmatprep.mubr.bf16.mxu1 %v1474_v27  ;;  %v3904_v26 = vld [vmem:[%s4977_s13 + $0x60] sm:$0xff]   ;;  %v3909_v29 = vld [vmem:[%s4977_s13 + $0xe8] sm:$0xff]   ;;  %v3914_v46 = vld [vmem:[%s4977_s13 + $0x30] sm:$0xff]  }
 0x4c9   : > { %v1398_v54 = vadd.f32 %v1397_v40, %v1290_v30  ;;  %v1451_v59 = vadd.f32 %v1450_v44, %v1298_v31  ;;  %v1399_v62 = vpop.f32.mrb[23].mxu0  ;;  %v1452_v55 = vpop.f32.mrb[23].mxu1  ;;  %1768 = vmatmul.mubr.bf16.vlgmr.msra.gmra.mrb[24].mxu0 %v1471_v24  ;;  %1817 = vmatmul.mubr.bf16.vlgmr.msra.gmra.mrb[24].mxu1 %v1473_v25  ;;  %v1463_v30 = vmax.f32 %v1394_v43, 0.0  ;;  %v1465_v31 = vmax.f32 %v1447_v45, 0.0  ;;  %v3902_v24 = vld [vmem:[%s4977_s13 + $0x18] sm:$0xff]   ;;  %v3905_v27 = vld [vmem:[%s4977_s13 + $0xe0] sm:$0xff]  }
 0x4ca   : > { %v1400_v56 = vadd.f32 %v1399_v62, %v4481_v35  ;;  %v1453_v63 = vadd.f32 %v1452_v55, %v4484_v41  ;;  %3632 = vmatpush3.bf16.msra.mxu0 %v3890_v32  ;;  %3660 = vmatpush3.bf16.msra.mxu1 %v3891_v33  ;;  %v3896_v35 = vld [vmem:[%s4977_s13 + $0x50] sm:$0xff]   ;;  %v1464_v4 = vmax.f32 %v1396_v49, 0.0  ;;  %v1466_v5 = vmax.f32 %v1449_v50, 0.0  ;;  %v3903_v25 = vld [vmem:[%s4977_s13 + $0x98] sm:$0xff]   ;;  %v3910_v32 = vld [vmem:[%s4977_s13 + $0x28] sm:$0xff]  }
 0x4cb   : > { %v1467_v2 = vmax.f32 %v1398_v54, 0.0  ;;  %v1469_v3 = vmax.f32 %v1451_v59, 0.0  ;;  %3633 = vmatprep.subr.bf16.mxu0 %v3892_v38  ;;  %3661 = vmatprep.subr.bf16.mxu1 %v3893_v14  ;;  %v3897_v41 = vld [vmem:[%s4977_s13 + $0xd0] sm:$0xff]   ;;  %v3911_v33 = vld [vmem:[%s4977_s13 + $0xa8] sm:$0xff]   ;;  %v3916_v38 = vld [vmem:[%s4977_s13 + $0x78] sm:$0xff]  }
 0x4cc   : > { %v1468_v6 = vmax.f32 %v1400_v56, 0.0  ;;  %v1470_v58 = vmax.f32 %v1453_v63, 0.0  ;;  %v3912_v43 = vld [vmem:[%s4977_s13 + $0x70] sm:$0xff]   ;;  %v3917_v14 = vld [vmem:[%s4977_s13 + $0xf8] sm:$0xff]   ;;  %v2123_v49 = vld [vmem:[%s4975_s11 + $0x20] sm:$0xff] }
 0x4cd   : > { %v1475_v16 = vpack.c.bf16 %v1467_v2, %v1463_v30  ;;  %v1477_v17 = vpack.c.bf16 %v1469_v3, %v1465_v31  ;;  %v3913_v45 = vld [vmem:[%s4977_s13 + $0xf0] sm:$0xff]   ;;  %v2125_v50 = vld [vmem:[%s4975_s11 + $0x60] sm:$0xff]  ;;  %v2124_v40 = vld [vmem:[%s4975_s11 + $0x28] sm:$0xff] }
 0x4ce   : > { %v1476_v18 = vpack.c.bf16 %v1468_v6, %v1464_v4  ;;  %v1478_v19 = vpack.c.bf16 %v1470_v58, %v1466_v5  ;;  %3634 = vmatpush3.bf16.msra.mxu0 %v3894_v0  ;;  %3662 = vmatpush3.bf16.msra.mxu1 %v3895_v1  ;;  %v3915_v47 = vld [vmem:[%s4977_s13 + $0xb0] sm:$0xff]   ;;  %v2126_v44 = vld [vmem:[%s4975_s11 + $0x68] sm:$0xff]  ;;  %v2127_v54 = vld [vmem:[%s4975_s11 + $0xa0] sm:$0x11]  ;;  %v3467_v56 = vcombine.high %v2123_v49, %v2125_v50 }
 0x4cf   : > { %3635 = vmatprep.subr.bf16.mxu0 %v3896_v35  ;;  %3663 = vmatprep.subr.bf16.mxu1 %v3897_v41  ;;  %v2128_v59 = vld [vmem:[%s4975_s11 + $0xa8] sm:$0x11]  ;;  %v3918_v62 = vld [vmem:[%s4977_s13 + $0x38] sm:$0xff]   ;;  %v3469_v63 = vcombine.high %v2124_v40, %v2126_v44  ;;  %v3471_v0 = vcombine.high %v2127_v54, %v2127_v54  ;;  %v3466_v30 = vcombine.low %v2123_v49, %v2125_v50  ;;  %v4733_v49 = vld [vmem:[%s4975_s11 + $0x30] sm:$0xff] }
 0x4d0   : > { %1775 = vmatprep.mubr.bf16.mxu0 %v1476_v18  ;;  %1824 = vmatprep.mubr.bf16.mxu1 %v1478_v19  ;;  %v3919_v55 = vld [vmem:[%s4977_s13 + $0xb8] sm:$0xff]   ;;  %v3473_v1 = vcombine.high %v2128_v59, %v2128_v59  ;;  %v3468_v31 = vcombine.low %v2124_v40, %v2126_v44  ;;  %v3470_v2 = vcombine.low %v2127_v54, %v2127_v54  ;;  %v3930_v6 = vld [vmem:[%s4977_s13 + $0x208] sm:$0xff]   ;;  %v3934_v18 = vld [vmem:[%s4977_s13 + $0x210] sm:$0xff]  }
 0x4d1   : > { %1776 = vmatmul.mubr.bf16.gmra.mrb[28].mxu0 %v1475_v16  ;;  %1825 = vmatmul.mubr.bf16.gmra.mrb[28].mxu1 %v1477_v17  ;;  %v3472_v3 = vcombine.low %v2128_v59, %v2128_v59  ;;  %v2185_v35 = vand.u32 %v3471_v0, %v4161_v8  ;;  %v3931_v58 = vld [vmem:[%s4977_s13 + $0x288] sm:$0xff]   ;;  %v3932_v16 = vld [vmem:[%s4977_s13 + $0x250] sm:$0xff]   ;;  %v4743_v40 = vld [vmem:[%s4975_s11 + $0x38] sm:$0xff] }
 0x4d2   : > { %3636 = vmatpush3.bf16.msra.mxu0 %v3898_v20  ;;  %3664 = vmatpush3.bf16.msra.mxu1 %v3899_v21  ;;  %v2191_v41 = vand.u32 %v3473_v1, %v4161_v8  ;;  %v2182_v4 = vand.u32 %v3470_v2, %v4161_v8  ;;  %v3933_v17 = vld [vmem:[%s4977_s13 + $0x2d0] sm:$0xff]   ;;  %v3936_v20 = vld [vmem:[%s4977_s13 + $0x258] sm:$0xff]  }
 0x4d3   : > { %2057 = vmatprep.mubr.bf16.mxu0 %v4471_v15  ;;  %2106 = vmatprep.mubr.bf16.mxu1 %v4473_v57  ;;  %v3907_v15 = vld [vmem:[%s4977_s13 + $0xa0] sm:$0xff]   ;;  %v3908_v57 = vld [vmem:[%s4977_s13 + $0x68] sm:$0xff]   ;;  %v2188_v5 = vand.u32 %v3472_v3, %v4161_v8  ;;  %v3935_v19 = vld [vmem:[%s4977_s13 + $0x290] sm:$0xff]  }
 0x4d4   : > { %3637 = vmatprep.subr.bf16.mxu0 %v3900_v22  ;;  %3665 = vmatprep.subr.bf16.mxu1 %v3901_v23  ;;  %v3937_v21 = vld [vmem:[%s4977_s13 + $0x2d8] sm:$0xff]   ;;  %v4738_v50 = vld [vmem:[%s4975_s11 + $0x70] sm:$0xff] }
 0x4d5   : > { %v3938_v22 = vld [vmem:[%s4977_s13 + $0x218] sm:$0xff]   ;;  %v3510_v44 = vcombine.low %v4733_v49, %v4738_v50  ;;  %v3511_v54 = vcombine.high %v4733_v49, %v4738_v50  ;;  %v3961_v49 = vld [vmem:[%s4977_s13 + $0x3c0] sm:$0xff]  }
 0x4d6   : > { %3638 = vmatpush3.bf16.msra.mxu0 %v3902_v24  ;;  %3666 = vmatpush3.bf16.msra.mxu1 %v3903_v25  ;;  %v3939_v23 = vld [vmem:[%s4977_s13 + $0x298] sm:$0xff]   ;;  %v3940_v24 = vld [vmem:[%s4977_s13 + $0x260] sm:$0xff]  }
 0x4d7   : > { %3639 = vmatprep.subr.bf16.mxu0 %v3904_v26  ;;  %3667 = vmatprep.subr.bf16.mxu1 %v3905_v27  ;;  %v3941_v25 = vld [vmem:[%s4977_s13 + $0x2e0] sm:$0xff]   ;;  %v4752_v59 = vld [vmem:[%s4975_s11 + $0x78] sm:$0xff] }
 0x4d8   : > { %v3942_v26 = vld [vmem:[%s4977_s13 + $0x220] sm:$0xff]  }
 0x4d9   : > { %v3943_v27 = vld [vmem:[%s4977_s13 + $0x2a0] sm:$0xff]  }
 0x4da   : > { %3640 = vmatpush3.bf16.msra.mxu0 %v3906_v28  ;;  %3668 = vmatpush3.bf16.msra.mxu1 %v3907_v15  ;;  %v3944_v28 = vld [vmem:[%s4977_s13 + $0x268] sm:$0xff]  }
 0x4db   : > { %3641 = vmatprep.subr.bf16.mxu0 %v3908_v57  ;;  %3669 = vmatprep.subr.bf16.mxu1 %v3909_v29  ;;  %v3945_v15 = vld [vmem:[%s4977_s13 + $0x2e8] sm:$0xff]  }
 0x4dc   : > { %v3946_v57 = vld [vmem:[%s4977_s13 + $0x228] sm:$0xff]  }
 0x4dd   : > { %v3947_v29 = vld [vmem:[%s4977_s13 + $0x2a8] sm:$0xff]  }
 0x4de   : > { %3642 = vmatpush3.bf16.msra.mxu0 %v3910_v32  ;;  %3670 = vmatpush3.bf16.msra.mxu1 %v3911_v33  ;;  %v3948_v32 = vld [vmem:[%s4977_s13 + $0x270] sm:$0xff]  }
 0x4df   : > { %3643 = vmatprep.subr.bf16.mxu0 %v3912_v43  ;;  %3671 = vmatprep.subr.bf16.mxu1 %v3913_v45  ;;  %v3949_v33 = vld [vmem:[%s4977_s13 + $0x2f0] sm:$0xff]  }
 0x4e0   : > { %v3950_v43 = vld [vmem:[%s4977_s13 + $0x230] sm:$0xff]  }
 0x4e1   : > { %v3951_v45 = vld [vmem:[%s4977_s13 + $0x2b0] sm:$0xff]  }
 0x4e2   : > { %3644 = vmatpush3.bf16.msra.mxu0 %v3914_v46  ;;  %3672 = vmatpush3.bf16.msra.mxu1 %v3915_v47  ;;  %v3952_v46 = vld [vmem:[%s4977_s13 + $0x278] sm:$0xff]  }
 0x4e3   : > { %3645 = vmatprep.subr.bf16.mxu0 %v3916_v38  ;;  %3673 = vmatprep.subr.bf16.mxu1 %v3917_v14  ;;  %v3953_v47 = vld [vmem:[%s4977_s13 + $0x2f8] sm:$0xff]  }
 0x4e4   : > { %v3954_v38 = vld [vmem:[%s4977_s13 + $0x238] sm:$0xff]  }
 0x4e5   : > { %v3955_v14 = vld [vmem:[%s4977_s13 + $0x2b8] sm:$0xff]  }
 0x4e6   : > { %3646 = vmatpush3.bf16.msra.mxu0 %v3918_v62  ;;  %3674 = vmatpush3.bf16.msra.mxu1 %v3919_v55  ;;  %v3512_v62 = vcombine.low %v4743_v40, %v4752_v59  ;;  %v3513_v55 = vcombine.high %v4743_v40, %v4752_v59 }
 0x4e7   : > { %2193 = vmatprep.subr.bf16.mxu0 %v3467_v56  ;;  %2246 = vmatprep.subr.bf16.mxu1 %v3469_v63 }
 0x4e9   : > { %2058 = vmatmul.mubr.bf16.vlgmr.msra.gmra.mrb[32].mxu0 %v4467_v9  ;;  %2107 = vmatmul.mubr.bf16.vlgmr.msra.gmra.mrb[32].mxu1 %v4469_v11  ;;  %v3924_v9 = vld [vmem:[%s4977_s13 + $0x240] sm:$0xff]  }
 0x4ea   : > { %2065 = vmatprep.mubr.bf16.mxu0 %v4490_v39  ;;  %2114 = vmatprep.mubr.bf16.mxu1 %v4492_v36  ;;  %v3925_v11 = vld [vmem:[%s4977_s13 + $0x2c0] sm:$0xff]   ;;  %v3928_v39 = vld [vmem:[%s4977_s13 + $0x248] sm:$0xff]  }
 0x4eb   : > { %2194 = vmatpush1.bf16.msra.mxu0 %v3466_v30  ;;  %2247 = vmatpush1.bf16.msra.mxu1 %v3468_v31  ;;  %v3929_v36 = vld [vmem:[%s4977_s13 + $0x2c8] sm:$0xff]  }
 0x4ec   : > { %2195 = vmatprep.subr.bf16.mxu0 %v2185_v35  ;;  %2248 = vmatprep.subr.bf16.mxu1 %v2191_v41 }
 0x4ef   : > { %2196 = vmatpush1.bf16.msra.mxu0 %v2182_v4  ;;  %2249 = vmatpush1.bf16.msra.mxu1 %v2188_v5 }
 0x4f0   : > { %3687 = vmatprep.subr.bf16.mxu0 %v3924_v9  ;;  %3715 = vmatprep.subr.bf16.mxu1 %v3925_v11 }
 0x4f1   : > { %2066 = vmatmul.mubr.bf16.gmra.mrb[36].mxu0 %v4486_v51  ;;  %2115 = vmatmul.mubr.bf16.gmra.mrb[36].mxu1 %v4488_v52  ;;  %v3926_v51 = vld [vmem:[%s4977_s13 + $0x200] sm:$0xff]  }
 0x4f2   : > { %2225 = vmatprep.mubr.bf16.mxu0 %v4040_v7  ;;  %2278 = vmatprep.mubr.bf16.mxu1 %v4040_v7  ;;  %v3927_v52 = vld [vmem:[%s4977_s13 + $0x280] sm:$0xff]  }
 0x4f9   : > { %3474 = vmatmul.mubr.msk.bf16.vlgmr.msra.gmra.mrb[40].mxu0 %vm553_vm2, %v4314_v48  ;;  %3476 = vmatmul.mubr.msk.bf16.vlgmr.msra.gmra.mrb[40].mxu1 %vm553_vm2, %v4314_v48 }
 0x4fa   : > { %2235 = vmatprep.mubr.bf16.mxu0 %v4040_v7  ;;  %2288 = vmatprep.mubr.bf16.mxu1 %v4040_v7 }
 0x4fb   : > { %3688 = vmatpush3.bf16.msra.mxu0 %v3926_v51  ;;  %3716 = vmatpush3.bf16.msra.mxu1 %v3927_v52 }
 0x4fc   : > { %3689 = vmatprep.subr.bf16.mxu0 %v3928_v39  ;;  %3717 = vmatprep.subr.bf16.mxu1 %v3929_v36 }
 0x4ff   : > { %3690 = vmatpush3.bf16.msra.mxu0 %v3930_v6  ;;  %3718 = vmatpush3.bf16.msra.mxu1 %v3931_v58 }
 0x500   : > { %3691 = vmatprep.subr.bf16.mxu0 %v3932_v16  ;;  %3719 = vmatprep.subr.bf16.mxu1 %v3933_v17 }
 0x501   : > { %3475 = vmatmul.mubr.msk.bf16.gmra.mrb[44].mxu0 %vm553_vm2, %v4338_v61  ;;  %3477 = vmatmul.mubr.msk.bf16.gmra.mrb[44].mxu1 %vm553_vm2, %v4338_v61 }
 0x503   : > { %3692 = vmatpush3.bf16.msra.mxu0 %v3934_v18  ;;  %3720 = vmatpush3.bf16.msra.mxu1 %v3935_v19 }
 0x504   : > { %3693 = vmatprep.subr.bf16.mxu0 %v3936_v20  ;;  %3721 = vmatprep.subr.bf16.mxu1 %v3937_v21 }
 0x507   : > { %3694 = vmatpush3.bf16.msra.mxu0 %v3938_v22  ;;  %3722 = vmatpush3.bf16.msra.mxu1 %v3939_v23 }
 0x508   : > { %3695 = vmatprep.subr.bf16.mxu0 %v3940_v24  ;;  %3723 = vmatprep.subr.bf16.mxu1 %v3941_v25 }
 0x50b   : > { %3696 = vmatpush3.bf16.msra.mxu0 %v3942_v26  ;;  %3724 = vmatpush3.bf16.msra.mxu1 %v3943_v27 }
 0x50c   : > { %3697 = vmatprep.subr.bf16.mxu0 %v3944_v28  ;;  %3725 = vmatprep.subr.bf16.mxu1 %v3945_v15 }
 0x50f   : > { %3698 = vmatpush3.bf16.msra.mxu0 %v3946_v57  ;;  %3726 = vmatpush3.bf16.msra.mxu1 %v3947_v29 }
 0x510   : > { %3699 = vmatprep.subr.bf16.mxu0 %v3948_v32  ;;  %3727 = vmatprep.subr.bf16.mxu1 %v3949_v33 }
 0x513   : > { %3700 = vmatpush3.bf16.msra.mxu0 %v3950_v43  ;;  %3728 = vmatpush3.bf16.msra.mxu1 %v3951_v45 }
 0x514   : > { %3701 = vmatprep.subr.bf16.mxu0 %v3952_v46  ;;  %3729 = vmatprep.subr.bf16.mxu1 %v3953_v47 }
 0x517   : > { %3702 = vmatpush3.bf16.msra.mxu0 %v3954_v38  ;;  %3730 = vmatpush3.bf16.msra.mxu1 %v3955_v14 }
 0x518   : > { %2751 = vmatprep.subr.bf16.mxu0 %v3511_v54  ;;  %2804 = vmatprep.subr.bf16.mxu1 %v3513_v55 }
 0x59c   : > { %v3591_v56 = vpop.f32.mrb[24].mxu0  ;;  %v3619_v63 = vpop.f32.mrb[24].mxu1 }
 0x59d   : > { %v3592_v0 = vpop.f32.mrb[25].mxu0  ;;  %v3620_v1 = vpop.f32.mrb[25].mxu1 }
 0x59e   : > { %v3593_v30 = vadd.f32 %v3592_v0, %v3591_v56  ;;  %v3621_v31 = vadd.f32 %v3620_v1, %v3619_v63  ;;  %v3594_v2 = vpop.f32.mrb[26].mxu0  ;;  %v3622_v3 = vpop.f32.mrb[26].mxu1 }
 0x59f   : > { %v3595_v35 = vpop.f32.mrb[27].mxu0  ;;  %v3623_v41 = vpop.f32.mrb[27].mxu1 }
 0x5a0   : > { %v1819_v4 = vadd.f32 %v3621_v31, %v3593_v30  ;;  %v3596_v5 = vadd.f32 %v3595_v35, %v3594_v2  ;;  %v3624_v9 = vadd.f32 %v3623_v41, %v3622_v3  ;;  %v2129_v2 = vld [vmem:[%s4976_s12 + $0x8] sm:$0xf] }
 0x5a2   : > { %v1822_v11 = vadd.f32 %v3624_v9, %v3596_v5  ;;  %v2134_v9 = vrot.slane %v2129_v2, %v4452_v34 }
 0x5a4   : > { %v3597_v51 = vpop.f32.mrb[28].mxu0  ;;  %v3625_v52 = vpop.f32.mrb[28].mxu1 }
 0x5a5   : > { %v3598_v39 = vpop.f32.mrb[29].mxu0  ;;  %v3626_v36 = vpop.f32.mrb[29].mxu1 }
 0x5a6   : > { %v3599_v6 = vadd.f32 %v3598_v39, %v3597_v51  ;;  %v3627_v58 = vadd.f32 %v3626_v36, %v3625_v52  ;;  %v3600_v16 = vpop.f32.mrb[30].mxu0  ;;  %v3628_v17 = vpop.f32.mrb[30].mxu1  ;;  %v2138_v39 = vrot.slane %v2129_v2, %v4459_v12  ;;  %v2146_v36 = vrot.slane %v2129_v2, %v4461_v37 }
 0x5a7   : > { %v3601_v18 = vpop.f32.mrb[31].mxu0  ;;  %v3629_v19 = vpop.f32.mrb[31].mxu1 }
 0x5a8   : > { %v1827_v20 = vadd.f32 %v3627_v58, %v3599_v6  ;;  %v3602_v21 = vadd.f32 %v3601_v18, %v3600_v16  ;;  %v3630_v22 = vadd.f32 %v3629_v19, %v3628_v17 }
 0x5aa   : > { %v1830_v23 = vadd.f32 %v3630_v22, %v3602_v21  ;;  %v2685_v21 = vld [vmem:[%s4975_s11 + $0xb0] sm:$0x11]  ;;  %v2686_v22 = vld [vmem:[%s4975_s11 + $0xb8] sm:$0x11] }
 0x5bc   : > { %v3647_v24 = vpop.f32.mrb[32].mxu0  ;;  %v3675_v25 = vpop.f32.mrb[32].mxu1 }
 0x5bd   : > { %v3648_v26 = vpop.f32.mrb[33].mxu0  ;;  %v3676_v27 = vpop.f32.mrb[33].mxu1 }
 0x5be   : > { %v3649_v28 = vadd.f32 %v3648_v26, %v3647_v24  ;;  %v3677_v15 = vadd.f32 %v3676_v27, %v3675_v25  ;;  %v3650_v57 = vpop.f32.mrb[34].mxu0  ;;  %v3678_v29 = vpop.f32.mrb[34].mxu1 }
 0x5bf   : > { %v3651_v32 = vpop.f32.mrb[35].mxu0  ;;  %v3679_v33 = vpop.f32.mrb[35].mxu1 }
 0x5c0   : > { %v2060_v43 = vadd.f32 %v3649_v28, %v1819_v4  ;;  %v3652_v45 = vadd.f32 %v3651_v32, %v3650_v57  ;;  %v3680_v46 = vadd.f32 %v3679_v33, %v3678_v29  ;;  %v3515_v33 = vcombine.high %v2685_v21, %v2685_v21 }
 0x5c2   : > { %v4758_v47 = vadd.f32 %v3677_v15, %v2060_v43  ;;  %v2063_v38 = vadd.f32 %v3652_v45, %v1822_v11  ;;  %v2142_v11 = vrot.slane %v2129_v2, %v4454_v10  ;;  %v3517_v43 = vcombine.high %v2686_v22, %v2686_v22 }
 0x5c4   : > { %v4760_v14 = vadd.f32 %v3680_v46, %v2063_v38  ;;  %v3653_v54 = vpop.f32.mrb[36].mxu0  ;;  %v3681_v55 = vpop.f32.mrb[36].mxu1 }
 0x5c5   : > { %v3654_v56 = vpop.f32.mrb[37].mxu0  ;;  %v3682_v63 = vpop.f32.mrb[37].mxu1 }
 0x5c6   : > { %v3655_v0 = vadd.f32 %v3654_v56, %v3653_v54  ;;  %v3683_v1 = vadd.f32 %v3682_v63, %v3681_v55  ;;  %v3656_v30 = vpop.f32.mrb[38].mxu0  ;;  %v3684_v31 = vpop.f32.mrb[38].mxu1 }
 0x5c7   : > { %v3657_v3 = vpop.f32.mrb[39].mxu0  ;;  %v3685_v35 = vpop.f32.mrb[39].mxu1 }
 0x5c8   : > { %v2068_v41 = vadd.f32 %v3655_v0, %v1827_v20  ;;  %v3658_v4 = vadd.f32 %v3657_v3, %v3656_v30  ;;  %v3686_v5 = vadd.f32 %v3685_v35, %v3684_v31  ;;  %v3514_v31 = vcombine.low %v2685_v21, %v2685_v21 }
 0x5ca   : > { %v4767_v51 = vadd.f32 %v3683_v1, %v2068_v41  ;;  %v2071_v52 = vadd.f32 %v3658_v4, %v1830_v23  ;;  %v3516_v4 = vcombine.low %v2686_v22, %v2686_v22  ;;  %v2740_v22 = vand.u32 %v3514_v31, %v4161_v8  ;;  %v3976_v31 = vld [vmem:[%s4977_s13 + $0x360] sm:$0xff]  }
 0x5cc   : > { %v4771_v6 = vadd.f32 %v3686_v5, %v2071_v52  ;;  %v2227_v58 = vpop.f32.mrb[40].mxu0  ;;  %v2280_v16 = vpop.f32.mrb[40].mxu1 }
 0x5cd   : > { %v2228_v17 = vadd.f32 %v2227_v58, %v2134_v9  ;;  %v2281_v18 = vadd.f32 %v2280_v16, %v2142_v11  ;;  %v2229_v19 = vpop.f32.mrb[41].mxu0  ;;  %v2282_v20 = vpop.f32.mrb[41].mxu1 }
 0x5ce   : > { %v2230_v23 = vadd.f32 %v2229_v19, %v2138_v39  ;;  %v2283_v24 = vadd.f32 %v2282_v20, %v2146_v36  ;;  %v2231_v25 = vpop.f32.mrb[42].mxu0  ;;  %v2284_v26 = vpop.f32.mrb[42].mxu1 }
 0x5cf   : > { %v2232_v27 = vadd.f32 %v2231_v25, %v2134_v9  ;;  %v2285_v28 = vadd.f32 %v2284_v26, %v2142_v11  ;;  %v2233_v15 = vpop.f32.mrb[43].mxu0  ;;  %v2286_v57 = vpop.f32.mrb[43].mxu1  ;;  %v2299_v45 = vmax.f32 %v2228_v17, 0.0  ;;  %v2301_v46 = vmax.f32 %v2281_v18, 0.0 }
 0x5d0   : > { %v2234_v29 = vadd.f32 %v2233_v15, %v2138_v39  ;;  %v2287_v32 = vadd.f32 %v2286_v57, %v2146_v36  ;;  %v2300_v55 = vmax.f32 %v2230_v23, 0.0  ;;  %v2302_v56 = vmax.f32 %v2283_v24, 0.0 }
 0x5d1   : > { %v2303_v38 = vmax.f32 %v2232_v27, 0.0  ;;  %v2305_v54 = vmax.f32 %v2285_v28, 0.0  ;;  %v2743_v17 = vand.u32 %v3515_v33, %v4161_v8  ;;  %v2749_v18 = vand.u32 %v3517_v43, %v4161_v8  ;;  %v3962_v43 = vld [vmem:[%s4977_s13 + $0x300] sm:$0xff]  }
 0x5d2   : > { %v2304_v63 = vmax.f32 %v2234_v29, 0.0  ;;  %v2306_v0 = vmax.f32 %v2287_v32, 0.0  ;;  %v2746_v57 = vand.u32 %v3516_v4, %v4161_v8  ;;  %v3981_v4 = vld [vmem:[%s4977_s13 + $0x3e8] sm:$0xff]  }
 0x5d3   : > { %v2315_v1 = vpack.c.bf16 %v2303_v38, %v2299_v45  ;;  %v2317_v30 = vpack.c.bf16 %v2305_v54, %v2301_v46  ;;  %v3963_v45 = vld [vmem:[%s4977_s13 + $0x380] sm:$0xff]   ;;  %v3964_v46 = vld [vmem:[%s4977_s13 + $0x348] sm:$0xff]  }
 0x5d4   : > { %v2316_v2 = vpack.c.bf16 %v2304_v63, %v2300_v55  ;;  %v2318_v3 = vpack.c.bf16 %v2306_v0, %v2302_v56  ;;  %v2237_v35 = vpop.f32.mrb[44].mxu0  ;;  %v2290_v41 = vpop.f32.mrb[44].mxu1  ;;  %v3965_v38 = vld [vmem:[%s4977_s13 + $0x3c8] sm:$0xff]   ;;  %v3969_v55 = vld [vmem:[%s4977_s13 + $0x3d0] sm:$0xff]   ;;  %v3972_v63 = vld [vmem:[%s4977_s13 + $0x358] sm:$0xff]  }
 0x5d5   : > { %v2238_v5 = vadd.f32 %v2237_v35, %v2134_v9  ;;  %v2291_v52 = vadd.f32 %v2290_v41, %v2142_v11  ;;  %v2239_v58 = vpop.f32.mrb[45].mxu0  ;;  %v2292_v16 = vpop.f32.mrb[45].mxu1  ;;  %v3966_v54 = vld [vmem:[%s4977_s13 + $0x308] sm:$0xff]   ;;  %v3971_v56 = vld [vmem:[%s4977_s13 + $0x390] sm:$0xff]   ;;  %v3973_v0 = vld [vmem:[%s4977_s13 + $0x3d8] sm:$0xff]  }
 0x5d6   : > { %v2240_v19 = vadd.f32 %v2239_v58, %v2138_v39  ;;  %v2293_v20 = vadd.f32 %v2292_v16, %v2146_v36  ;;  %v2241_v23 = vpop.f32.mrb[46].mxu0  ;;  %v2294_v24 = vpop.f32.mrb[46].mxu1  ;;  %2611 = vmatprep.mubr.bf16.mxu0 %v2316_v2  ;;  %2660 = vmatprep.mubr.bf16.mxu1 %v2318_v3  ;;  %v3977_v2 = vld [vmem:[%s4977_s13 + $0x3e0] sm:$0xff]   ;;  %v3980_v41 = vld [vmem:[%s4977_s13 + $0x368] sm:$0xff]   ;;  %v3984_v58 = vld [vmem:[%s4977_s13 + $0x370] sm:$0xff]  }
 0x5d7   : > { %v2242_v21 = vadd.f32 %v2241_v23, %v2134_v9  ;;  %v2295_v25 = vadd.f32 %v2294_v24, %v2142_v11  ;;  %v2243_v26 = vpop.f32.mrb[47].mxu0  ;;  %v2296_v27 = vpop.f32.mrb[47].mxu1  ;;  %2612 = vmatmul.mubr.bf16.vlgmr.msra.gmra.mrb[48].mxu0 %v2315_v1  ;;  %2661 = vmatmul.mubr.bf16.vlgmr.msra.gmra.mrb[48].mxu1 %v2317_v30  ;;  %v2307_v9 = vmax.f32 %v2238_v5, 0.0  ;;  %v2309_v11 = vmax.f32 %v2291_v52, 0.0  ;;  %v3974_v1 = vld [vmem:[%s4977_s13 + $0x318] sm:$0xff]   ;;  %v3978_v3 = vld [vmem:[%s4977_s13 + $0x320] sm:$0xff]  }
 0x5d8   : > { %v2244_v28 = vadd.f32 %v2243_v26, %v2138_v39  ;;  %v2297_v15 = vadd.f32 %v2296_v27, %v2146_v36  ;;  %2752 = vmatpush1.bf16.msra.mxu0 %v3510_v44  ;;  %2805 = vmatpush1.bf16.msra.mxu1 %v3512_v62  ;;  %v3960_v39 = vld [vmem:[%s4977_s13 + $0x340] sm:$0xff]   ;;  %v2308_v50 = vmax.f32 %v2240_v19, 0.0  ;;  %v2310_v44 = vmax.f32 %v2293_v20, 0.0  ;;  %v3975_v30 = vld [vmem:[%s4977_s13 + $0x398] sm:$0xff]   ;;  %v3982_v5 = vld [vmem:[%s4977_s13 + $0x328] sm:$0xff]  }
 0x5d9   : > { %v2311_v29 = vmax.f32 %v2242_v21, 0.0  ;;  %v2313_v32 = vmax.f32 %v2295_v25, 0.0  ;;  %2753 = vmatprep.subr.bf16.mxu0 %v2743_v17  ;;  %2806 = vmatprep.subr.bf16.mxu1 %v2749_v18  ;;  %v3979_v35 = vld [vmem:[%s4977_s13 + $0x3a0] sm:$0xff]   ;;  %v3983_v52 = vld [vmem:[%s4977_s13 + $0x3a8] sm:$0xff]   ;;  %v3985_v16 = vld [vmem:[%s4977_s13 + $0x3f0] sm:$0xff]  }
 0x5da   : > { %v2312_v40 = vmax.f32 %v2244_v28, 0.0  ;;  %v2314_v59 = vmax.f32 %v2297_v15, 0.0  ;;  %v3986_v17 = vld [vmem:[%s4977_s13 + $0x330] sm:$0xff]   ;;  %v3988_v19 = vld [vmem:[%s4977_s13 + $0x378] sm:$0xff]  }
 0x5db   : > { %v2319_v62 = vpack.c.bf16 %v2311_v29, %v2307_v9  ;;  %v2321_v8 = vpack.c.bf16 %v2313_v32, %v2309_v11  ;;  %v3987_v18 = vld [vmem:[%s4977_s13 + $0x3b0] sm:$0xff]   ;;  %v3989_v20 = vld [vmem:[%s4977_s13 + $0x3f8] sm:$0xff]  }
 0x5dc   : > { %v2320_v36 = vpack.c.bf16 %v2312_v40, %v2308_v50  ;;  %v2322_v33 = vpack.c.bf16 %v2314_v59, %v2310_v44  ;;  %2754 = vmatpush1.bf16.msra.mxu0 %v2740_v22  ;;  %2807 = vmatpush1.bf16.msra.mxu1 %v2746_v57  ;;  %v3990_v23 = vld [vmem:[%s4977_s13 + $0x338] sm:$0xff]  }
 0x5dd   : > { %3743 = vmatprep.subr.bf16.mxu0 %v3960_v39  ;;  %3771 = vmatprep.subr.bf16.mxu1 %v3961_v49  ;;  %v3991_v24 = vld [vmem:[%s4977_s13 + $0x3b8] sm:$0xff]  }
 0x5de   : > { %2619 = vmatprep.mubr.bf16.mxu0 %v2320_v36  ;;  %2668 = vmatprep.mubr.bf16.mxu1 %v2322_v33 }
 0x5df   : > { %2620 = vmatmul.mubr.bf16.gmra.mrb[52].mxu0 %v2319_v62  ;;  %2669 = vmatmul.mubr.bf16.gmra.mrb[52].mxu1 %v2321_v8 }
 0x5e0   : > { %2783 = vmatprep.mubr.bf16.mxu0 %v4040_v7  ;;  %2836 = vmatprep.mubr.bf16.mxu1 %v4040_v7 }
 0x5e7   : > { %3518 = vmatmul.mubr.msk.bf16.vlgmr.msra.gmra.mrb[56].mxu0 %vm553_vm2, %v4314_v48  ;;  %3520 = vmatmul.mubr.msk.bf16.vlgmr.msra.gmra.mrb[56].mxu1 %vm553_vm2, %v4314_v48  ;;  %v3967_v48 = vld [vmem:[%s4977_s13 + $0x388] sm:$0xff]  }
 0x5e8   : > { %2793 = vmatprep.mubr.bf16.mxu0 %v4040_v7  ;;  %2846 = vmatprep.mubr.bf16.mxu1 %v4040_v7  ;;  %v3968_v7 = vld [vmem:[%s4977_s13 + $0x350] sm:$0xff]  }
 0x5e9   : > { %3744 = vmatpush3.bf16.msra.mxu0 %v3962_v43  ;;  %3772 = vmatpush3.bf16.msra.mxu1 %v3963_v45 }
 0x5ea   : > { %3745 = vmatprep.subr.bf16.mxu0 %v3964_v46  ;;  %3773 = vmatprep.subr.bf16.mxu1 %v3965_v38  ;;  %v2687_v46 = vld [vmem:[%s4976_s12 + $0xc] sm:$0xf] }
 0x5ed   : > { %3746 = vmatpush3.bf16.msra.mxu0 %v3966_v54  ;;  %3774 = vmatpush3.bf16.msra.mxu1 %v3967_v48 }
 0x5ee   : > { %3747 = vmatprep.subr.bf16.mxu0 %v3968_v7  ;;  %3775 = vmatprep.subr.bf16.mxu1 %v3969_v55  ;;  %v2700_v55 = vrot.slane %v2687_v46, %v4454_v10 }
 0x5ef   : > { %3519 = vmatmul.mubr.msk.bf16.gmra.mrb[60].mxu0 %vm553_vm2, %v4338_v61  ;;  %3521 = vmatmul.mubr.msk.bf16.gmra.mrb[60].mxu1 %vm553_vm2, %v4338_v61  ;;  %v3970_v61 = vld [vmem:[%s4977_s13 + $0x310] sm:$0xff]  }
 0x5f1   : > { %3748 = vmatpush3.bf16.msra.mxu0 %v3970_v61  ;;  %3776 = vmatpush3.bf16.msra.mxu1 %v3971_v56 }
 0x5f2   : > { %3749 = vmatprep.subr.bf16.mxu0 %v3972_v63  ;;  %3777 = vmatprep.subr.bf16.mxu1 %v3973_v0  ;;  %v2696_v63 = vrot.slane %v2687_v46, %v4459_v12  ;;  %v2704_v0 = vrot.slane %v2687_v46, %v4461_v37 }
 0x5f5   : > { %3750 = vmatpush3.bf16.msra.mxu0 %v3974_v1  ;;  %3778 = vmatpush3.bf16.msra.mxu1 %v3975_v30 }
 0x5f6   : > { %3751 = vmatprep.subr.bf16.mxu0 %v3976_v31  ;;  %3779 = vmatprep.subr.bf16.mxu1 %v3977_v2 }
 0x5f9   : > { %3752 = vmatpush3.bf16.msra.mxu0 %v3978_v3  ;;  %3780 = vmatpush3.bf16.msra.mxu1 %v3979_v35 }
 0x5fa   : > { %3753 = vmatprep.subr.bf16.mxu0 %v3980_v41  ;;  %3781 = vmatprep.subr.bf16.mxu1 %v3981_v4 }
 0x5fd   : > { %3754 = vmatpush3.bf16.msra.mxu0 %v3982_v5  ;;  %3782 = vmatpush3.bf16.msra.mxu1 %v3983_v52 }
 0x5fe   : > { %3755 = vmatprep.subr.bf16.mxu0 %v3984_v58  ;;  %3783 = vmatprep.subr.bf16.mxu1 %v3985_v16 }
 0x601   : > { %3756 = vmatpush3.bf16.msra.mxu0 %v3986_v17  ;;  %3784 = vmatpush3.bf16.msra.mxu1 %v3987_v18 }
 0x602   : > { %3757 = vmatprep.subr.bf16.mxu0 %v3988_v19  ;;  %3785 = vmatprep.subr.bf16.mxu1 %v3989_v20 }
 0x605   : > { %3758 = vmatpush3.bf16.msra.mxu0 %v3990_v23  ;;  %3786 = vmatpush3.bf16.msra.mxu1 %v3991_v24 }
 0x6aa   : > { %v3703_v21 = vpop.f32.mrb[48].mxu0  ;;  %v3731_v25 = vpop.f32.mrb[48].mxu1 }
 0x6ab   : > { %v3704_v26 = vpop.f32.mrb[49].mxu0  ;;  %v3732_v27 = vpop.f32.mrb[49].mxu1 }
 0x6ac   : > { %v3705_v22 = vadd.f32 %v3704_v26, %v3703_v21  ;;  %v3733_v28 = vadd.f32 %v3732_v27, %v3731_v25  ;;  %v3706_v15 = vpop.f32.mrb[50].mxu0  ;;  %v3734_v57 = vpop.f32.mrb[50].mxu1 }
 0x6ad   : > { %v3707_v9 = vpop.f32.mrb[51].mxu0  ;;  %v3735_v11 = vpop.f32.mrb[51].mxu1 }
 0x6ae   : > { %v2663_v29 = vadd.f32 %v3733_v28, %v3705_v22  ;;  %v3708_v32 = vadd.f32 %v3707_v9, %v3706_v15  ;;  %v3736_v39 = vadd.f32 %v3735_v11, %v3734_v57 }
 0x6b0   : > { %v4898_v49 = vadd.f32 %v2663_v29, %v4758_v47  ;;  %v2666_v50 = vadd.f32 %v3736_v39, %v3708_v32 }
 0x6b2   : > { %v4901_v44 = vadd.f32 %v2666_v50, %v4760_v14  ;;  %v3709_v40 = vpop.f32.mrb[52].mxu0  ;;  %v3737_v59 = vpop.f32.mrb[52].mxu1  ;;  %v2692_v14 = vrot.slane %v2687_v46, %v4452_v34 }
 0x6b3   : > { %v3710_v62 = vpop.f32.mrb[53].mxu0  ;;  %v3738_v8 = vpop.f32.mrb[53].mxu1 }
 0x6b4   : > { %v3711_v36 = vadd.f32 %v3710_v62, %v3709_v40  ;;  %v3739_v33 = vadd.f32 %v3738_v8, %v3737_v59  ;;  %v3712_v43 = vpop.f32.mrb[54].mxu0  ;;  %v3740_v45 = vpop.f32.mrb[54].mxu1 }
 0x6b5   : > { %v3713_v38 = vpop.f32.mrb[55].mxu0  ;;  %v3741_v54 = vpop.f32.mrb[55].mxu1 }
 0x6b6   : > { %v2671_v47 = vadd.f32 %v3739_v33, %v3711_v36  ;;  %v3714_v48 = vadd.f32 %v3713_v38, %v3712_v43  ;;  %v3742_v7 = vadd.f32 %v3741_v54, %v3740_v45 }
 0x6b8   : > { %v4909_v61 = vadd.f32 %v2671_v47, %v4767_v51  ;;  %v2674_v56 = vadd.f32 %v3742_v7, %v3714_v48 }
 0x6ba   : > { %v4914_v1 = vadd.f32 %v2674_v56, %v4771_v6  ;;  %v2785_v30 = vpop.f32.mrb[56].mxu0  ;;  %v2838_v31 = vpop.f32.mrb[56].mxu1 }
 0x6bb   : > { %v2786_v2 = vadd.f32 %v2785_v30, %v2692_v14  ;;  %v2839_v3 = vadd.f32 %v2838_v31, %v2700_v55  ;;  %v2787_v35 = vpop.f32.mrb[57].mxu0  ;;  %v2840_v41 = vpop.f32.mrb[57].mxu1 }
 0x6bc   : > { %v2788_v34 = vadd.f32 %v2787_v35, %v2696_v63  ;;  %v2841_v4 = vadd.f32 %v2840_v41, %v2704_v0  ;;  %v2789_v10 = vpop.f32.mrb[58].mxu0  ;;  %v2842_v5 = vpop.f32.mrb[58].mxu1 }
 0x6bd   : > { %v2790_v51 = vadd.f32 %v2789_v10, %v2692_v14  ;;  %v2843_v52 = vadd.f32 %v2842_v5, %v2700_v55  ;;  %v2791_v58 = vpop.f32.mrb[59].mxu0  ;;  %v2844_v16 = vpop.f32.mrb[59].mxu1  ;;  %v2857_v37 = vmax.f32 %v2786_v2, 0.0  ;;  %v2859_v18 = vmax.f32 %v2839_v3, 0.0 }
 0x6be   : > { %v2792_v12 = vadd.f32 %v2791_v58, %v2696_v63  ;;  %v2845_v17 = vadd.f32 %v2844_v16, %v2704_v0  ;;  %v2858_v20 = vmax.f32 %v2788_v34, 0.0  ;;  %v2860_v23 = vmax.f32 %v2841_v4, 0.0  ;;  %v3554_v16 = vld [vmem:[%s4978_s14] ss:$0 sm:$0xff] }
 0x6bf   : > { %v2861_v6 = vmax.f32 %v2790_v51, 0.0  ;;  %v2863_v19 = vmax.f32 %v2843_v52, 0.0 }
 0x6c0   : > { %v2862_v24 = vmax.f32 %v2792_v12, 0.0  ;;  %v2864_v21 = vmax.f32 %v2845_v17, 0.0 }
 0x6c1   : > { %v2873_v25 = vpack.c.bf16 %v2861_v6, %v2857_v37  ;;  %v2875_v26 = vpack.c.bf16 %v2863_v19, %v2859_v18 }
 0x6c2   : > { %v2874_v27 = vpack.c.bf16 %v2862_v24, %v2858_v20  ;;  %v2876_v22 = vpack.c.bf16 %v2864_v21, %v2860_v23  ;;  %v2795_v28 = vpop.f32.mrb[60].mxu0  ;;  %v2848_v15 = vpop.f32.mrb[60].mxu1 }
 0x6c3   : > { %v2796_v57 = vadd.f32 %v2795_v28, %v2692_v14  ;;  %v2849_v9 = vadd.f32 %v2848_v15, %v2700_v55  ;;  %v2797_v11 = vpop.f32.mrb[61].mxu0  ;;  %v2850_v29 = vpop.f32.mrb[61].mxu1 }
 0x6c4   : > { %v2798_v32 = vadd.f32 %v2797_v11, %v2696_v63  ;;  %v2851_v39 = vadd.f32 %v2850_v29, %v2704_v0  ;;  %v2799_v50 = vpop.f32.mrb[62].mxu0  ;;  %v2852_v40 = vpop.f32.mrb[62].mxu1  ;;  %3169 = vmatprep.mubr.bf16.mxu0 %v2874_v27  ;;  %3218 = vmatprep.mubr.bf16.mxu1 %v2876_v22 }
 0x6c5   : > { %v2800_v59 = vadd.f32 %v2799_v50, %v2692_v14  ;;  %v2853_v62 = vadd.f32 %v2852_v40, %v2700_v55  ;;  %v2801_v8 = vpop.f32.mrb[63].mxu0  ;;  %v2854_v36 = vpop.f32.mrb[63].mxu1  ;;  %3170 = vmatmul.mubr.bf16.vlgmr.msra.gmra.mrb[64].mxu0 %v2873_v25  ;;  %3219 = vmatmul.mubr.bf16.vlgmr.msra.gmra.mrb[64].mxu1 %v2875_v26  ;;  %v2865_v45 = vmax.f32 %v2796_v57, 0.0  ;;  %v2867_v46 = vmax.f32 %v2849_v9, 0.0 }
 0x6c6   : > { %v2802_v33 = vadd.f32 %v2801_v8, %v2696_v63  ;;  %v2855_v43 = vadd.f32 %v2854_v36, %v2704_v0  ;;  %v2866_v47 = vmax.f32 %v2798_v32, 0.0  ;;  %v2868_v48 = vmax.f32 %v2851_v39, 0.0 }
 0x6c7   : > { %v2869_v38 = vmax.f32 %v2800_v59, 0.0  ;;  %v2871_v54 = vmax.f32 %v2853_v62, 0.0 }
 0x6c8   : > { %v2870_v7 = vmax.f32 %v2802_v33, 0.0  ;;  %v2872_v56 = vmax.f32 %v2855_v43, 0.0 }
 0x6c9   : > { %v2877_v30 = vpack.c.bf16 %v2869_v38, %v2865_v45  ;;  %v2879_v31 = vpack.c.bf16 %v2871_v54, %v2867_v46 }
 0x6ca   : > { %v2878_v2 = vpack.c.bf16 %v2870_v7, %v2866_v47  ;;  %v2880_v3 = vpack.c.bf16 %v2872_v56, %v2868_v48 }
 0x6cc   : > { %3177 = vmatprep.mubr.bf16.mxu0 %v2878_v2  ;;  %3226 = vmatprep.mubr.bf16.mxu1 %v2880_v3 }
 0x6cd   : > { %3178 = vmatmul.mubr.bf16.gmra.mrb[68].mxu0 %v2877_v30  ;;  %3227 = vmatmul.mubr.bf16.gmra.mrb[68].mxu1 %v2879_v31 }
 0x798   : > { %v3759_v14 = vpop.f32.mrb[64].mxu0  ;;  %v3787_v55 = vpop.f32.mrb[64].mxu1 }
 0x799   : > { %v3760_v63 = vpop.f32.mrb[65].mxu0  ;;  %v3788_v0 = vpop.f32.mrb[65].mxu1 }
 0x79a   : > { %v3761_v35 = vadd.f32 %v3760_v63, %v3759_v14  ;;  %v3789_v41 = vadd.f32 %v3788_v0, %v3787_v55  ;;  %v3762_v34 = vpop.f32.mrb[66].mxu0  ;;  %v3790_v4 = vpop.f32.mrb[66].mxu1 }
 0x79b   : > { %v3763_v10 = vpop.f32.mrb[67].mxu0  ;;  %v3791_v5 = vpop.f32.mrb[67].mxu1 }
 0x79c   : > { %v3221_v51 = vadd.f32 %v3789_v41, %v3761_v35  ;;  %v3764_v52 = vadd.f32 %v3763_v10, %v3762_v34  ;;  %v3792_v58 = vadd.f32 %v3791_v5, %v3790_v4 }
 0x79e   : > { %v3235_v12 = vadd.f32 %v3221_v51, %v4898_v49  ;;  %v3224_v17 = vadd.f32 %v3792_v58, %v3764_v52 }
 0x7a0   : > { %v3236_v37 = vadd.f32 %v3224_v17, %v4901_v44  ;;  %v3765_v18 = vpop.f32.mrb[68].mxu0  ;;  %v3793_v6 = vpop.f32.mrb[68].mxu1  ;;  %v3246_v19 = vadd.f32 %v3554_v16, %v3235_v12  ;;  %v3555_v12 = vld [vmem:[%s4979_s15] ss:$0 sm:$0xff] }
 0x7a1   : > { %v3766_v20 = vpop.f32.mrb[69].mxu0  ;;  %v3794_v23 = vpop.f32.mrb[69].mxu1 }
 0x7a2   : > { %v3767_v24 = vadd.f32 %v3766_v20, %v3765_v18  ;;  %v3795_v21 = vadd.f32 %v3794_v23, %v3793_v6  ;;  %v3768_v25 = vpop.f32.mrb[70].mxu0  ;;  %v3796_v26 = vpop.f32.mrb[70].mxu1  ;;  %v3250_v27 = vadd.f32 %v3246_v19, %v4306_v42  ;;  %v3247_v22 = vadd.f32 %v3554_v16, %v3236_v37  ;;  %v3556_v37 = vld [vmem:[%s4980_s16] ss:$0 sm:$0xff] }
 0x7a3   : > { %v3769_v28 = vpop.f32.mrb[71].mxu0  ;;  %v3797_v15 = vpop.f32.mrb[71].mxu1 }
 0x7a4   : > { %v3229_v57 = vadd.f32 %v3795_v21, %v3767_v24  ;;  %v3770_v9 = vadd.f32 %v3769_v28, %v3768_v25  ;;  %v3798_v49 = vadd.f32 %v3797_v15, %v3796_v26  ;;  %v3256_v11 = vsel %vm553_vm2, %v3250_v27, 0.0 }
 0x7a5   : > { %3257 = vadd.xlane.f32.xlu0 %v3256_v11  ;;  %v3251_v44 = vadd.f32 %v3247_v22, %v4308_v13 }
 0x7a6   : > { %v3237_v29 = vadd.f32 %v3229_v57, %v4909_v61  ;;  %v3232_v32 = vadd.f32 %v3798_v49, %v3770_v9 }
 0x7a7   : > { %v3259_v39 = vsel %vm553_vm2, %v3251_v44, 0.0 }
 0x7a8   : > { %v3238_v50 = vadd.f32 %v3232_v32, %v4914_v1  ;;  %3260 = vadd.xlane.f32.xlu1 %v3259_v39  ;;  %v3248_v42 = vadd.f32 %v3554_v16, %v3237_v29 }
 0x7aa   : > { %v3252_v40 = vadd.f32 %v3248_v42, %v4334_v60  ;;  %v3249_v59 = vadd.f32 %v3554_v16, %v3238_v50 }
 0x7ac   : > { %v3262_v62 = vsel %vm553_vm2, %v3252_v40, 0.0  ;;  %v3253_v8 = vadd.f32 %v3249_v59, %v4324_v53 }
 0x7ad   : > { %3263 = vadd.xlane.f32.xlu0 %v3262_v62 }
 0x7ae   : > { %v3265_v36 = vsel %vm553_vm2, %v3253_v8, 0.0 }
 0x7af   : > { %3266 = vadd.xlane.f32.xlu1 %v3265_v36 }
 0x832   : > { %v3258_v13 = vpop.xlane.xlu0 %3257 }
 0x833   : > { %v3268_v61 = vmul.f32 0.05882353, %v3258_v13 }
 0x835   : > { %v3272_v33 = vsub.f32 %v3250_v27, %v3268_v61  ;;  %v3261_v43 = vpop.xlane.xlu1 %3260 }
 0x836   : > { %v3269_v45 = vmul.f32 0.05882353, %v3261_v43 }
 0x837   : > { %v3276_v46 = vmul.f32 %v3272_v33, %v3272_v33 }
 0x838   : > { %v3273_v1 = vsub.f32 %v3251_v44, %v3269_v45 }
 0x839   : > { %v3280_v38 = vsel %vm553_vm2, %v3276_v46, 0.0 }
 0x83a   : > { %3281 = vadd.xlane.f32.xlu0 %v3280_v38  ;;  %v3264_v60 = vpop.xlane.xlu0 %3263  ;;  %v3277_v54 = vmul.f32 %v3273_v1, %v3273_v1 }
 0x83b   : > { %v3270_v47 = vmul.f32 0.05882353, %v3264_v60 }
 0x83c   : > { %v3283_v48 = vsel %vm553_vm2, %v3277_v54, 0.0  ;;  %v3267_v53 = vpop.xlane.xlu1 %3266 }
 0x83d   : > { %v3274_v7 = vsub.f32 %v3252_v40, %v3270_v47  ;;  %3284 = vadd.xlane.f32.xlu1 %v3283_v48  ;;  %v3271_v56 = vmul.f32 0.05882353, %v3267_v53 }
 0x83f   : > { %v3275_v30 = vsub.f32 %v3253_v8, %v3271_v56  ;;  %v3278_v31 = vmul.f32 %v3274_v7, %v3274_v7 }
 0x841   : > { %v3286_v2 = vsel %vm553_vm2, %v3278_v31, 0.0  ;;  %v3279_v3 = vmul.f32 %v3275_v30, %v3275_v30 }
 0x842   : > { %3287 = vadd.xlane.f32.xlu0 %v3286_v2 }
 0x843   : > { %v3289_v14 = vsel %vm553_vm2, %v3279_v3, 0.0 }
 0x844   : > { %3290 = vadd.xlane.f32.xlu1 %v3289_v14 }
 0x8c7   : > { %v3282_v55 = vpop.xlane.xlu0 %3281 }
 0x8c8   : > { %v3292_v63 = vmul.f32 0.05882353, %v3282_v55 }
 0x8ca   : > { %v3296_v0 = vadd.f32 1e-05, %v3292_v63  ;;  %v3285_v35 = vpop.xlane.xlu1 %3284 }
 0x8cb   : > { %v3293_v41 = vmul.f32 0.05882353, %v3285_v35 }
 0x8cc   : > { %4024 = vrsqrt.f32 %v3296_v0 }
 0x8cd   : > { %v3297_v34 = vadd.f32 1e-05, %v3293_v41 }
 0x8cf   : > { %4026 = vrsqrt.f32 %v3297_v34  ;;  %v3288_v4 = vpop.xlane.xlu0 %3287 }
 0x8d0   : > { %v3294_v10 = vmul.f32 0.05882353, %v3288_v4 }
 0x8d1   : > { %v3291_v5 = vpop.xlane.xlu1 %3290 }
 0x8d2   : > { %v3298_v51 = vadd.f32 1e-05, %v3294_v10  ;;  %v3295_v52 = vmul.f32 0.05882353, %v3291_v5 }
 0x8d4   : > { %4028 = vrsqrt.f32 %v3298_v51  ;;  %v3299_v58 = vadd.f32 1e-05, %v3295_v52 }
 0x8d6   : > { %v4025_v16 = vpop.eup %4024  ;;  %4030 = vrsqrt.f32 %v3299_v58 }
 0x8d7   : > { %v3304_v17 = vmul.f32 %v4025_v16, %v3272_v33 }
 0x8d9   : > { %v4027_v18 = vpop.eup %4026  ;;  %v3314_v6 = vmul.f32 %v3555_v12, %v3304_v17 }
 0x8da   : > { %v3305_v19 = vmul.f32 %v4027_v18, %v3273_v1 }
 0x8db   : > { %v3324_v20 = vadd.f32 %v3556_v37, %v3314_v6 }
 0x8dc   : > { %v3315_v23 = vmul.f32 %v3555_v12, %v3305_v19 }
 0x8dd   : > { %3328 = vst.msk [vmem:[#allocation2] sm:$0xff] %vm553_vm2, %v3324_v20  ;;  %3332 = vst.msk [vmem:[%s4981_s17] sm:$0xff] %vm553_vm2, %v3324_v20 }
 0x8de   : > { %v4029_v24 = vpop.eup %4028  ;;  %v3325_v21 = vadd.f32 %v3556_v37, %v3315_v23 }
 0x8df   : > { %v3306_v25 = vmul.f32 %v4029_v24, %v3274_v7 }
 0x8e0   : > { %v4031_v26 = vpop.eup %4030  ;;  %3329 = vst.msk [vmem:[#allocation2 + $0x8] sm:$0xff] %vm553_vm2, %v3325_v21  ;;  %3333 = vst.msk [vmem:[%s4981_s17 + $0x8] sm:$0xff] %vm553_vm2, %v3325_v21 }
 0x8e1   : > { %v3316_v27 = vmul.f32 %v3555_v12, %v3306_v25  ;;  %v3307_v22 = vmul.f32 %v4031_v26, %v3275_v30 }
 0x8e3   : > { %v3326_v28 = vadd.f32 %v3556_v37, %v3316_v27  ;;  %v3317_v15 = vmul.f32 %v3555_v12, %v3307_v22 }
 0x8e5   : > { %3330 = vst.msk [vmem:[#allocation2 + $0x10] sm:$0xff] %vm553_vm2, %v3326_v28  ;;  %3334 = vst.msk [vmem:[%s4981_s17 + $0x10] sm:$0xff] %vm553_vm2, %v3326_v28  ;;  %v3327_v57 = vadd.f32 %v3556_v37, %v3317_v15 }
 0x8e7   : > { %3331 = vst.msk [vmem:[#allocation2 + $0x18] sm:$0xff] %vm553_vm2, %v3327_v57  ;;  %3335 = vst.msk [vmem:[%s4981_s17 + $0x18] sm:$0xff] %vm553_vm2, %v3327_v57 }
 0x8e8 PF: > { %s27_s24 = sadd.s32 1, %s4038_s24  }
 0x8e9   : > { %p24_p4 = scmp.ge.s32.totalorder %s27_s24, 4  }
 0x8eb   :  { %26 = sbr.rel (!%p24_p4) target bundleno = 3 (0x3), region = 115 }

</bundles_post_ra>
